<compile_context>
chip_gen: v7x
topology: tpu7x:2x2x1
jax: 0.10.0
libtpu: 0.0.40
codegen_flags: <defaults>
</compile_context>

<pallas_src>
import jax
import jax.numpy as jnp
from jax import lax
from jax.experimental import pallas as pl
from jax.experimental.pallas import tpu as pltpu

BN_EPS = 1e-5


# --------------------------------------------------------------------------
# Fused kernel: initial_conv + residual blocks + ConvTranspose3d + ReLU
# --------------------------------------------------------------------------
def _make_fused_kernel(D, H, W, C, o_c, num_blocks):
    DH, WC = D * H, W * C
    row_up = 4 * W * o_c          # lane width of each kd output half (128 here)

    def conv9(pad_ref, w_ref, acc):
        """3x3x3 conv as 9 accumulating lane-dense matmuls.

        kw taps and the W zero-padding are folded into banded (Toeplitz-over-W)
        weights, so each (kd, kh) tap is one (DH, WC) x (WC, WC) bf16 dot with
        f32 accumulation.  `acc` already carries the bias (no zeros fill, no
        separate bias add).
        # TODO(synk): for larger volumes, concatenate the 9 banded taps along K
        # (single K = 9*WC dot) and fold extra D planes / batch rows into M to
        # raise MXU utilization; at demo shapes the kernel is overhead-bound.
        """
        for t in range(9):
            kd, kh = divmod(t, 3)
            xs = pad_ref[kd:kd + D, kh:kh + H, :].reshape(DH, WC)
            acc = acc + jnp.dot(xs.astype(jnp.bfloat16), w_ref[t],
                                preferred_element_type=jnp.float32)
        return acc

    def kernel(*refs):
        x_ref = refs[0]
        w_init, b_init = refs[1], refs[2]
        blk = refs[3:3 + 6 * num_blocks]
        w_up = refs[3 + 6 * num_blocks]
        b_up = refs[4 + 6 * num_blocks]
        o_ref = refs[5 + 6 * num_blocks]
        pad_ref = refs[6 + 6 * num_blocks]     # (D+2, H+2, W*C) f32 halo scratch
        h_ref = refs[7 + 6 * num_blocks]       # (D*H, W*C) f32 residual carry

        # Zero once per grid step: only the halo must stay zero; the interior
        # is fully rewritten before every conv stage.
        pad_ref[...] = jnp.zeros_like(pad_ref)

        # ---- initial_conv: Conv3d(C, C, 3, padding=1), no activation --------
        pad_ref[1:D + 1, 1:H + 1, :] = x_ref[0]
        h_ref[...] = conv9(pad_ref, w_init, b_init[...])

        # ---- residual blocks -------------------------------------------------
        for i in range(num_blocks):
            wA, bA, wB, bB, wP, bP = blk[6 * i:6 * i + 6]

            # stage A: conv1 (1x1, composed into conv2) + conv2 + BN1 + SiLU.
            # bA is the precomputed spatial bias field that carries conv1's
            # bias correctly through conv2's zero padding.
            pad_ref[1:D + 1, 1:H + 1, :] = h_ref[...].reshape(D, H, WC)
            z = conv9(pad_ref, wA, bA[...].reshape(DH, WC))
            z = z * jax.nn.sigmoid(z)                       # SiLU (EUP path)

            # stage B: conv3 + BN2 + SiLU.
            pad_ref[1:D + 1, 1:H + 1, :] = z.reshape(D, H, WC)
            y = conv9(pad_ref, wB, bB[...])
            y = y * jax.nn.sigmoid(y)

            # conv4 (1x1) + residual add, fused.
            h_ref[...] = (h_ref[...] + bP[...]
                          + jnp.dot(y.astype(jnp.bfloat16), wP[...],
                                    preferred_element_type=jnp.float32))

        # ---- ConvTranspose3d(C, o_c, 2, stride=2) + ReLU ---------------------
        # Single N = 8*W*o_c dot (columns ordered (kd, kh, w, kw, co)) feeding
        # the full-width MXU; the two kd halves are stored 128-lane dense into
        # an output layout whose pixel shuffle is a pure reshape.
        u = jnp.dot(h_ref[...].astype(jnp.bfloat16), w_up[...],
                    preferred_element_type=jnp.float32) + b_up[...]
        u = jnp.maximum(u, 0.0)
        o_ref[0, :, 0, :, :] = u[:, :row_up].reshape(D, H, row_up)
        o_ref[0, :, 1, :, :] = u[:, row_up:].reshape(D, H, row_up)

    return kernel


# --------------------------------------------------------------------------
# pallas_call wrapper
# --------------------------------------------------------------------------
def _vmem_capacity_bytes():
    """Per-core VMEM capacity; falls back to the smallest generation (v7x)."""
    try:
        cap = getattr(pltpu.get_tpu_info(), "vmem_capacity_bytes", None)
        if cap:
            return int(cap)
    except Exception:
        pass
    return 64 * 1024 * 1024


def upconv3d_block_forward(x, kp):
    """x: (N, D, H, W, C) float32.  Returns (N, 2D, 2H, 2W, o_c) float32."""
    N, D, H, W, C = x.shape
    WC = W * C
    o_c = kp["up_w"].shape[1] // (8 * W)
    row_up = 4 * W * o_c
    num_blocks = len(kp["blocks"])

    x_m = x.reshape(N, D, H, WC).astype(jnp.float32)   # free reshape, no pad

    args = [x_m, kp["init_w"], kp["init_b"]]
    for blk in kp["blocks"]:
        args += [blk["wA"], blk["bA"], blk["wB"], blk["bB"], blk["wP"], blk["bP"]]
    args += [kp["up_w"], kp["up_b"]]

    def const_spec(a):
        return pl.BlockSpec(a.shape, lambda n, _nd=a.ndim: (0,) * _nd)

    in_specs = [pl.BlockSpec((1, D, H, WC), lambda n: (n, 0, 0, 0))]
    in_specs += [const_spec(a) for a in args[1:]]

    # Generation-aware VMEM gate (v7x has 64 MiB/TC vs 128 MiB on v5e/v6e).
    weight_bytes = sum(int(a.size) * a.dtype.itemsize for a in args[1:])
    io_bytes = D * H * WC * 4 + D * 2 * H * row_up * 4
    scratch_bytes = ((D + 2) * (H + 2) * WC + D * H * WC) * 4
    footprint = 2 * (weight_bytes + io_bytes) + scratch_bytes   # 2x: dbl buffer
    vmem_limit = min(_vmem_capacity_bytes() // 2, 64 * 1024 * 1024)
    assert footprint < vmem_limit, (footprint, vmem_limit)

    out = pl.pallas_call(
        _make_fused_kernel(D, H, W, C, o_c, num_blocks),
        out_shape=jax.ShapeDtypeStruct((N, D, 2, H, row_up), jnp.float32),
        grid_spec=pltpu.PrefetchScalarGridSpec(
            num_scalar_prefetch=0,
            grid=(N,),
            in_specs=in_specs,
            out_specs=pl.BlockSpec((1, D, 2, H, row_up),
                                   lambda n: (n, 0, 0, 0, 0)),
            scratch_shapes=[pltpu.VMEM((D + 2, H + 2, WC), jnp.float32),
                            pltpu.VMEM((D * H, WC), jnp.float32)]),
        compiler_params=pltpu.CompilerParams(
            dimension_semantics=("parallel",),
            vmem_limit_bytes=vmem_limit),
    )(*args)

    # Output memory order is (n, d, kd, h, kh, w, kw, co): the transposed-conv
    # pixel shuffle is a pure reshape -- no XLA transpose, no extra HBM pass.
    return out.reshape(N, 2 * D, 2 * H, 2 * W, o_c)


# --------------------------------------------------------------------------
# Host-side weight preparation (BN fold, 1x1 composition, banded layout)
# --------------------------------------------------------------------------
def prepare_kernel_params(raw, D, H, W):
    """Fold BN (eval) into the weights, compose the 1x1 convs, band over W and
    pre-compute the spatial bias field that carries conv1's bias through
    conv2's zero padding.  MXU operands are bf16; biases stay f32."""
    bf16 = jnp.bfloat16
    C = raw["init_w"].shape[0]
    o_c = raw["up_w"].shape[1]
    WC = W * C

    def taps_from_torch(w):                 # (Cout, Cin, 3,3,3) -> (3,3,3,Cin,Cout)
        return jnp.transpose(w, (2, 3, 4, 1, 0))

    def banded(taps):                       # (3,3,3,Cin,Cout) -> (9, W*Cin, W*Cout)
        # kw taps AND the W zero-padding are folded into a Toeplitz band, so the
        # kernel needs no W halo and every tap is one lane-dense matmul.
        # TODO(synk): band over a fixed W-tile (with halo) once W*Cout >= 128 to
        # cap the O(W^2) zero fraction / weight footprint at large volumes.
        mats = []
        for kd in range(3):
            for kh in range(3):
                m = sum(jnp.kron(jnp.eye(W, W, k=1 - kw, dtype=jnp.float32),
                                 taps[kd, kh, kw]) for kw in range(3))
                mats.append(m)
        return jnp.stack(mats)

    def block_diag(m):                      # (Cin, Cout) -> (W*Cin, W*Cout)
        return jnp.kron(jnp.eye(W, dtype=jnp.float32), m)

    def bn_fold(bn):
        scale = bn["gamma"] / jnp.sqrt(bn["var"] + BN_EPS)
        return scale, bn["beta"] - bn["mean"] * scale

    def ones_field(bias_taps, b_uniform):   # (3,3,3,C), (C,) -> (D, H, W*C) f32
        ones = jnp.ones((1, D, H, W, 1), jnp.float32)
        ker = bias_taps[:, :, :, None, :]                        # DHWIO, I=1
        f = lax.conv_general_dilated(
            ones, ker, window_strides=(1, 1, 1),
            padding=((1, 1), (1, 1), (1, 1)),
            dimension_numbers=("NDHWC", "DHWIO", "NDHWC"))[0] + b_uniform
        return f.reshape(D, H, WC).astype(jnp.float32)

    kp = {
        "init_w": banded(taps_from_torch(raw["init_w"])).astype(bf16),
        "init_b": jnp.tile(raw["init_b"], W).reshape(1, WC).astype(jnp.float32),
        "blocks": [],
    }

    for rb in raw["blocks"]:
        s1, t1 = bn_fold(rb["bn1"])
        s2, t2 = bn_fold(rb["bn2"])
        taps2 = taps_from_torch(rb["w2"]) * s1           # BN1 scale folded
        taps3 = taps_from_torch(rb["w3"]) * s2           # BN2 scale folded
        b2f = rb["b2"] * s1 + t1
        b3f = rb["b3"] * s2 + t2

        # Compose conv1 (1x1) into conv2; conv1's bias becomes a spatial field.
        w1 = rb["w1"][:, :, 0, 0, 0].T                   # (Cin, Cmid)
        taps_a = jnp.einsum("ij,dhwjk->dhwik", w1, taps2)
        bias_taps = jnp.einsum("j,dhwjk->dhwk", rb["b1"], taps2)

        w4 = rb["w4"][:, :, 0, 0, 0].T
        kp["blocks"].append(dict(
            wA=banded(taps_a).astype(bf16),
            bA=ones_field(bias_taps, b2f),                       # (D, H, W*C)
            wB=banded(taps3).astype(bf16),
            bB=jnp.tile(b3f, W).reshape(1, WC).astype(jnp.float32),
            wP=block_diag(w4).astype(bf16),
            bP=jnp.tile(rb["b4"], W).reshape(1, WC).astype(jnp.float32),
        ))

    # ConvTranspose3d(C, o_c, 2, stride 2): one (W*C, 8*W*o_c) matrix whose
    # columns are ordered (kd, kh, w, kw, co) -> single full-width MXU dot and
    # a reshape-only pixel shuffle.
    wt = raw["up_w"]                                      # (C, o_c, 2, 2, 2)
    cols = []
    for kd in range(2):
        for kh in range(2):
            m = jnp.transpose(wt[:, :, kd, kh, :], (0, 2, 1)).reshape(C, 2 * o_c)
            cols.append(block_diag(m))
    kp["up_w"] = jnp.concatenate(cols, axis=1).astype(bf16)      # (WC, 8*W*o_c)
    kp["up_b"] = jnp.tile(raw["up_b"], 8 * W).reshape(
        1, 8 * W * o_c).astype(jnp.float32)
    return kp


# --------------------------------------------------------------------------
# Raw (PyTorch-layout) parameter init and a pure-JAX reference
# --------------------------------------------------------------------------
def init_raw_params(key, i_c, o_c, num_res_blocks=2):
    keys = iter(jax.random.split(key, 64))

    def conv(cin, cout, k):
        bound = float(1.0 / ((cin * k ** 3) ** 0.5))
        w = jax.random.uniform(next(keys), (cout, cin, k, k, k),
                               jnp.float32, -bound, bound)
        b = jax.random.uniform(next(keys), (cout,), jnp.float32, -bound, bound)
        return w, b

    def bn(c):
        return dict(
            gamma=jax.random.uniform(next(keys), (c,), jnp.float32, 0.5, 1.5),
            beta=jax.random.uniform(next(keys), (c,), jnp.float32, -0.5, 0.5),
            mean=jax.random.uniform(next(keys), (c,), jnp.float32, -0.5, 0.5),
            var=jax.random.uniform(next(keys), (c,), jnp.float32, 0.5, 1.5))

    raw = {}
    raw["init_w"], raw["init_b"] = conv(i_c, i_c, 3)
    raw["blocks"] = []
    for _ in range(num_res_blocks):
        w1, b1 = conv(i_c, i_c, 1)
        w2, b2 = conv(i_c, i_c, 3)
        w3, b3 = conv(i_c, i_c, 3)
        w4, b4 = conv(i_c, i_c, 1)
        raw["blocks"].append(dict(w1=w1, b1=b1, w2=w2, b2=b2, bn1=bn(i_c),
                                  w3=w3, b3=b3, bn2=bn(i_c), w4=w4, b4=b4))
    bound = float(1.0 / ((i_c * 8) ** 0.5))
    raw["up_w"] = jax.random.uniform(next(keys), (i_c, o_c, 2, 2, 2),
                                     jnp.float32, -bound, bound)
    raw["up_b"] = jax.random.uniform(next(keys), (o_c,), jnp.float32,
                                     -bound, bound)
    return raw


def reference_forward(x, raw):
    """Pure-JAX f32 reference of the PyTorch UpConv3DBlock (eval mode)."""
    def conv3(a, w, b):
        w_ = jnp.transpose(w, (2, 3, 4, 1, 0))           # DHWIO
        y = lax.conv_general_dilated(
            a, w_, window_strides=(1, 1, 1),
            padding=((1, 1), (1, 1), (1, 1)),
            dimension_numbers=("NDHWC", "DHWIO", "NDHWC"))
        return y + b

    def conv1(a, w, b):
        return jnp.einsum("ndhwc,ec->ndhwe", a, w[:, :, 0, 0, 0]) + b

    def bn(a, p):
        s = p["gamma"] / jnp.sqrt(p["var"] + BN_EPS)
        return (a - p["mean"]) * s + p["beta"]

    h = conv3(x, raw["init_w"], raw["init_b"])
    for blk in raw["blocks"]:
        y = conv1(h, blk["w1"], blk["b1"])
        y = jax.nn.silu(bn(conv3(y, blk["w2"], blk["b2"]), blk["bn1"]))
        y = jax.nn.silu(bn(conv3(y, blk["w3"], blk["b3"]), blk["bn2"]))
        h = h + conv1(y, blk["w4"], blk["b4"])

    wt = raw["up_w"]                                     # (C, oc, 2, 2, 2)
    N, D, H, W, _ = h.shape
    oc = wt.shape[1]
    y = jnp.einsum("ndhwc,cokxy->ndhwkxyo", h, wt) + raw["up_b"]
    y = jnp.transpose(y, (0, 1, 4, 2, 5, 3, 6, 7)).reshape(
        N, 2 * D, 2 * H, 2 * W, oc)
    return jax.nn.relu(y)


if __name__ == "__main__":
    key = jax.random.PRNGKey(0)
    i_c, o_c = 8, 4
    N, D, H, W = 2, 8, 8, 8

    kp_key, x_key = jax.random.split(key)
    raw = init_raw_params(kp_key, i_c, o_c, num_res_blocks=2)
    x = jax.random.normal(x_key, (N, D, H, W, i_c), jnp.float32)

    kparams = prepare_kernel_params(raw, D, H, W)

    fwd = jax.jit(upconv3d_block_forward)
    out = fwd(x, kparams)
    jax.block_until_ready(out)

    assert out.shape == (N, 2 * D, 2 * H, 2 * W, o_c), out.shape
    assert bool(jnp.all(jnp.isfinite(out)))

    # Cross-check against a pure-JAX f32 reference (the kernel path uses bf16
    # MXU operands with f32 accumulation, so allow a loose tolerance).
    ref = jax.jit(reference_forward)(x, raw)
    err = float(jnp.max(jnp.abs(out.astype(jnp.float32) - ref)))
    assert err < 1e-1, f"kernel/reference mismatch: max abs err = {err}"

    print("KERNEL_OK")
</pallas_src>

<mosaic_0001>
module attributes {stable_mosaic.version = 11 : i64} {
  func.func @kernel(%arg0: i32, %arg1: memref<1x8x8x64xf32, #tpu.memory_space<vmem>>, %arg2: memref<9x64x64xbf16, #tpu.memory_space<vmem>>, %arg3: memref<1x64xf32, #tpu.memory_space<vmem>>, %arg4: memref<9x64x64xbf16, #tpu.memory_space<vmem>>, %arg5: memref<8x8x64xf32, #tpu.memory_space<vmem>>, %arg6: memref<9x64x64xbf16, #tpu.memory_space<vmem>>, %arg7: memref<1x64xf32, #tpu.memory_space<vmem>>, %arg8: memref<64x64xbf16, #tpu.memory_space<vmem>>, %arg9: memref<1x64xf32, #tpu.memory_space<vmem>>, %arg10: memref<9x64x64xbf16, #tpu.memory_space<vmem>>, %arg11: memref<8x8x64xf32, #tpu.memory_space<vmem>>, %arg12: memref<9x64x64xbf16, #tpu.memory_space<vmem>>, %arg13: memref<1x64xf32, #tpu.memory_space<vmem>>, %arg14: memref<64x64xbf16, #tpu.memory_space<vmem>>, %arg15: memref<1x64xf32, #tpu.memory_space<vmem>>, %arg16: memref<64x256xbf16, #tpu.memory_space<vmem>>, %arg17: memref<1x256xf32, #tpu.memory_space<vmem>>, %arg18: memref<1x8x2x8x128xf32, #tpu.memory_space<vmem>>, %arg19: memref<10x10x64xf32, #tpu.memory_space<vmem>>, %arg20: memref<64x64xf32, #tpu.memory_space<vmem>>) attributes {dimension_semantics = [#tpu.dimension_semantics<parallel>], iteration_bounds = array<i64: 2>, scalar_prefetch = 0 : i64, scratch_operands = 2 : i64, tpu.core_type = #tpu.core_type<tc>, window_params = [{transform_indices = @transform_0, window_bounds = array<i64: 1, 8, 8, 64>}, {pipeline_mode = #tpu.pipeline_mode<synchronous>, transform_indices = @transform_1, window_bounds = array<i64: 9, 64, 64>}, {pipeline_mode = #tpu.pipeline_mode<synchronous>, transform_indices = @transform_2, window_bounds = array<i64: 1, 64>}, {pipeline_mode = #tpu.pipeline_mode<synchronous>, transform_indices = @transform_3, window_bounds = array<i64: 9, 64, 64>}, {pipeline_mode = #tpu.pipeline_mode<synchronous>, transform_indices = @transform_4, window_bounds = array<i64: 8, 8, 64>}, {pipeline_mode = #tpu.pipeline_mode<synchronous>, transform_indices = @transform_5, window_bounds = array<i64: 9, 64, 64>}, {pipeline_mode = #tpu.pipeline_mode<synchronous>, transform_indices = @transform_6, window_bounds = array<i64: 1, 64>}, {pipeline_mode = #tpu.pipeline_mode<synchronous>, transform_indices = @transform_7, window_bounds = array<i64: 64, 64>}, {pipeline_mode = #tpu.pipeline_mode<synchronous>, transform_indices = @transform_8, window_bounds = array<i64: 1, 64>}, {pipeline_mode = #tpu.pipeline_mode<synchronous>, transform_indices = @transform_9, window_bounds = array<i64: 9, 64, 64>}, {pipeline_mode = #tpu.pipeline_mode<synchronous>, transform_indices = @transform_10, window_bounds = array<i64: 8, 8, 64>}, {pipeline_mode = #tpu.pipeline_mode<synchronous>, transform_indices = @transform_11, window_bounds = array<i64: 9, 64, 64>}, {pipeline_mode = #tpu.pipeline_mode<synchronous>, transform_indices = @transform_12, window_bounds = array<i64: 1, 64>}, {pipeline_mode = #tpu.pipeline_mode<synchronous>, transform_indices = @transform_13, window_bounds = array<i64: 64, 64>}, {pipeline_mode = #tpu.pipeline_mode<synchronous>, transform_indices = @transform_14, window_bounds = array<i64: 1, 64>}, {pipeline_mode = #tpu.pipeline_mode<synchronous>, transform_indices = @transform_15, window_bounds = array<i64: 64, 256>}, {pipeline_mode = #tpu.pipeline_mode<synchronous>, transform_indices = @transform_16, window_bounds = array<i64: 1, 256>}, {transform_indices = @transform_17, window_bounds = array<i64: 1, 8, 2, 8, 128>}]} {
    %cst = arith.constant 0.000000e+00 : f32
    %0 = vector.broadcast %cst : f32 to vector<10x10x64xf32>
    %c0 = arith.constant 0 : index
    %c0_0 = arith.constant 0 : index
    %c0_1 = arith.constant 0 : index
    %1 = vector.load %arg19[%c0, %c0_0, %c0_1] : memref<10x10x64xf32, #tpu.memory_space<vmem>>, vector<10x10x64xf32>
    tpu.vector_store %arg19[%c0, %c0_0, %c0_1], %0 {strides = array<i32>} : memref<10x10x64xf32, #tpu.memory_space<vmem>>, vector<10x10x64xf32>,
    %c0_2 = arith.constant 0 : index
    %c0_3 = arith.constant 0 : index
    %c0_4 = arith.constant 0 : index
    %c0_5 = arith.constant 0 : index
    %2 = vector.load %arg1[%c0_2, %c0_3, %c0_4, %c0_5] : memref<1x8x8x64xf32, #tpu.memory_space<vmem>>, vector<1x8x8x64xf32>
    %3 = vector.shape_cast %2 : vector<1x8x8x64xf32> to vector<8x8x64xf32>
    %c1 = arith.constant 1 : index
    %c1_6 = arith.constant 1 : index
    %c0_7 = arith.constant 0 : index
    %4 = vector.load %arg19[%c1, %c1_6, %c0_7] : memref<10x10x64xf32, #tpu.memory_space<vmem>>, vector<8x8x64xf32>
    tpu.vector_store %arg19[%c1, %c1_6, %c0_7], %3 {strides = array<i32>} : memref<10x10x64xf32, #tpu.memory_space<vmem>>, vector<8x8x64xf32>,
    %c0_8 = arith.constant 0 : index
    %c0_9 = arith.constant 0 : index
    %5 = vector.load %arg3[%c0_8, %c0_9] : memref<1x64xf32, #tpu.memory_space<vmem>>, vector<1x64xf32>
    %c0_10 = arith.constant 0 : index
    %c0_11 = arith.constant 0 : index
    %c0_12 = arith.constant 0 : index
    %6 = vector.load %arg19[%c0_10, %c0_11, %c0_12] : memref<10x10x64xf32, #tpu.memory_space<vmem>>, vector<8x8x64xf32>
    %7 = vector.shape_cast %6 : vector<8x8x64xf32> to vector<64x64xf32>
    %8 = arith.truncf %7 : vector<64x64xf32> to vector<64x64xbf16>
    %c0_13 = arith.constant 0 : index
    %c0_14 = arith.constant 0 : index
    %c0_15 = arith.constant 0 : index
    %9 = vector.load %arg2[%c0_13, %c0_14, %c0_15] : memref<9x64x64xbf16, #tpu.memory_space<vmem>>, vector<1x64x64xbf16>
    %10 = vector.shape_cast %9 : vector<1x64x64xbf16> to vector<64x64xbf16>
    %cst_16 = arith.constant dense<0.000000e+00> : vector<64x64xf32>
    %11 = tpu.matmul %8, %10, %cst_16 {dimension_numbers = #tpu.dot_dimension_numbers<[1], [0], [0], [1], [0, 0, 1, 1], [], []>} : vector<64x64xbf16>, vector<64x64xbf16>, vector<64x64xf32> -> vector<64x64xf32>
    %12 = vector.broadcast %5 : vector<1x64xf32> to vector<64x64xf32>
    %13 = arith.addf %12, %11 : vector<64x64xf32>
    %c0_17 = arith.constant 0 : index
    %c1_18 = arith.constant 1 : index
    %c0_19 = arith.constant 0 : index
    %14 = vector.load %arg19[%c0_17, %c1_18, %c0_19] : memref<10x10x64xf32, #tpu.memory_space<vmem>>, vector<8x8x64xf32>
    %15 = vector.shape_cast %14 : vector<8x8x64xf32> to vector<64x64xf32>
    %16 = arith.truncf %15 : vector<64x64xf32> to vector<64x64xbf16>
    %c1_20 = arith.constant 1 : index
    %c0_21 = arith.constant 0 : index
    %c0_22 = arith.constant 0 : index
    %17 = vector.load %arg2[%c1_20, %c0_21, %c0_22] : memref<9x64x64xbf16, #tpu.memory_space<vmem>>, vector<1x64x64xbf16>
    %18 = vector.shape_cast %17 : vector<1x64x64xbf16> to vector<64x64xbf16>
    %cst_23 = arith.constant dense<0.000000e+00> : vector<64x64xf32>
    %19 = tpu.matmul %16, %18, %cst_23 {dimension_numbers = #tpu.dot_dimension_numbers<[1], [0], [0], [1], [0, 0, 1, 1], [], []>} : vector<64x64xbf16>, vector<64x64xbf16>, vector<64x64xf32> -> vector<64x64xf32>
    %20 = arith.addf %13, %19 : vector<64x64xf32>
    %c0_24 = arith.constant 0 : index
    %c2 = arith.constant 2 : index
    %c0_25 = arith.constant 0 : index
    %21 = vector.load %arg19[%c0_24, %c2, %c0_25] : memref<10x10x64xf32, #tpu.memory_space<vmem>>, vector<8x8x64xf32>
    %22 = vector.shape_cast %21 : vector<8x8x64xf32> to vector<64x64xf32>
    %23 = arith.truncf %22 : vector<64x64xf32> to vector<64x64xbf16>
    %c2_26 = arith.constant 2 : index
    %c0_27 = arith.constant 0 : index
    %c0_28 = arith.constant 0 : index
    %24 = vector.load %arg2[%c2_26, %c0_27, %c0_28] : memref<9x64x64xbf16, #tpu.memory_space<vmem>>, vector<1x64x64xbf16>
    %25 = vector.shape_cast %24 : vector<1x64x64xbf16> to vector<64x64xbf16>
    %cst_29 = arith.constant dense<0.000000e+00> : vector<64x64xf32>
    %26 = tpu.matmul %23, %25, %cst_29 {dimension_numbers = #tpu.dot_dimension_numbers<[1], [0], [0], [1], [0, 0, 1, 1], [], []>} : vector<64x64xbf16>, vector<64x64xbf16>, vector<64x64xf32> -> vector<64x64xf32>
    %27 = arith.addf %20, %26 : vector<64x64xf32>
    %c1_30 = arith.constant 1 : index
    %c0_31 = arith.constant 0 : index
    %c0_32 = arith.constant 0 : index
    %28 = vector.load %arg19[%c1_30, %c0_31, %c0_32] : memref<10x10x64xf32, #tpu.memory_space<vmem>>, vector<8x8x64xf32>
    %29 = vector.shape_cast %28 : vector<8x8x64xf32> to vector<64x64xf32>
    %30 = arith.truncf %29 : vector<64x64xf32> to vector<64x64xbf16>
    %c3 = arith.constant 3 : index
    %c0_33 = arith.constant 0 : index
    %c0_34 = arith.constant 0 : index
    %31 = vector.load %arg2[%c3, %c0_33, %c0_34] : memref<9x64x64xbf16, #tpu.memory_space<vmem>>, vector<1x64x64xbf16>
    %32 = vector.shape_cast %31 : vector<1x64x64xbf16> to vector<64x64xbf16>
    %cst_35 = arith.constant dense<0.000000e+00> : vector<64x64xf32>
    %33 = tpu.matmul %30, %32, %cst_35 {dimension_numbers = #tpu.dot_dimension_numbers<[1], [0], [0], [1], [0, 0, 1, 1], [], []>} : vector<64x64xbf16>, vector<64x64xbf16>, vector<64x64xf32> -> vector<64x64xf32>
    %34 = arith.addf %27, %33 : vector<64x64xf32>
    %c1_36 = arith.constant 1 : index
    %c1_37 = arith.constant 1 : index
    %c0_38 = arith.constant 0 : index
    %35 = vector.load %arg19[%c1_36, %c1_37, %c0_38] : memref<10x10x64xf32, #tpu.memory_space<vmem>>, vector<8x8x64xf32>
    %36 = vector.shape_cast %35 : vector<8x8x64xf32> to vector<64x64xf32>
    %37 = arith.truncf %36 : vector<64x64xf32> to vector<64x64xbf16>
    %c4 = arith.constant 4 : index
    %c0_39 = arith.constant 0 : index
    %c0_40 = arith.constant 0 : index
    %38 = vector.load %arg2[%c4, %c0_39, %c0_40] : memref<9x64x64xbf16, #tpu.memory_space<vmem>>, vector<1x64x64xbf16>
    %39 = vector.shape_cast %38 : vector<1x64x64xbf16> to vector<64x64xbf16>
    %cst_41 = arith.constant dense<0.000000e+00> : vector<64x64xf32>
    %40 = tpu.matmul %37, %39, %cst_41 {dimension_numbers = #tpu.dot_dimension_numbers<[1], [0], [0], [1], [0, 0, 1, 1], [], []>} : vector<64x64xbf16>, vector<64x64xbf16>, vector<64x64xf32> -> vector<64x64xf32>
    %41 = arith.addf %34, %40 : vector<64x64xf32>
    %c1_42 = arith.constant 1 : index
    %c2_43 = arith.constant 2 : index
    %c0_44 = arith.constant 0 : index
    %42 = vector.load %arg19[%c1_42, %c2_43, %c0_44] : memref<10x10x64xf32, #tpu.memory_space<vmem>>, vector<8x8x64xf32>
    %43 = vector.shape_cast %42 : vector<8x8x64xf32> to vector<64x64xf32>
    %44 = arith.truncf %43 : vector<64x64xf32> to vector<64x64xbf16>
    %c5 = arith.constant 5 : index
    %c0_45 = arith.constant 0 : index
    %c0_46 = arith.constant 0 : index
    %45 = vector.load %arg2[%c5, %c0_45, %c0_46] : memref<9x64x64xbf16, #tpu.memory_space<vmem>>, vector<1x64x64xbf16>
    %46 = vector.shape_cast %45 : vector<1x64x64xbf16> to vector<64x64xbf16>
    %cst_47 = arith.constant dense<0.000000e+00> : vector<64x64xf32>
    %47 = tpu.matmul %44, %46, %cst_47 {dimension_numbers = #tpu.dot_dimension_numbers<[1], [0], [0], [1], [0, 0, 1, 1], [], []>} : vector<64x64xbf16>, vector<64x64xbf16>, vector<64x64xf32> -> vector<64x64xf32>
    %48 = arith.addf %41, %47 : vector<64x64xf32>
    %c2_48 = arith.constant 2 : index
    %c0_49 = arith.constant 0 : index
    %c0_50 = arith.constant 0 : index
    %49 = vector.load %arg19[%c2_48, %c0_49, %c0_50] : memref<10x10x64xf32, #tpu.memory_space<vmem>>, vector<8x8x64xf32>
    %50 = vector.shape_cast %49 : vector<8x8x64xf32> to vector<64x64xf32>
    %51 = arith.truncf %50 : vector<64x64xf32> to vector<64x64xbf16>
    %c6 = arith.constant 6 : index
    %c0_51 = arith.constant 0 : index
    %c0_52 = arith.constant 0 : index
    %52 = vector.load %arg2[%c6, %c0_51, %c0_52] : memref<9x64x64xbf16, #tpu.memory_space<vmem>>, vector<1x64x64xbf16>
    %53 = vector.shape_cast %52 : vector<1x64x64xbf16> to vector<64x64xbf16>
    %cst_53 = arith.constant dense<0.000000e+00> : vector<64x64xf32>
    %54 = tpu.matmul %51, %53, %cst_53 {dimension_numbers = #tpu.dot_dimension_numbers<[1], [0], [0], [1], [0, 0, 1, 1], [], []>} : vector<64x64xbf16>, vector<64x64xbf16>, vector<64x64xf32> -> vector<64x64xf32>
    %55 = arith.addf %48, %54 : vector<64x64xf32>
    %c2_54 = arith.constant 2 : index
    %c1_55 = arith.constant 1 : index
    %c0_56 = arith.constant 0 : index
    %56 = vector.load %arg19[%c2_54, %c1_55, %c0_56] : memref<10x10x64xf32, #tpu.memory_space<vmem>>, vector<8x8x64xf32>
    %57 = vector.shape_cast %56 : vector<8x8x64xf32> to vector<64x64xf32>
    %58 = arith.truncf %57 : vector<64x64xf32> to vector<64x64xbf16>
    %c7 = arith.constant 7 : index
    %c0_57 = arith.constant 0 : index
    %c0_58 = arith.constant 0 : index
    %59 = vector.load %arg2[%c7, %c0_57, %c0_58] : memref<9x64x64xbf16, #tpu.memory_space<vmem>>, vector<1x64x64xbf16>
    %60 = vector.shape_cast %59 : vector<1x64x64xbf16> to vector<64x64xbf16>
    %cst_59 = arith.constant dense<0.000000e+00> : vector<64x64xf32>
    %61 = tpu.matmul %58, %60, %cst_59 {dimension_numbers = #tpu.dot_dimension_numbers<[1], [0], [0], [1], [0, 0, 1, 1], [], []>} : vector<64x64xbf16>, vector<64x64xbf16>, vector<64x64xf32> -> vector<64x64xf32>
    %62 = arith.addf %55, %61 : vector<64x64xf32>
    %c2_60 = arith.constant 2 : index
    %c2_61 = arith.constant 2 : index
    %c0_62 = arith.constant 0 : index
    %63 = vector.load %arg19[%c2_60, %c2_61, %c0_62] : memref<10x10x64xf32, #tpu.memory_space<vmem>>, vector<8x8x64xf32>
    %64 = vector.shape_cast %63 : vector<8x8x64xf32> to vector<64x64xf32>
    %65 = arith.truncf %64 : vector<64x64xf32> to vector<64x64xbf16>
    %c8 = arith.constant 8 : index
    %c0_63 = arith.constant 0 : index
    %c0_64 = arith.constant 0 : index
    %66 = vector.load %arg2[%c8, %c0_63, %c0_64] : memref<9x64x64xbf16, #tpu.memory_space<vmem>>, vector<1x64x64xbf16>
    %67 = vector.shape_cast %66 : vector<1x64x64xbf16> to vector<64x64xbf16>
    %cst_65 = arith.constant dense<0.000000e+00> : vector<64x64xf32>
    %68 = tpu.matmul %65, %67, %cst_65 {dimension_numbers = #tpu.dot_dimension_numbers<[1], [0], [0], [1], [0, 0, 1, 1], [], []>} : vector<64x64xbf16>, vector<64x64xbf16>, vector<64x64xf32> -> vector<64x64xf32>
    %69 = arith.addf %62, %68 : vector<64x64xf32>
    %c0_66 = arith.constant 0 : index
    %c0_67 = arith.constant 0 : index
    %70 = vector.load %arg20[%c0_66, %c0_67] : memref<64x64xf32, #tpu.memory_space<vmem>>, vector<64x64xf32>
    tpu.vector_store %arg20[%c0_66, %c0_67], %69 {strides = array<i32>} : memref<64x64xf32, #tpu.memory_space<vmem>>, vector<64x64xf32>,
    %c0_68 = arith.constant 0 : index
    %c0_69 = arith.constant 0 : index
    %71 = vector.load %arg20[%c0_68, %c0_69] : memref<64x64xf32, #tpu.memory_space<vmem>>, vector<64x64xf32>
    %72 = vector.shape_cast %71 : vector<64x64xf32> to vector<8x8x64xf32>
    %c1_70 = arith.constant 1 : index
    %c1_71 = arith.constant 1 : index
    %c0_72 = arith.constant 0 : index
    %73 = vector.load %arg19[%c1_70, %c1_71, %c0_72] : memref<10x10x64xf32, #tpu.memory_space<vmem>>, vector<8x8x64xf32>
    tpu.vector_store %arg19[%c1_70, %c1_71, %c0_72], %72 {strides = array<i32>} : memref<10x10x64xf32, #tpu.memory_space<vmem>>, vector<8x8x64xf32>,
    %c0_73 = arith.constant 0 : index
    %c0_74 = arith.constant 0 : index
    %c0_75 = arith.constant 0 : index
    %74 = vector.load %arg5[%c0_73, %c0_74, %c0_75] : memref<8x8x64xf32, #tpu.memory_space<vmem>>, vector<8x8x64xf32>
    %75 = vector.shape_cast %74 : vector<8x8x64xf32> to vector<64x64xf32>
    %c0_76 = arith.constant 0 : index
    %c0_77 = arith.constant 0 : index
    %c0_78 = arith.constant 0 : index
    %76 = vector.load %arg19[%c0_76, %c0_77, %c0_78] : memref<10x10x64xf32, #tpu.memory_space<vmem>>, vector<8x8x64xf32>
    %77 = vector.shape_cast %76 : vector<8x8x64xf32> to vector<64x64xf32>
    %78 = arith.truncf %77 : vector<64x64xf32> to vector<64x64xbf16>
    %c0_79 = arith.constant 0 : index
    %c0_80 = arith.constant 0 : index
    %c0_81 = arith.constant 0 : index
    %79 = vector.load %arg4[%c0_79, %c0_80, %c0_81] : memref<9x64x64xbf16, #tpu.memory_space<vmem>>, vector<1x64x64xbf16>
    %80 = vector.shape_cast %79 : vector<1x64x64xbf16> to vector<64x64xbf16>
    %cst_82 = arith.constant dense<0.000000e+00> : vector<64x64xf32>
    %81 = tpu.matmul %78, %80, %cst_82 {dimension_numbers = #tpu.dot_dimension_numbers<[1], [0], [0], [1], [0, 0, 1, 1], [], []>} : vector<64x64xbf16>, vector<64x64xbf16>, vector<64x64xf32> -> vector<64x64xf32>
    %82 = arith.addf %75, %81 : vector<64x64xf32>
    %c0_83 = arith.constant 0 : index
    %c1_84 = arith.constant 1 : index
    %c0_85 = arith.constant 0 : index
    %83 = vector.load %arg19[%c0_83, %c1_84, %c0_85] : memref<10x10x64xf32, #tpu.memory_space<vmem>>, vector<8x8x64xf32>
    %84 = vector.shape_cast %83 : vector<8x8x64xf32> to vector<64x64xf32>
    %85 = arith.truncf %84 : vector<64x64xf32> to vector<64x64xbf16>
    %c1_86 = arith.constant 1 : index
    %c0_87 = arith.constant 0 : index
    %c0_88 = arith.constant 0 : index
    %86 = vector.load %arg4[%c1_86, %c0_87, %c0_88] : memref<9x64x64xbf16, #tpu.memory_space<vmem>>, vector<1x64x64xbf16>
    %87 = vector.shape_cast %86 : vector<1x64x64xbf16> to vector<64x64xbf16>
    %cst_89 = arith.constant dense<0.000000e+00> : vector<64x64xf32>
    %88 = tpu.matmul %85, %87, %cst_89 {dimension_numbers = #tpu.dot_dimension_numbers<[1], [0], [0], [1], [0, 0, 1, 1], [], []>} : vector<64x64xbf16>, vector<64x64xbf16>, vector<64x64xf32> -> vector<64x64xf32>
    %89 = arith.addf %82, %88 : vector<64x64xf32>
    %c0_90 = arith.constant 0 : index
    %c2_91 = arith.constant 2 : index
    %c0_92 = arith.constant 0 : index
    %90 = vector.load %arg19[%c0_90, %c2_91, %c0_92] : memref<10x10x64xf32, #tpu.memory_space<vmem>>, vector<8x8x64xf32>
    %91 = vector.shape_cast %90 : vector<8x8x64xf32> to vector<64x64xf32>
    %92 = arith.truncf %91 : vector<64x64xf32> to vector<64x64xbf16>
    %c2_93 = arith.constant 2 : index
    %c0_94 = arith.constant 0 : index
    %c0_95 = arith.constant 0 : index
    %93 = vector.load %arg4[%c2_93, %c0_94, %c0_95] : memref<9x64x64xbf16, #tpu.memory_space<vmem>>, vector<1x64x64xbf16>
    %94 = vector.shape_cast %93 : vector<1x64x64xbf16> to vector<64x64xbf16>
    %cst_96 = arith.constant dense<0.000000e+00> : vector<64x64xf32>
    %95 = tpu.matmul %92, %94, %cst_96 {dimension_numbers = #tpu.dot_dimension_numbers<[1], [0], [0], [1], [0, 0, 1, 1], [], []>} : vector<64x64xbf16>, vector<64x64xbf16>, vector<64x64xf32> -> vector<64x64xf32>
    %96 = arith.addf %89, %95 : vector<64x64xf32>
    %c1_97 = arith.constant 1 : index
    %c0_98 = arith.constant 0 : index
    %c0_99 = arith.constant 0 : index
    %97 = vector.load %arg19[%c1_97, %c0_98, %c0_99] : memref<10x10x64xf32, #tpu.memory_space<vmem>>, vector<8x8x64xf32>
    %98 = vector.shape_cast %97 : vector<8x8x64xf32> to vector<64x64xf32>
    %99 = arith.truncf %98 : vector<64x64xf32> to vector<64x64xbf16>
    %c3_100 = arith.constant 3 : index
    %c0_101 = arith.constant 0 : index
    %c0_102 = arith.constant 0 : index
    %100 = vector.load %arg4[%c3_100, %c0_101, %c0_102] : memref<9x64x64xbf16, #tpu.memory_space<vmem>>, vector<1x64x64xbf16>
    %101 = vector.shape_cast %100 : vector<1x64x64xbf16> to vector<64x64xbf16>
    %cst_103 = arith.constant dense<0.000000e+00> : vector<64x64xf32>
    %102 = tpu.matmul %99, %101, %cst_103 {dimension_numbers = #tpu.dot_dimension_numbers<[1], [0], [0], [1], [0, 0, 1, 1], [], []>} : vector<64x64xbf16>, vector<64x64xbf16>, vector<64x64xf32> -> vector<64x64xf32>
    %103 = arith.addf %96, %102 : vector<64x64xf32>
    %c1_104 = arith.constant 1 : index
    %c1_105 = arith.constant 1 : index
    %c0_106 = arith.constant 0 : index
    %104 = vector.load %arg19[%c1_104, %c1_105, %c0_106] : memref<10x10x64xf32, #tpu.memory_space<vmem>>, vector<8x8x64xf32>
    %105 = vector.shape_cast %104 : vector<8x8x64xf32> to vector<64x64xf32>
    %106 = arith.truncf %105 : vector<64x64xf32> to vector<64x64xbf16>
    %c4_107 = arith.constant 4 : index
    %c0_108 = arith.constant 0 : index
    %c0_109 = arith.constant 0 : index
    %107 = vector.load %arg4[%c4_107, %c0_108, %c0_109] : memref<9x64x64xbf16, #tpu.memory_space<vmem>>, vector<1x64x64xbf16>
    %108 = vector.shape_cast %107 : vector<1x64x64xbf16> to vector<64x64xbf16>
    %cst_110 = arith.constant dense<0.000000e+00> : vector<64x64xf32>
    %109 = tpu.matmul %106, %108, %cst_110 {dimension_numbers = #tpu.dot_dimension_numbers<[1], [0], [0], [1], [0, 0, 1, 1], [], []>} : vector<64x64xbf16>, vector<64x64xbf16>, vector<64x64xf32> -> vector<64x64xf32>
    %110 = arith.addf %103, %109 : vector<64x64xf32>
    %c1_111 = arith.constant 1 : index
    %c2_112 = arith.constant 2 : index
    %c0_113 = arith.constant 0 : index
    %111 = vector.load %arg19[%c1_111, %c2_112, %c0_113] : memref<10x10x64xf32, #tpu.memory_space<vmem>>, vector<8x8x64xf32>
    %112 = vector.shape_cast %111 : vector<8x8x64xf32> to vector<64x64xf32>
    %113 = arith.truncf %112 : vector<64x64xf32> to vector<64x64xbf16>
    %c5_114 = arith.constant 5 : index
    %c0_115 = arith.constant 0 : index
    %c0_116 = arith.constant 0 : index
    %114 = vector.load %arg4[%c5_114, %c0_115, %c0_116] : memref<9x64x64xbf16, #tpu.memory_space<vmem>>, vector<1x64x64xbf16>
    %115 = vector.shape_cast %114 : vector<1x64x64xbf16> to vector<64x64xbf16>
    %cst_117 = arith.constant dense<0.000000e+00> : vector<64x64xf32>
    %116 = tpu.matmul %113, %115, %cst_117 {dimension_numbers = #tpu.dot_dimension_numbers<[1], [0], [0], [1], [0, 0, 1, 1], [], []>} : vector<64x64xbf16>, vector<64x64xbf16>, vector<64x64xf32> -> vector<64x64xf32>
    %117 = arith.addf %110, %116 : vector<64x64xf32>
    %c2_118 = arith.constant 2 : index
    %c0_119 = arith.constant 0 : index
    %c0_120 = arith.constant 0 : index
    %118 = vector.load %arg19[%c2_118, %c0_119, %c0_120] : memref<10x10x64xf32, #tpu.memory_space<vmem>>, vector<8x8x64xf32>
    %119 = vector.shape_cast %118 : vector<8x8x64xf32> to vector<64x64xf32>
    %120 = arith.truncf %119 : vector<64x64xf32> to vector<64x64xbf16>
    %c6_121 = arith.constant 6 : index
    %c0_122 = arith.constant 0 : index
    %c0_123 = arith.constant 0 : index
    %121 = vector.load %arg4[%c6_121, %c0_122, %c0_123] : memref<9x64x64xbf16, #tpu.memory_space<vmem>>, vector<1x64x64xbf16>
    %122 = vector.shape_cast %121 : vector<1x64x64xbf16> to vector<64x64xbf16>
    %cst_124 = arith.constant dense<0.000000e+00> : vector<64x64xf32>
    %123 = tpu.matmul %120, %122, %cst_124 {dimension_numbers = #tpu.dot_dimension_numbers<[1], [0], [0], [1], [0, 0, 1, 1], [], []>} : vector<64x64xbf16>, vector<64x64xbf16>, vector<64x64xf32> -> vector<64x64xf32>
    %124 = arith.addf %117, %123 : vector<64x64xf32>
    %c2_125 = arith.constant 2 : index
    %c1_126 = arith.constant 1 : index
    %c0_127 = arith.constant 0 : index
    %125 = vector.load %arg19[%c2_125, %c1_126, %c0_127] : memref<10x10x64xf32, #tpu.memory_space<vmem>>, vector<8x8x64xf32>
    %126 = vector.shape_cast %125 : vector<8x8x64xf32> to vector<64x64xf32>
    %127 = arith.truncf %126 : vector<64x64xf32> to vector<64x64xbf16>
    %c7_128 = arith.constant 7 : index
    %c0_129 = arith.constant 0 : index
    %c0_130 = arith.constant 0 : index
    %128 = vector.load %arg4[%c7_128, %c0_129, %c0_130] : memref<9x64x64xbf16, #tpu.memory_space<vmem>>, vector<1x64x64xbf16>
    %129 = vector.shape_cast %128 : vector<1x64x64xbf16> to vector<64x64xbf16>
    %cst_131 = arith.constant dense<0.000000e+00> : vector<64x64xf32>
    %130 = tpu.matmul %127, %129, %cst_131 {dimension_numbers = #tpu.dot_dimension_numbers<[1], [0], [0], [1], [0, 0, 1, 1], [], []>} : vector<64x64xbf16>, vector<64x64xbf16>, vector<64x64xf32> -> vector<64x64xf32>
    %131 = arith.addf %124, %130 : vector<64x64xf32>
    %c2_132 = arith.constant 2 : index
    %c2_133 = arith.constant 2 : index
    %c0_134 = arith.constant 0 : index
    %132 = vector.load %arg19[%c2_132, %c2_133, %c0_134] : memref<10x10x64xf32, #tpu.memory_space<vmem>>, vector<8x8x64xf32>
    %133 = vector.shape_cast %132 : vector<8x8x64xf32> to vector<64x64xf32>
    %134 = arith.truncf %133 : vector<64x64xf32> to vector<64x64xbf16>
    %c8_135 = arith.constant 8 : index
    %c0_136 = arith.constant 0 : index
    %c0_137 = arith.constant 0 : index
    %135 = vector.load %arg4[%c8_135, %c0_136, %c0_137] : memref<9x64x64xbf16, #tpu.memory_space<vmem>>, vector<1x64x64xbf16>
    %136 = vector.shape_cast %135 : vector<1x64x64xbf16> to vector<64x64xbf16>
    %cst_138 = arith.constant dense<0.000000e+00> : vector<64x64xf32>
    %137 = tpu.matmul %134, %136, %cst_138 {dimension_numbers = #tpu.dot_dimension_numbers<[1], [0], [0], [1], [0, 0, 1, 1], [], []>} : vector<64x64xbf16>, vector<64x64xbf16>, vector<64x64xf32> -> vector<64x64xf32>
    %138 = arith.addf %131, %137 : vector<64x64xf32>
    %139 = arith.negf %138 : vector<64x64xf32>
    %140 = math.exp %139 : vector<64x64xf32>
    %cst_139 = arith.constant 1.000000e+00 : f32
    %141 = vector.broadcast %cst_139 : f32 to vector<64x64xf32>
    %142 = arith.addf %141, %140 : vector<64x64xf32>
    %143 = arith.divf %141, %142 : vector<64x64xf32>
    %144 = arith.mulf %138, %143 : vector<64x64xf32>
    %145 = vector.shape_cast %144 : vector<64x64xf32> to vector<8x8x64xf32>
    %c1_140 = arith.constant 1 : index
    %c1_141 = arith.constant 1 : index
    %c0_142 = arith.constant 0 : index
    %146 = vector.load %arg19[%c1_140, %c1_141, %c0_142] : memref<10x10x64xf32, #tpu.memory_space<vmem>>, vector<8x8x64xf32>
    tpu.vector_store %arg19[%c1_140, %c1_141, %c0_142], %145 {strides = array<i32>} : memref<10x10x64xf32, #tpu.memory_space<vmem>>, vector<8x8x64xf32>,
    %c0_143 = arith.constant 0 : index
    %c0_144 = arith.constant 0 : index
    %147 = vector.load %arg7[%c0_143, %c0_144] : memref<1x64xf32, #tpu.memory_space<vmem>>, vector<1x64xf32>
    %c0_145 = arith.constant 0 : index
    %c0_146 = arith.constant 0 : index
    %c0_147 = arith.constant 0 : index
    %148 = vector.load %arg19[%c0_145, %c0_146, %c0_147] : memref<10x10x64xf32, #tpu.memory_space<vmem>>, vector<8x8x64xf32>
    %149 = vector.shape_cast %148 : vector<8x8x64xf32> to vector<64x64xf32>
    %150 = arith.truncf %149 : vector<64x64xf32> to vector<64x64xbf16>
    %c0_148 = arith.constant 0 : index
    %c0_149 = arith.constant 0 : index
    %c0_150 = arith.constant 0 : index
    %151 = vector.load %arg6[%c0_148, %c0_149, %c0_150] : memref<9x64x64xbf16, #tpu.memory_space<vmem>>, vector<1x64x64xbf16>
    %152 = vector.shape_cast %151 : vector<1x64x64xbf16> to vector<64x64xbf16>
    %cst_151 = arith.constant dense<0.000000e+00> : vector<64x64xf32>
    %153 = tpu.matmul %150, %152, %cst_151 {dimension_numbers = #tpu.dot_dimension_numbers<[1], [0], [0], [1], [0, 0, 1, 1], [], []>} : vector<64x64xbf16>, vector<64x64xbf16>, vector<64x64xf32> -> vector<64x64xf32>
    %154 = vector.broadcast %147 : vector<1x64xf32> to vector<64x64xf32>
    %155 = arith.addf %154, %153 : vector<64x64xf32>
    %c0_152 = arith.constant 0 : index
    %c1_153 = arith.constant 1 : index
    %c0_154 = arith.constant 0 : index
    %156 = vector.load %arg19[%c0_152, %c1_153, %c0_154] : memref<10x10x64xf32, #tpu.memory_space<vmem>>, vector<8x8x64xf32>
    %157 = vector.shape_cast %156 : vector<8x8x64xf32> to vector<64x64xf32>
    %158 = arith.truncf %157 : vector<64x64xf32> to vector<64x64xbf16>
    %c1_155 = arith.constant 1 : index
    %c0_156 = arith.constant 0 : index
    %c0_157 = arith.constant 0 : index
    %159 = vector.load %arg6[%c1_155, %c0_156, %c0_157] : memref<9x64x64xbf16, #tpu.memory_space<vmem>>, vector<1x64x64xbf16>
    %160 = vector.shape_cast %159 : vector<1x64x64xbf16> to vector<64x64xbf16>
    %cst_158 = arith.constant dense<0.000000e+00> : vector<64x64xf32>
    %161 = tpu.matmul %158, %160, %cst_158 {dimension_numbers = #tpu.dot_dimension_numbers<[1], [0], [0], [1], [0, 0, 1, 1], [], []>} : vector<64x64xbf16>, vector<64x64xbf16>, vector<64x64xf32> -> vector<64x64xf32>
    %162 = arith.addf %155, %161 : vector<64x64xf32>
    %c0_159 = arith.constant 0 : index
    %c2_160 = arith.constant 2 : index
    %c0_161 = arith.constant 0 : index
    %163 = vector.load %arg19[%c0_159, %c2_160, %c0_161] : memref<10x10x64xf32, #tpu.memory_space<vmem>>, vector<8x8x64xf32>
    %164 = vector.shape_cast %163 : vector<8x8x64xf32> to vector<64x64xf32>
    %165 = arith.truncf %164 : vector<64x64xf32> to vector<64x64xbf16>
    %c2_162 = arith.constant 2 : index
    %c0_163 = arith.constant 0 : index
    %c0_164 = arith.constant 0 : index
    %166 = vector.load %arg6[%c2_162, %c0_163, %c0_164] : memref<9x64x64xbf16, #tpu.memory_space<vmem>>, vector<1x64x64xbf16>
    %167 = vector.shape_cast %166 : vector<1x64x64xbf16> to vector<64x64xbf16>
    %cst_165 = arith.constant dense<0.000000e+00> : vector<64x64xf32>
    %168 = tpu.matmul %165, %167, %cst_165 {dimension_numbers = #tpu.dot_dimension_numbers<[1], [0], [0], [1], [0, 0, 1, 1], [], []>} : vector<64x64xbf16>, vector<64x64xbf16>, vector<64x64xf32> -> vector<64x64xf32>
    %169 = arith.addf %162, %168 : vector<64x64xf32>
    %c1_166 = arith.constant 1 : index
    %c0_167 = arith.constant 0 : index
    %c0_168 = arith.constant 0 : index
    %170 = vector.load %arg19[%c1_166, %c0_167, %c0_168] : memref<10x10x64xf32, #tpu.memory_space<vmem>>, vector<8x8x64xf32>
    %171 = vector.shape_cast %170 : vector<8x8x64xf32> to vector<64x64xf32>
    %172 = arith.truncf %171 : vector<64x64xf32> to vector<64x64xbf16>
    %c3_169 = arith.constant 3 : index
    %c0_170 = arith.constant 0 : index
    %c0_171 = arith.constant 0 : index
    %173 = vector.load %arg6[%c3_169, %c0_170, %c0_171] : memref<9x64x64xbf16, #tpu.memory_space<vmem>>, vector<1x64x64xbf16>
    %174 = vector.shape_cast %173 : vector<1x64x64xbf16> to vector<64x64xbf16>
    %cst_172 = arith.constant dense<0.000000e+00> : vector<64x64xf32>
    %175 = tpu.matmul %172, %174, %cst_172 {dimension_numbers = #tpu.dot_dimension_numbers<[1], [0], [0], [1], [0, 0, 1, 1], [], []>} : vector<64x64xbf16>, vector<64x64xbf16>, vector<64x64xf32> -> vector<64x64xf32>
    %176 = arith.addf %169, %175 : vector<64x64xf32>
    %c1_173 = arith.constant 1 : index
    %c1_174 = arith.constant 1 : index
    %c0_175 = arith.constant 0 : index
    %177 = vector.load %arg19[%c1_173, %c1_174, %c0_175] : memref<10x10x64xf32, #tpu.memory_space<vmem>>, vector<8x8x64xf32>
    %178 = vector.shape_cast %177 : vector<8x8x64xf32> to vector<64x64xf32>
    %179 = arith.truncf %178 : vector<64x64xf32> to vector<64x64xbf16>
    %c4_176 = arith.constant 4 : index
    %c0_177 = arith.constant 0 : index
    %c0_178 = arith.constant 0 : index
    %180 = vector.load %arg6[%c4_176, %c0_177, %c0_178] : memref<9x64x64xbf16, #tpu.memory_space<vmem>>, vector<1x64x64xbf16>
    %181 = vector.shape_cast %180 : vector<1x64x64xbf16> to vector<64x64xbf16>
    %cst_179 = arith.constant dense<0.000000e+00> : vector<64x64xf32>
    %182 = tpu.matmul %179, %181, %cst_179 {dimension_numbers = #tpu.dot_dimension_numbers<[1], [0], [0], [1], [0, 0, 1, 1], [], []>} : vector<64x64xbf16>, vector<64x64xbf16>, vector<64x64xf32> -> vector<64x64xf32>
    %183 = arith.addf %176, %182 : vector<64x64xf32>
    %c1_180 = arith.constant 1 : index
    %c2_181 = arith.constant 2 : index
    %c0_182 = arith.constant 0 : index
    %184 = vector.load %arg19[%c1_180, %c2_181, %c0_182] : memref<10x10x64xf32, #tpu.memory_space<vmem>>, vector<8x8x64xf32>
    %185 = vector.shape_cast %184 : vector<8x8x64xf32> to vector<64x64xf32>
    %186 = arith.truncf %185 : vector<64x64xf32> to vector<64x64xbf16>
    %c5_183 = arith.constant 5 : index
    %c0_184 = arith.constant 0 : index
    %c0_185 = arith.constant 0 : index
    %187 = vector.load %arg6[%c5_183, %c0_184, %c0_185] : memref<9x64x64xbf16, #tpu.memory_space<vmem>>, vector<1x64x64xbf16>
    %188 = vector.shape_cast %187 : vector<1x64x64xbf16> to vector<64x64xbf16>
    %cst_186 = arith.constant dense<0.000000e+00> : vector<64x64xf32>
    %189 = tpu.matmul %186, %188, %cst_186 {dimension_numbers = #tpu.dot_dimension_numbers<[1], [0], [0], [1], [0, 0, 1, 1], [], []>} : vector<64x64xbf16>, vector<64x64xbf16>, vector<64x64xf32> -> vector<64x64xf32>
    %190 = arith.addf %183, %189 : vector<64x64xf32>
    %c2_187 = arith.constant 2 : index
    %c0_188 = arith.constant 0 : index
    %c0_189 = arith.constant 0 : index
    %191 = vector.load %arg19[%c2_187, %c0_188, %c0_189] : memref<10x10x64xf32, #tpu.memory_space<vmem>>, vector<8x8x64xf32>
    %192 = vector.shape_cast %191 : vector<8x8x64xf32> to vector<64x64xf32>
    %193 = arith.truncf %192 : vector<64x64xf32> to vector<64x64xbf16>
    %c6_190 = arith.constant 6 : index
    %c0_191 = arith.constant 0 : index
    %c0_192 = arith.constant 0 : index
    %194 = vector.load %arg6[%c6_190, %c0_191, %c0_192] : memref<9x64x64xbf16, #tpu.memory_space<vmem>>, vector<1x64x64xbf16>
    %195 = vector.shape_cast %194 : vector<1x64x64xbf16> to vector<64x64xbf16>
    %cst_193 = arith.constant dense<0.000000e+00> : vector<64x64xf32>
    %196 = tpu.matmul %193, %195, %cst_193 {dimension_numbers = #tpu.dot_dimension_numbers<[1], [0], [0], [1], [0, 0, 1, 1], [], []>} : vector<64x64xbf16>, vector<64x64xbf16>, vector<64x64xf32> -> vector<64x64xf32>
    %197 = arith.addf %190, %196 : vector<64x64xf32>
    %c2_194 = arith.constant 2 : index
    %c1_195 = arith.constant 1 : index
    %c0_196 = arith.constant 0 : index
    %198 = vector.load %arg19[%c2_194, %c1_195, %c0_196] : memref<10x10x64xf32, #tpu.memory_space<vmem>>, vector<8x8x64xf32>
    %199 = vector.shape_cast %198 : vector<8x8x64xf32> to vector<64x64xf32>
    %200 = arith.truncf %199 : vector<64x64xf32> to vector<64x64xbf16>
    %c7_197 = arith.constant 7 : index
    %c0_198 = arith.constant 0 : index
    %c0_199 = arith.constant 0 : index
    %201 = vector.load %arg6[%c7_197, %c0_198, %c0_199] : memref<9x64x64xbf16, #tpu.memory_space<vmem>>, vector<1x64x64xbf16>
    %202 = vector.shape_cast %201 : vector<1x64x64xbf16> to vector<64x64xbf16>
    %cst_200 = arith.constant dense<0.000000e+00> : vector<64x64xf32>
    %203 = tpu.matmul %200, %202, %cst_200 {dimension_numbers = #tpu.dot_dimension_numbers<[1], [0], [0], [1], [0, 0, 1, 1], [], []>} : vector<64x64xbf16>, vector<64x64xbf16>, vector<64x64xf32> -> vector<64x64xf32>
    %204 = arith.addf %197, %203 : vector<64x64xf32>
    %c2_201 = arith.constant 2 : index
    %c2_202 = arith.constant 2 : index
    %c0_203 = arith.constant 0 : index
    %205 = vector.load %arg19[%c2_201, %c2_202, %c0_203] : memref<10x10x64xf32, #tpu.memory_space<vmem>>, vector<8x8x64xf32>
    %206 = vector.shape_cast %205 : vector<8x8x64xf32> to vector<64x64xf32>
    %207 = arith.truncf %206 : vector<64x64xf32> to vector<64x64xbf16>
    %c8_204 = arith.constant 8 : index
    %c0_205 = arith.constant 0 : index
    %c0_206 = arith.constant 0 : index
    %208 = vector.load %arg6[%c8_204, %c0_205, %c0_206] : memref<9x64x64xbf16, #tpu.memory_space<vmem>>, vector<1x64x64xbf16>
    %209 = vector.shape_cast %208 : vector<1x64x64xbf16> to vector<64x64xbf16>
    %cst_207 = arith.constant dense<0.000000e+00> : vector<64x64xf32>
    %210 = tpu.matmul %207, %209, %cst_207 {dimension_numbers = #tpu.dot_dimension_numbers<[1], [0], [0], [1], [0, 0, 1, 1], [], []>} : vector<64x64xbf16>, vector<64x64xbf16>, vector<64x64xf32> -> vector<64x64xf32>
    %211 = arith.addf %204, %210 : vector<64x64xf32>
    %212 = arith.negf %211 : vector<64x64xf32>
    %213 = math.exp %212 : vector<64x64xf32>
    %cst_208 = arith.constant 1.000000e+00 : f32
    %214 = vector.broadcast %cst_208 : f32 to vector<64x64xf32>
    %215 = arith.addf %214, %213 : vector<64x64xf32>
    %216 = arith.divf %214, %215 : vector<64x64xf32>
    %217 = arith.mulf %211, %216 : vector<64x64xf32>
    %c0_209 = arith.constant 0 : index
    %c0_210 = arith.constant 0 : index
    %218 = vector.load %arg20[%c0_209, %c0_210] : memref<64x64xf32, #tpu.memory_space<vmem>>, vector<64x64xf32>
    %c0_211 = arith.constant 0 : index
    %c0_212 = arith.constant 0 : index
    %219 = vector.load %arg9[%c0_211, %c0_212] : memref<1x64xf32, #tpu.memory_space<vmem>>, vector<1x64xf32>
    %220 = vector.broadcast %219 : vector<1x64xf32> to vector<64x64xf32>
    %221 = arith.addf %218, %220 : vector<64x64xf32>
    %222 = arith.truncf %217 : vector<64x64xf32> to vector<64x64xbf16>
    %c0_213 = arith.constant 0 : index
    %c0_214 = arith.constant 0 : index
    %223 = vector.load %arg8[%c0_213, %c0_214] : memref<64x64xbf16, #tpu.memory_space<vmem>>, vector<64x64xbf16>
    %cst_215 = arith.constant dense<0.000000e+00> : vector<64x64xf32>
    %224 = tpu.matmul %222, %223, %cst_215 {dimension_numbers = #tpu.dot_dimension_numbers<[1], [0], [0], [1], [0, 0, 1, 1], [], []>} : vector<64x64xbf16>, vector<64x64xbf16>, vector<64x64xf32> -> vector<64x64xf32>
    %225 = arith.addf %221, %224 : vector<64x64xf32>
    %c0_216 = arith.constant 0 : index
    %c0_217 = arith.constant 0 : index
    %226 = vector.load %arg20[%c0_216, %c0_217] : memref<64x64xf32, #tpu.memory_space<vmem>>, vector<64x64xf32>
    tpu.vector_store %arg20[%c0_216, %c0_217], %225 {strides = array<i32>} : memref<64x64xf32, #tpu.memory_space<vmem>>, vector<64x64xf32>,
    %c0_218 = arith.constant 0 : index
    %c0_219 = arith.constant 0 : index
    %227 = vector.load %arg20[%c0_218, %c0_219] : memref<64x64xf32, #tpu.memory_space<vmem>>, vector<64x64xf32>
    %228 = vector.shape_cast %227 : vector<64x64xf32> to vector<8x8x64xf32>
    %c1_220 = arith.constant 1 : index
    %c1_221 = arith.constant 1 : index
    %c0_222 = arith.constant 0 : index
    %229 = vector.load %arg19[%c1_220, %c1_221, %c0_222] : memref<10x10x64xf32, #tpu.memory_space<vmem>>, vector<8x8x64xf32>
    tpu.vector_store %arg19[%c1_220, %c1_221, %c0_222], %228 {strides = array<i32>} : memref<10x10x64xf32, #tpu.memory_space<vmem>>, vector<8x8x64xf32>,
    %c0_223 = arith.constant 0 : index
    %c0_224 = arith.constant 0 : index
    %c0_225 = arith.constant 0 : index
    %230 = vector.load %arg11[%c0_223, %c0_224, %c0_225] : memref<8x8x64xf32, #tpu.memory_space<vmem>>, vector<8x8x64xf32>
    %231 = vector.shape_cast %230 : vector<8x8x64xf32> to vector<64x64xf32>
    %c0_226 = arith.constant 0 : index
    %c0_227 = arith.constant 0 : index
    %c0_228 = arith.constant 0 : index
    %232 = vector.load %arg19[%c0_226, %c0_227, %c0_228] : memref<10x10x64xf32, #tpu.memory_space<vmem>>, vector<8x8x64xf32>
    %233 = vector.shape_cast %232 : vector<8x8x64xf32> to vector<64x64xf32>
    %234 = arith.truncf %233 : vector<64x64xf32> to vector<64x64xbf16>
    %c0_229 = arith.constant 0 : index
    %c0_230 = arith.constant 0 : index
    %c0_231 = arith.constant 0 : index
    %235 = vector.load %arg10[%c0_229, %c0_230, %c0_231] : memref<9x64x64xbf16, #tpu.memory_space<vmem>>, vector<1x64x64xbf16>
    %236 = vector.shape_cast %235 : vector<1x64x64xbf16> to vector<64x64xbf16>
    %cst_232 = arith.constant dense<0.000000e+00> : vector<64x64xf32>
    %237 = tpu.matmul %234, %236, %cst_232 {dimension_numbers = #tpu.dot_dimension_numbers<[1], [0], [0], [1], [0, 0, 1, 1], [], []>} : vector<64x64xbf16>, vector<64x64xbf16>, vector<64x64xf32> -> vector<64x64xf32>
    %238 = arith.addf %231, %237 : vector<64x64xf32>
    %c0_233 = arith.constant 0 : index
    %c1_234 = arith.constant 1 : index
    %c0_235 = arith.constant 0 : index
    %239 = vector.load %arg19[%c0_233, %c1_234, %c0_235] : memref<10x10x64xf32, #tpu.memory_space<vmem>>, vector<8x8x64xf32>
    %240 = vector.shape_cast %239 : vector<8x8x64xf32> to vector<64x64xf32>
    %241 = arith.truncf %240 : vector<64x64xf32> to vector<64x64xbf16>
    %c1_236 = arith.constant 1 : index
    %c0_237 = arith.constant 0 : index
    %c0_238 = arith.constant 0 : index
    %242 = vector.load %arg10[%c1_236, %c0_237, %c0_238] : memref<9x64x64xbf16, #tpu.memory_space<vmem>>, vector<1x64x64xbf16>
    %243 = vector.shape_cast %242 : vector<1x64x64xbf16> to vector<64x64xbf16>
    %cst_239 = arith.constant dense<0.000000e+00> : vector<64x64xf32>
    %244 = tpu.matmul %241, %243, %cst_239 {dimension_numbers = #tpu.dot_dimension_numbers<[1], [0], [0], [1], [0, 0, 1, 1], [], []>} : vector<64x64xbf16>, vector<64x64xbf16>, vector<64x64xf32> -> vector<64x64xf32>
    %245 = arith.addf %238, %244 : vector<64x64xf32>
    %c0_240 = arith.constant 0 : index
    %c2_241 = arith.constant 2 : index
    %c0_242 = arith.constant 0 : index
    %246 = vector.load %arg19[%c0_240, %c2_241, %c0_242] : memref<10x10x64xf32, #tpu.memory_space<vmem>>, vector<8x8x64xf32>
    %247 = vector.shape_cast %246 : vector<8x8x64xf32> to vector<64x64xf32>
    %248 = arith.truncf %247 : vector<64x64xf32> to vector<64x64xbf16>
    %c2_243 = arith.constant 2 : index
    %c0_244 = arith.constant 0 : index
    %c0_245 = arith.constant 0 : index
    %249 = vector.load %arg10[%c2_243, %c0_244, %c0_245] : memref<9x64x64xbf16, #tpu.memory_space<vmem>>, vector<1x64x64xbf16>
    %250 = vector.shape_cast %249 : vector<1x64x64xbf16> to vector<64x64xbf16>
    %cst_246 = arith.constant dense<0.000000e+00> : vector<64x64xf32>
    %251 = tpu.matmul %248, %250, %cst_246 {dimension_numbers = #tpu.dot_dimension_numbers<[1], [0], [0], [1], [0, 0, 1, 1], [], []>} : vector<64x64xbf16>, vector<64x64xbf16>, vector<64x64xf32> -> vector<64x64xf32>
    %252 = arith.addf %245, %251 : vector<64x64xf32>
    %c1_247 = arith.constant 1 : index
    %c0_248 = arith.constant 0 : index
    %c0_249 = arith.constant 0 : index
    %253 = vector.load %arg19[%c1_247, %c0_248, %c0_249] : memref<10x10x64xf32, #tpu.memory_space<vmem>>, vector<8x8x64xf32>
    %254 = vector.shape_cast %253 : vector<8x8x64xf32> to vector<64x64xf32>
    %255 = arith.truncf %254 : vector<64x64xf32> to vector<64x64xbf16>
    %c3_250 = arith.constant 3 : index
    %c0_251 = arith.constant 0 : index
    %c0_252 = arith.constant 0 : index
    %256 = vector.load %arg10[%c3_250, %c0_251, %c0_252] : memref<9x64x64xbf16, #tpu.memory_space<vmem>>, vector<1x64x64xbf16>
    %257 = vector.shape_cast %256 : vector<1x64x64xbf16> to vector<64x64xbf16>
    %cst_253 = arith.constant dense<0.000000e+00> : vector<64x64xf32>
    %258 = tpu.matmul %255, %257, %cst_253 {dimension_numbers = #tpu.dot_dimension_numbers<[1], [0], [0], [1], [0, 0, 1, 1], [], []>} : vector<64x64xbf16>, vector<64x64xbf16>, vector<64x64xf32> -> vector<64x64xf32>
    %259 = arith.addf %252, %258 : vector<64x64xf32>
    %c1_254 = arith.constant 1 : index
    %c1_255 = arith.constant 1 : index
    %c0_256 = arith.constant 0 : index
    %260 = vector.load %arg19[%c1_254, %c1_255, %c0_256] : memref<10x10x64xf32, #tpu.memory_space<vmem>>, vector<8x8x64xf32>
    %261 = vector.shape_cast %260 : vector<8x8x64xf32> to vector<64x64xf32>
    %262 = arith.truncf %261 : vector<64x64xf32> to vector<64x64xbf16>
    %c4_257 = arith.constant 4 : index
    %c0_258 = arith.constant 0 : index
    %c0_259 = arith.constant 0 : index
    %263 = vector.load %arg10[%c4_257, %c0_258, %c0_259] : memref<9x64x64xbf16, #tpu.memory_space<vmem>>, vector<1x64x64xbf16>
    %264 = vector.shape_cast %263 : vector<1x64x64xbf16> to vector<64x64xbf16>
    %cst_260 = arith.constant dense<0.000000e+00> : vector<64x64xf32>
    %265 = tpu.matmul %262, %264, %cst_260 {dimension_numbers = #tpu.dot_dimension_numbers<[1], [0], [0], [1], [0, 0, 1, 1], [], []>} : vector<64x64xbf16>, vector<64x64xbf16>, vector<64x64xf32> -> vector<64x64xf32>
    %266 = arith.addf %259, %265 : vector<64x64xf32>
    %c1_261 = arith.constant 1 : index
    %c2_262 = arith.constant 2 : index
    %c0_263 = arith.constant 0 : index
    %267 = vector.load %arg19[%c1_261, %c2_262, %c0_263] : memref<10x10x64xf32, #tpu.memory_space<vmem>>, vector<8x8x64xf32>
    %268 = vector.shape_cast %267 : vector<8x8x64xf32> to vector<64x64xf32>
    %269 = arith.truncf %268 : vector<64x64xf32> to vector<64x64xbf16>
    %c5_264 = arith.constant 5 : index
    %c0_265 = arith.constant 0 : index
    %c0_266 = arith.constant 0 : index
    %270 = vector.load %arg10[%c5_264, %c0_265, %c0_266] : memref<9x64x64xbf16, #tpu.memory_space<vmem>>, vector<1x64x64xbf16>
    %271 = vector.shape_cast %270 : vector<1x64x64xbf16> to vector<64x64xbf16>
    %cst_267 = arith.constant dense<0.000000e+00> : vector<64x64xf32>
    %272 = tpu.matmul %269, %271, %cst_267 {dimension_numbers = #tpu.dot_dimension_numbers<[1], [0], [0], [1], [0, 0, 1, 1], [], []>} : vector<64x64xbf16>, vector<64x64xbf16>, vector<64x64xf32> -> vector<64x64xf32>
    %273 = arith.addf %266, %272 : vector<64x64xf32>
    %c2_268 = arith.constant 2 : index
    %c0_269 = arith.constant 0 : index
    %c0_270 = arith.constant 0 : index
    %274 = vector.load %arg19[%c2_268, %c0_269, %c0_270] : memref<10x10x64xf32, #tpu.memory_space<vmem>>, vector<8x8x64xf32>
    %275 = vector.shape_cast %274 : vector<8x8x64xf32> to vector<64x64xf32>
    %276 = arith.truncf %275 : vector<64x64xf32> to vector<64x64xbf16>
    %c6_271 = arith.constant 6 : index
    %c0_272 = arith.constant 0 : index
    %c0_273 = arith.constant 0 : index
    %277 = vector.load %arg10[%c6_271, %c0_272, %c0_273] : memref<9x64x64xbf16, #tpu.memory_space<vmem>>, vector<1x64x64xbf16>
    %278 = vector.shape_cast %277 : vector<1x64x64xbf16> to vector<64x64xbf16>
    %cst_274 = arith.constant dense<0.000000e+00> : vector<64x64xf32>
    %279 = tpu.matmul %276, %278, %cst_274 {dimension_numbers = #tpu.dot_dimension_numbers<[1], [0], [0], [1], [0, 0, 1, 1], [], []>} : vector<64x64xbf16>, vector<64x64xbf16>, vector<64x64xf32> -> vector<64x64xf32>
    %280 = arith.addf %273, %279 : vector<64x64xf32>
    %c2_275 = arith.constant 2 : index
    %c1_276 = arith.constant 1 : index
    %c0_277 = arith.constant 0 : index
    %281 = vector.load %arg19[%c2_275, %c1_276, %c0_277] : memref<10x10x64xf32, #tpu.memory_space<vmem>>, vector<8x8x64xf32>
    %282 = vector.shape_cast %281 : vector<8x8x64xf32> to vector<64x64xf32>
    %283 = arith.truncf %282 : vector<64x64xf32> to vector<64x64xbf16>
    %c7_278 = arith.constant 7 : index
    %c0_279 = arith.constant 0 : index
    %c0_280 = arith.constant 0 : index
    %284 = vector.load %arg10[%c7_278, %c0_279, %c0_280] : memref<9x64x64xbf16, #tpu.memory_space<vmem>>, vector<1x64x64xbf16>
    %285 = vector.shape_cast %284 : vector<1x64x64xbf16> to vector<64x64xbf16>
    %cst_281 = arith.constant dense<0.000000e+00> : vector<64x64xf32>
    %286 = tpu.matmul %283, %285, %cst_281 {dimension_numbers = #tpu.dot_dimension_numbers<[1], [0], [0], [1], [0, 0, 1, 1], [], []>} : vector<64x64xbf16>, vector<64x64xbf16>, vector<64x64xf32> -> vector<64x64xf32>
    %287 = arith.addf %280, %286 : vector<64x64xf32>
    %c2_282 = arith.constant 2 : index
    %c2_283 = arith.constant 2 : index
    %c0_284 = arith.constant 0 : index
    %288 = vector.load %arg19[%c2_282, %c2_283, %c0_284] : memref<10x10x64xf32, #tpu.memory_space<vmem>>, vector<8x8x64xf32>
    %289 = vector.shape_cast %288 : vector<8x8x64xf32> to vector<64x64xf32>
    %290 = arith.truncf %289 : vector<64x64xf32> to vector<64x64xbf16>
    %c8_285 = arith.constant 8 : index
    %c0_286 = arith.constant 0 : index
    %c0_287 = arith.constant 0 : index
    %291 = vector.load %arg10[%c8_285, %c0_286, %c0_287] : memref<9x64x64xbf16, #tpu.memory_space<vmem>>, vector<1x64x64xbf16>
    %292 = vector.shape_cast %291 : vector<1x64x64xbf16> to vector<64x64xbf16>
    %cst_288 = arith.constant dense<0.000000e+00> : vector<64x64xf32>
    %293 = tpu.matmul %290, %292, %cst_288 {dimension_numbers = #tpu.dot_dimension_numbers<[1], [0], [0], [1], [0, 0, 1, 1], [], []>} : vector<64x64xbf16>, vector<64x64xbf16>, vector<64x64xf32> -> vector<64x64xf32>
    %294 = arith.addf %287, %293 : vector<64x64xf32>
    %295 = arith.negf %294 : vector<64x64xf32>
    %296 = math.exp %295 : vector<64x64xf32>
    %cst_289 = arith.constant 1.000000e+00 : f32
    %297 = vector.broadcast %cst_289 : f32 to vector<64x64xf32>
    %298 = arith.addf %297, %296 : vector<64x64xf32>
    %299 = arith.divf %297, %298 : vector<64x64xf32>
    %300 = arith.mulf %294, %299 : vector<64x64xf32>
    %301 = vector.shape_cast %300 : vector<64x64xf32> to vector<8x8x64xf32>
    %c1_290 = arith.constant 1 : index
    %c1_291 = arith.constant 1 : index
    %c0_292 = arith.constant 0 : index
    %302 = vector.load %arg19[%c1_290, %c1_291, %c0_292] : memref<10x10x64xf32, #tpu.memory_space<vmem>>, vector<8x8x64xf32>
    tpu.vector_store %arg19[%c1_290, %c1_291, %c0_292], %301 {strides = array<i32>} : memref<10x10x64xf32, #tpu.memory_space<vmem>>, vector<8x8x64xf32>,
    %c0_293 = arith.constant 0 : index
    %c0_294 = arith.constant 0 : index
    %303 = vector.load %arg13[%c0_293, %c0_294] : memref<1x64xf32, #tpu.memory_space<vmem>>, vector<1x64xf32>
    %c0_295 = arith.constant 0 : index
    %c0_296 = arith.constant 0 : index
    %c0_297 = arith.constant 0 : index
    %304 = vector.load %arg19[%c0_295, %c0_296, %c0_297] : memref<10x10x64xf32, #tpu.memory_space<vmem>>, vector<8x8x64xf32>
    %305 = vector.shape_cast %304 : vector<8x8x64xf32> to vector<64x64xf32>
    %306 = arith.truncf %305 : vector<64x64xf32> to vector<64x64xbf16>
    %c0_298 = arith.constant 0 : index
    %c0_299 = arith.constant 0 : index
    %c0_300 = arith.constant 0 : index
    %307 = vector.load %arg12[%c0_298, %c0_299, %c0_300] : memref<9x64x64xbf16, #tpu.memory_space<vmem>>, vector<1x64x64xbf16>
    %308 = vector.shape_cast %307 : vector<1x64x64xbf16> to vector<64x64xbf16>
    %cst_301 = arith.constant dense<0.000000e+00> : vector<64x64xf32>
    %309 = tpu.matmul %306, %308, %cst_301 {dimension_numbers = #tpu.dot_dimension_numbers<[1], [0], [0], [1], [0, 0, 1, 1], [], []>} : vector<64x64xbf16>, vector<64x64xbf16>, vector<64x64xf32> -> vector<64x64xf32>
    %310 = vector.broadcast %303 : vector<1x64xf32> to vector<64x64xf32>
    %311 = arith.addf %310, %309 : vector<64x64xf32>
    %c0_302 = arith.constant 0 : index
    %c1_303 = arith.constant 1 : index
    %c0_304 = arith.constant 0 : index
    %312 = vector.load %arg19[%c0_302, %c1_303, %c0_304] : memref<10x10x64xf32, #tpu.memory_space<vmem>>, vector<8x8x64xf32>
    %313 = vector.shape_cast %312 : vector<8x8x64xf32> to vector<64x64xf32>
    %314 = arith.truncf %313 : vector<64x64xf32> to vector<64x64xbf16>
    %c1_305 = arith.constant 1 : index
    %c0_306 = arith.constant 0 : index
    %c0_307 = arith.constant 0 : index
    %315 = vector.load %arg12[%c1_305, %c0_306, %c0_307] : memref<9x64x64xbf16, #tpu.memory_space<vmem>>, vector<1x64x64xbf16>
    %316 = vector.shape_cast %315 : vector<1x64x64xbf16> to vector<64x64xbf16>
    %cst_308 = arith.constant dense<0.000000e+00> : vector<64x64xf32>
    %317 = tpu.matmul %314, %316, %cst_308 {dimension_numbers = #tpu.dot_dimension_numbers<[1], [0], [0], [1], [0, 0, 1, 1], [], []>} : vector<64x64xbf16>, vector<64x64xbf16>, vector<64x64xf32> -> vector<64x64xf32>
    %318 = arith.addf %311, %317 : vector<64x64xf32>
    %c0_309 = arith.constant 0 : index
    %c2_310 = arith.constant 2 : index
    %c0_311 = arith.constant 0 : index
    %319 = vector.load %arg19[%c0_309, %c2_310, %c0_311] : memref<10x10x64xf32, #tpu.memory_space<vmem>>, vector<8x8x64xf32>
    %320 = vector.shape_cast %319 : vector<8x8x64xf32> to vector<64x64xf32>
    %321 = arith.truncf %320 : vector<64x64xf32> to vector<64x64xbf16>
    %c2_312 = arith.constant 2 : index
    %c0_313 = arith.constant 0 : index
    %c0_314 = arith.constant 0 : index
    %322 = vector.load %arg12[%c2_312, %c0_313, %c0_314] : memref<9x64x64xbf16, #tpu.memory_space<vmem>>, vector<1x64x64xbf16>
    %323 = vector.shape_cast %322 : vector<1x64x64xbf16> to vector<64x64xbf16>
    %cst_315 = arith.constant dense<0.000000e+00> : vector<64x64xf32>
    %324 = tpu.matmul %321, %323, %cst_315 {dimension_numbers = #tpu.dot_dimension_numbers<[1], [0], [0], [1], [0, 0, 1, 1], [], []>} : vector<64x64xbf16>, vector<64x64xbf16>, vector<64x64xf32> -> vector<64x64xf32>
    %325 = arith.addf %318, %324 : vector<64x64xf32>
    %c1_316 = arith.constant 1 : index
    %c0_317 = arith.constant 0 : index
    %c0_318 = arith.constant 0 : index
    %326 = vector.load %arg19[%c1_316, %c0_317, %c0_318] : memref<10x10x64xf32, #tpu.memory_space<vmem>>, vector<8x8x64xf32>
    %327 = vector.shape_cast %326 : vector<8x8x64xf32> to vector<64x64xf32>
    %328 = arith.truncf %327 : vector<64x64xf32> to vector<64x64xbf16>
    %c3_319 = arith.constant 3 : index
    %c0_320 = arith.constant 0 : index
    %c0_321 = arith.constant 0 : index
    %329 = vector.load %arg12[%c3_319, %c0_320, %c0_321] : memref<9x64x64xbf16, #tpu.memory_space<vmem>>, vector<1x64x64xbf16>
    %330 = vector.shape_cast %329 : vector<1x64x64xbf16> to vector<64x64xbf16>
    %cst_322 = arith.constant dense<0.000000e+00> : vector<64x64xf32>
    %331 = tpu.matmul %328, %330, %cst_322 {dimension_numbers = #tpu.dot_dimension_numbers<[1], [0], [0], [1], [0, 0, 1, 1], [], []>} : vector<64x64xbf16>, vector<64x64xbf16>, vector<64x64xf32> -> vector<64x64xf32>
    %332 = arith.addf %325, %331 : vector<64x64xf32>
    %c1_323 = arith.constant 1 : index
    %c1_324 = arith.constant 1 : index
    %c0_325 = arith.constant 0 : index
    %333 = vector.load %arg19[%c1_323, %c1_324, %c0_325] : memref<10x10x64xf32, #tpu.memory_space<vmem>>, vector<8x8x64xf32>
    %334 = vector.shape_cast %333 : vector<8x8x64xf32> to vector<64x64xf32>
    %335 = arith.truncf %334 : vector<64x64xf32> to vector<64x64xbf16>
    %c4_326 = arith.constant 4 : index
    %c0_327 = arith.constant 0 : index
    %c0_328 = arith.constant 0 : index
    %336 = vector.load %arg12[%c4_326, %c0_327, %c0_328] : memref<9x64x64xbf16, #tpu.memory_space<vmem>>, vector<1x64x64xbf16>
    %337 = vector.shape_cast %336 : vector<1x64x64xbf16> to vector<64x64xbf16>
    %cst_329 = arith.constant dense<0.000000e+00> : vector<64x64xf32>
    %338 = tpu.matmul %335, %337, %cst_329 {dimension_numbers = #tpu.dot_dimension_numbers<[1], [0], [0], [1], [0, 0, 1, 1], [], []>} : vector<64x64xbf16>, vector<64x64xbf16>, vector<64x64xf32> -> vector<64x64xf32>
    %339 = arith.addf %332, %338 : vector<64x64xf32>
    %c1_330 = arith.constant 1 : index
    %c2_331 = arith.constant 2 : index
    %c0_332 = arith.constant 0 : index
    %340 = vector.load %arg19[%c1_330, %c2_331, %c0_332] : memref<10x10x64xf32, #tpu.memory_space<vmem>>, vector<8x8x64xf32>
    %341 = vector.shape_cast %340 : vector<8x8x64xf32> to vector<64x64xf32>
    %342 = arith.truncf %341 : vector<64x64xf32> to vector<64x64xbf16>
    %c5_333 = arith.constant 5 : index
    %c0_334 = arith.constant 0 : index
    %c0_335 = arith.constant 0 : index
    %343 = vector.load %arg12[%c5_333, %c0_334, %c0_335] : memref<9x64x64xbf16, #tpu.memory_space<vmem>>, vector<1x64x64xbf16>
    %344 = vector.shape_cast %343 : vector<1x64x64xbf16> to vector<64x64xbf16>
    %cst_336 = arith.constant dense<0.000000e+00> : vector<64x64xf32>
    %345 = tpu.matmul %342, %344, %cst_336 {dimension_numbers = #tpu.dot_dimension_numbers<[1], [0], [0], [1], [0, 0, 1, 1], [], []>} : vector<64x64xbf16>, vector<64x64xbf16>, vector<64x64xf32> -> vector<64x64xf32>
    %346 = arith.addf %339, %345 : vector<64x64xf32>
    %c2_337 = arith.constant 2 : index
    %c0_338 = arith.constant 0 : index
    %c0_339 = arith.constant 0 : index
    %347 = vector.load %arg19[%c2_337, %c0_338, %c0_339] : memref<10x10x64xf32, #tpu.memory_space<vmem>>, vector<8x8x64xf32>
    %348 = vector.shape_cast %347 : vector<8x8x64xf32> to vector<64x64xf32>
    %349 = arith.truncf %348 : vector<64x64xf32> to vector<64x64xbf16>
    %c6_340 = arith.constant 6 : index
    %c0_341 = arith.constant 0 : index
    %c0_342 = arith.constant 0 : index
    %350 = vector.load %arg12[%c6_340, %c0_341, %c0_342] : memref<9x64x64xbf16, #tpu.memory_space<vmem>>, vector<1x64x64xbf16>
    %351 = vector.shape_cast %350 : vector<1x64x64xbf16> to vector<64x64xbf16>
    %cst_343 = arith.constant dense<0.000000e+00> : vector<64x64xf32>
    %352 = tpu.matmul %349, %351, %cst_343 {dimension_numbers = #tpu.dot_dimension_numbers<[1], [0], [0], [1], [0, 0, 1, 1], [], []>} : vector<64x64xbf16>, vector<64x64xbf16>, vector<64x64xf32> -> vector<64x64xf32>
    %353 = arith.addf %346, %352 : vector<64x64xf32>
    %c2_344 = arith.constant 2 : index
    %c1_345 = arith.constant 1 : index
    %c0_346 = arith.constant 0 : index
    %354 = vector.load %arg19[%c2_344, %c1_345, %c0_346] : memref<10x10x64xf32, #tpu.memory_space<vmem>>, vector<8x8x64xf32>
    %355 = vector.shape_cast %354 : vector<8x8x64xf32> to vector<64x64xf32>
    %356 = arith.truncf %355 : vector<64x64xf32> to vector<64x64xbf16>
    %c7_347 = arith.constant 7 : index
    %c0_348 = arith.constant 0 : index
    %c0_349 = arith.constant 0 : index
    %357 = vector.load %arg12[%c7_347, %c0_348, %c0_349] : memref<9x64x64xbf16, #tpu.memory_space<vmem>>, vector<1x64x64xbf16>
    %358 = vector.shape_cast %357 : vector<1x64x64xbf16> to vector<64x64xbf16>
    %cst_350 = arith.constant dense<0.000000e+00> : vector<64x64xf32>
    %359 = tpu.matmul %356, %358, %cst_350 {dimension_numbers = #tpu.dot_dimension_numbers<[1], [0], [0], [1], [0, 0, 1, 1], [], []>} : vector<64x64xbf16>, vector<64x64xbf16>, vector<64x64xf32> -> vector<64x64xf32>
    %360 = arith.addf %353, %359 : vector<64x64xf32>
    %c2_351 = arith.constant 2 : index
    %c2_352 = arith.constant 2 : index
    %c0_353 = arith.constant 0 : index
    %361 = vector.load %arg19[%c2_351, %c2_352, %c0_353] : memref<10x10x64xf32, #tpu.memory_space<vmem>>, vector<8x8x64xf32>
    %362 = vector.shape_cast %361 : vector<8x8x64xf32> to vector<64x64xf32>
    %363 = arith.truncf %362 : vector<64x64xf32> to vector<64x64xbf16>
    %c8_354 = arith.constant 8 : index
    %c0_355 = arith.constant 0 : index
    %c0_356 = arith.constant 0 : index
    %364 = vector.load %arg12[%c8_354, %c0_355, %c0_356] : memref<9x64x64xbf16, #tpu.memory_space<vmem>>, vector<1x64x64xbf16>
    %365 = vector.shape_cast %364 : vector<1x64x64xbf16> to vector<64x64xbf16>
    %cst_357 = arith.constant dense<0.000000e+00> : vector<64x64xf32>
    %366 = tpu.matmul %363, %365, %cst_357 {dimension_numbers = #tpu.dot_dimension_numbers<[1], [0], [0], [1], [0, 0, 1, 1], [], []>} : vector<64x64xbf16>, vector<64x64xbf16>, vector<64x64xf32> -> vector<64x64xf32>
    %367 = arith.addf %360, %366 : vector<64x64xf32>
    %368 = arith.negf %367 : vector<64x64xf32>
    %369 = math.exp %368 : vector<64x64xf32>
    %cst_358 = arith.constant 1.000000e+00 : f32
    %370 = vector.broadcast %cst_358 : f32 to vector<64x64xf32>
    %371 = arith.addf %370, %369 : vector<64x64xf32>
    %372 = arith.divf %370, %371 : vector<64x64xf32>
    %373 = arith.mulf %367, %372 : vector<64x64xf32>
    %c0_359 = arith.constant 0 : index
    %c0_360 = arith.constant 0 : index
    %374 = vector.load %arg20[%c0_359, %c0_360] : memref<64x64xf32, #tpu.memory_space<vmem>>, vector<64x64xf32>
    %c0_361 = arith.constant 0 : index
    %c0_362 = arith.constant 0 : index
    %375 = vector.load %arg15[%c0_361, %c0_362] : memref<1x64xf32, #tpu.memory_space<vmem>>, vector<1x64xf32>
    %376 = vector.broadcast %375 : vector<1x64xf32> to vector<64x64xf32>
    %377 = arith.addf %374, %376 : vector<64x64xf32>
    %378 = arith.truncf %373 : vector<64x64xf32> to vector<64x64xbf16>
    %c0_363 = arith.constant 0 : index
    %c0_364 = arith.constant 0 : index
    %379 = vector.load %arg14[%c0_363, %c0_364] : memref<64x64xbf16, #tpu.memory_space<vmem>>, vector<64x64xbf16>
    %cst_365 = arith.constant dense<0.000000e+00> : vector<64x64xf32>
    %380 = tpu.matmul %378, %379, %cst_365 {dimension_numbers = #tpu.dot_dimension_numbers<[1], [0], [0], [1], [0, 0, 1, 1], [], []>} : vector<64x64xbf16>, vector<64x64xbf16>, vector<64x64xf32> -> vector<64x64xf32>
    %381 = arith.addf %377, %380 : vector<64x64xf32>
    %c0_366 = arith.constant 0 : index
    %c0_367 = arith.constant 0 : index
    %382 = vector.load %arg20[%c0_366, %c0_367] : memref<64x64xf32, #tpu.memory_space<vmem>>, vector<64x64xf32>
    tpu.vector_store %arg20[%c0_366, %c0_367], %381 {strides = array<i32>} : memref<64x64xf32, #tpu.memory_space<vmem>>, vector<64x64xf32>,
    %c0_368 = arith.constant 0 : index
    %c0_369 = arith.constant 0 : index
    %383 = vector.load %arg20[%c0_368, %c0_369] : memref<64x64xf32, #tpu.memory_space<vmem>>, vector<64x64xf32>
    %384 = arith.truncf %383 : vector<64x64xf32> to vector<64x64xbf16>
    %c0_370 = arith.constant 0 : index
    %c0_371 = arith.constant 0 : index
    %385 = vector.load %arg16[%c0_370, %c0_371] : memref<64x256xbf16, #tpu.memory_space<vmem>>, vector<64x256xbf16>
    %cst_372 = arith.constant dense<0.000000e+00> : vector<64x256xf32>
    %386 = tpu.matmul %384, %385, %cst_372 {dimension_numbers = #tpu.dot_dimension_numbers<[1], [0], [0], [1], [0, 0, 1, 1], [], []>} : vector<64x64xbf16>, vector<64x256xbf16>, vector<64x256xf32> -> vector<64x256xf32>
    %c0_373 = arith.constant 0 : index
    %c0_374 = arith.constant 0 : index
    %387 = vector.load %arg17[%c0_373, %c0_374] : memref<1x256xf32, #tpu.memory_space<vmem>>, vector<1x256xf32>
    %388 = vector.broadcast %387 : vector<1x256xf32> to vector<64x256xf32>
    %389 = arith.addf %386, %388 : vector<64x256xf32>
    %cst_375 = arith.constant 0.000000e+00 : f32
    %390 = vector.broadcast %cst_375 : f32 to vector<64x256xf32>
    %391 = arith.maximumf %389, %390 : vector<64x256xf32>
    %392 = vector.extract_strided_slice %391 {offsets = [0, 0], sizes = [64, 128], strides = [1, 1]} : vector<64x256xf32> to vector<64x128xf32>
    %393 = vector.shape_cast %392 : vector<64x128xf32> to vector<8x8x128xf32>
    %c0_376 = arith.constant 0 : index
    %c0_377 = arith.constant 0 : index
    %c0_378 = arith.constant 0 : index
    %c0_379 = arith.constant 0 : index
    %c0_380 = arith.constant 0 : index
    %394 = vector.load %arg18[%c0_376, %c0_377, %c0_378, %c0_379, %c0_380] : memref<1x8x2x8x128xf32, #tpu.memory_space<vmem>>, vector<1x8x1x8x128xf32>
    %395 = vector.shape_cast %394 : vector<1x8x1x8x128xf32> to vector<8x8x128xf32>
    %396 = vector.shape_cast %393 : vector<8x8x128xf32> to vector<1x8x1x8x128xf32>
    tpu.vector_store %arg18[%c0_376, %c0_377, %c0_378, %c0_379, %c0_380], %396 {strides = array<i32>} : memref<1x8x2x8x128xf32, #tpu.memory_space<vmem>>, vector<1x8x1x8x128xf32>,
    %397 = vector.extract_strided_slice %391 {offsets = [0, 128], sizes = [64, 128], strides = [1, 1]} : vector<64x256xf32> to vector<64x128xf32>
    %398 = vector.shape_cast %397 : vector<64x128xf32> to vector<8x8x128xf32>
    %c0_381 = arith.constant 0 : index
    %c0_382 = arith.constant 0 : index
    %c1_383 = arith.constant 1 : index
    %c0_384 = arith.constant 0 : index
    %c0_385 = arith.constant 0 : index
    %399 = vector.load %arg18[%c0_381, %c0_382, %c1_383, %c0_384, %c0_385] : memref<1x8x2x8x128xf32, #tpu.memory_space<vmem>>, vector<1x8x1x8x128xf32>
    %400 = vector.shape_cast %399 : vector<1x8x1x8x128xf32> to vector<8x8x128xf32>
    %401 = vector.shape_cast %398 : vector<8x8x128xf32> to vector<1x8x1x8x128xf32>
    tpu.vector_store %arg18[%c0_381, %c0_382, %c1_383, %c0_384, %c0_385], %401 {strides = array<i32>} : memref<1x8x2x8x128xf32, #tpu.memory_space<vmem>>, vector<1x8x1x8x128xf32>,
    return
  }
  func.func @transform_0(%arg0: i32) -> (i32, i32, i32, i32) {
    %c0_i32 = arith.constant 0 : i32
    %c0_i32_0 = arith.constant 0 : i32
    %c0_i32_1 = arith.constant 0 : i32
    %c0_i32_2 = arith.constant 0 : i32
    return %arg0, %c0_i32, %c0_i32_0, %c0_i32_1 : i32, i32, i32, i32
  }
  func.func @transform_1(%arg0: i32) -> (i32, i32, i32) {
    %c0_i32 = arith.constant 0 : i32
    %c0_i32_0 = arith.constant 0 : i32
    %c0_i32_1 = arith.constant 0 : i32
    %c0_i32_2 = arith.constant 0 : i32
    return %c0_i32, %c0_i32_0, %c0_i32_1 : i32, i32, i32
  }
  func.func @transform_2(%arg0: i32) -> (i32, i32) {
    %c0_i32 = arith.constant 0 : i32
    %c0_i32_0 = arith.constant 0 : i32
    %c0_i32_1 = arith.constant 0 : i32
    return %c0_i32, %c0_i32_0 : i32, i32
  }
  func.func @transform_3(%arg0: i32) -> (i32, i32, i32) {
    %c0_i32 = arith.constant 0 : i32
    %c0_i32_0 = arith.constant 0 : i32
    %c0_i32_1 = arith.constant 0 : i32
    %c0_i32_2 = arith.constant 0 : i32
    return %c0_i32, %c0_i32_0, %c0_i32_1 : i32, i32, i32
  }
  func.func @transform_4(%arg0: i32) -> (i32, i32, i32) {
    %c0_i32 = arith.constant 0 : i32
    %c0_i32_0 = arith.constant 0 : i32
    %c0_i32_1 = arith.constant 0 : i32
    %c0_i32_2 = arith.constant 0 : i32
    return %c0_i32, %c0_i32_0, %c0_i32_1 : i32, i32, i32
  }
  func.func @transform_5(%arg0: i32) -> (i32, i32, i32) {
    %c0_i32 = arith.constant 0 : i32
    %c0_i32_0 = arith.constant 0 : i32
    %c0_i32_1 = arith.constant 0 : i32
    %c0_i32_2 = arith.constant 0 : i32
    return %c0_i32, %c0_i32_0, %c0_i32_1 : i32, i32, i32
  }
  func.func @transform_6(%arg0: i32) -> (i32, i32) {
    %c0_i32 = arith.constant 0 : i32
    %c0_i32_0 = arith.constant 0 : i32
    %c0_i32_1 = arith.constant 0 : i32
    return %c0_i32, %c0_i32_0 : i32, i32
  }
  func.func @transform_7(%arg0: i32) -> (i32, i32) {
    %c0_i32 = arith.constant 0 : i32
    %c0_i32_0 = arith.constant 0 : i32
    %c0_i32_1 = arith.constant 0 : i32
    return %c0_i32, %c0_i32_0 : i32, i32
  }
  func.func @transform_8(%arg0: i32) -> (i32, i32) {
    %c0_i32 = arith.constant 0 : i32
    %c0_i32_0 = arith.constant 0 : i32
    %c0_i32_1 = arith.constant 0 : i32
    return %c0_i32, %c0_i32_0 : i32, i32
  }
  func.func @transform_9(%arg0: i32) -> (i32, i32, i32) {
    %c0_i32 = arith.constant 0 : i32
    %c0_i32_0 = arith.constant 0 : i32
    %c0_i32_1 = arith.constant 0 : i32
    %c0_i32_2 = arith.constant 0 : i32
    return %c0_i32, %c0_i32_0, %c0_i32_1 : i32, i32, i32
  }
  func.func @transform_10(%arg0: i32) -> (i32, i32, i32) {
    %c0_i32 = arith.constant 0 : i32
    %c0_i32_0 = arith.constant 0 : i32
    %c0_i32_1 = arith.constant 0 : i32
    %c0_i32_2 = arith.constant 0 : i32
    return %c0_i32, %c0_i32_0, %c0_i32_1 : i32, i32, i32
  }
  func.func @transform_11(%arg0: i32) -> (i32, i32, i32) {
    %c0_i32 = arith.constant 0 : i32
    %c0_i32_0 = arith.constant 0 : i32
    %c0_i32_1 = arith.constant 0 : i32
    %c0_i32_2 = arith.constant 0 : i32
    return %c0_i32, %c0_i32_0, %c0_i32_1 : i32, i32, i32
  }
  func.func @transform_12(%arg0: i32) -> (i32, i32) {
    %c0_i32 = arith.constant 0 : i32
    %c0_i32_0 = arith.constant 0 : i32
    %c0_i32_1 = arith.constant 0 : i32
    return %c0_i32, %c0_i32_0 : i32, i32
  }
  func.func @transform_13(%arg0: i32) -> (i32, i32) {
    %c0_i32 = arith.constant 0 : i32
    %c0_i32_0 = arith.constant 0 : i32
    %c0_i32_1 = arith.constant 0 : i32
    return %c0_i32, %c0_i32_0 : i32, i32
  }
  func.func @transform_14(%arg0: i32) -> (i32, i32) {
    %c0_i32 = arith.constant 0 : i32
    %c0_i32_0 = arith.constant 0 : i32
    %c0_i32_1 = arith.constant 0 : i32
    return %c0_i32, %c0_i32_0 : i32, i32
  }
  func.func @transform_15(%arg0: i32) -> (i32, i32) {
    %c0_i32 = arith.constant 0 : i32
    %c0_i32_0 = arith.constant 0 : i32
    %c0_i32_1 = arith.constant 0 : i32
    return %c0_i32, %c0_i32_0 : i32, i32
  }
  func.func @transform_16(%arg0: i32) -> (i32, i32) {
    %c0_i32 = arith.constant 0 : i32
    %c0_i32_0 = arith.constant 0 : i32
    %c0_i32_1 = arith.constant 0 : i32
    return %c0_i32, %c0_i32_0 : i32, i32
  }
  func.func @transform_17(%arg0: i32) -> (i32, i32, i32, i32, i32) {
    %c0_i32 = arith.constant 0 : i32
    %c0_i32_0 = arith.constant 0 : i32
    %c0_i32_1 = arith.constant 0 : i32
    %c0_i32_2 = arith.constant 0 : i32
    %c0_i32_3 = arith.constant 0 : i32
    return %arg0, %c0_i32, %c0_i32_0, %c0_i32_1, %c0_i32_2 : i32, i32, i32, i32, i32
  }
}

</mosaic_0001>

<bundles_post_ra>
// kernel: upconv3d_block_forward.1
= control target key start
LH: loop header
LB: loop body
LE: loop exit
PB: predicated region body
PF: predicated region fallthrough
CT: control target
= control target key end

     0   :  { %s12084_s0 = inlined_call_operand.vmem [shape: f32[2,8,8,64], index: 0, kind: input, shape index: {}]   ;;  %s12085_s1 = inlined_call_operand.hbm [shape: bf16[9,64,64], index: 1, kind: input, shape index: {}]   ;;  %s12086_s2 = inlined_call_operand.hbm [shape: f32[1,64], index: 2, kind: input, shape index: {}]   ;;  %s12087_s3 = inlined_call_operand.hbm [shape: bf16[9,64,64], index: 3, kind: input, shape index: {}]   ;;  %s12088_s4 = inlined_call_operand.hbm [shape: f32[8,8,64], index: 4, kind: input, shape index: {}]   ;;  %s12089_s5 = inlined_call_operand.hbm [shape: bf16[9,64,64], index: 5, kind: input, shape index: {}]   ;;  %s12090_s6 = inlined_call_operand.hbm [shape: f32[1,64], index: 6, kind: input, shape index: {}]   ;;  %s12091_s7 = inlined_call_operand.hbm [shape: bf16[64,64], index: 7, kind: input, shape index: {}]   ;;  %s12092_s8 = inlined_call_operand.hbm [shape: f32[1,64], index: 8, kind: input, shape index: {}]   ;;  %s12093_s9 = inlined_call_operand.hbm [shape: bf16[9,64,64], index: 9, kind: input, shape index: {}]   ;;  %s12094_s10 = inlined_call_operand.hbm [shape: f32[8,8,64], index: 10, kind: input, shape index: {}]   ;;  %s12095_s11 = inlined_call_operand.hbm [shape: bf16[9,64,64], index: 11, kind: input, shape index: {}]   ;;  %s12096_s12 = inlined_call_operand.hbm [shape: f32[1,64], index: 12, kind: input, shape index: {}]   ;;  %s12097_s13 = inlined_call_operand.hbm [shape: bf16[64,64], index: 13, kind: input, shape index: {}]   ;;  %s12098_s14 = inlined_call_operand.hbm [shape: f32[1,64], index: 14, kind: input, shape index: {}]   ;;  %s12099_s15 = inlined_call_operand.hbm [shape: bf16[64,256], index: 15, kind: input, shape index: {}]   ;;  %s12100_s16 = inlined_call_operand.hbm [shape: f32[1,256], index: 16, kind: input, shape index: {}]   ;;  %s12101_s17 = inlined_call_operand.vmem [shape: f32[2,8,2,8,128], index: 17, kind: output, shape index: {}]  }
   0x1   :  { %12111 = sst [smem:[#allocation40_spill]] %s12084_s0 }
   0x2   :  { %12112 = sst [smem:[#allocation41_spill]] %s12085_s1 }
   0x3   :  { %12113 = sst [smem:[#allocation42_spill]] %s12086_s2 }
   0x4   :  { %12114 = sst [smem:[#allocation43_spill]] %s12088_s4 }
   0x5   :  { %12115 = sst [smem:[#allocation44_spill]] %s12090_s6 }
   0x6   :  { %12116 = sst [smem:[#allocation45_spill]] %s12092_s8 }
   0x7   :  { %12117 = sst [smem:[#allocation46_spill]] %s12094_s10 }
   0x8   :  { %12118 = sst [smem:[#allocation47_spill]] %s12101_s17 }
   0x9   :  { %22 = vsyncpa [#allocation5], 0 }
   0xa   :  { %23 = vsyncpa [#allocation7], 0 }
   0xb   :  { %24 = vsyncpa [#allocation10], 0 }
   0xc   :  { %25 = vsyncpa [#allocation13], 0 }
   0xd   :  { %26 = vsyncpa [#allocation16], 0 }
   0xe   :  { %27 = vsyncpa [#allocation19], 0 }
   0xf   :  { %28 = vsyncpa [#allocation22], 0 }
  0x10   :  { %29 = vsyncpa [#allocation25], 0 }
  0x11   :  { %30 = vsyncpa [#allocation28], 0  ;;  %s10752_s24 = smov 0  }
  0x12 LB: > { %12119 = sst [smem:[#allocation38_spill]] %s10638_s24  ;;  %s10640_s25 = smov [#allocation6]   ;;  %s10638_s24 = sphi %s10752_s24, %s36_s24  }
  0x13   : > { %s455_s26 = sshll.u32 %s10640_s25, 4  ;;  %s10758_s27 = sadd.s32 4294967295, %s10638_s24   ;;  %s10763_s26 = int_to_ptr.vmem [resolvable:$true] %s455_s26 }
  0x14   : > { %12120 = sst [smem:[#allocation39_spill]] %s10758_s27  ;;  %p7679_p0 = scmp.ge.s32.totalorder %s10638_s24, 1 }
  0x15   : > { %p429_p1 = scmp.lt.s32.totalorder %s10638_s24, 3  ;;  %p12106_p2 = scmp.eq.s32.totalorder %s10758_s27, 0 }
  0x16   : > { %s10641_s29 = smov [#allocation9]   ;;  %s10642_s18 = smov [#allocation12]  }
  0x17   : > { %p10765_p3 = pnand %p7679_p0, %p429_p1  ;;  %s478_s0 = sshll.u32 %s10641_s29, 4  ;;  %s10771_s0 = int_to_ptr.vmem [resolvable:$true] %s478_s0 }
  0x18   : > { %s505_s19 = sshll.u32 %s10642_s18, 4  ;;  %s10643_s1 = smov [#allocation15]   ;;  %s10779_s19 = int_to_ptr.vmem [resolvable:$true] %s505_s19 }
  0x19   : > { %s12121_s28 = scalar_select %p10765_p3, 1, 0 }
  0x1a   : > { %p9707_p4 = pneg %p10765_p3  ;;  %s10781_s20 = sshll.u32 %s10643_s1, 4  ;;  %s530_s20 = int_to_ptr.vmem [resolvable:$true] %s10781_s20 }
  0x1b   : > { %s12123_s2 = sld [smem:[#allocation42_spill]] }
  0x1c   : > { %p10775_p5 = pnand %p12106_p2, %p9707_p4 }
  0x1e   : > { %p10791_p7 = pneg %p10775_p5 }
  0x21   : > { %s10148_s23 = scalar_lea.hbm %s12123_s2, 16 }
  0x22   : > { %p10149_p6 = scmp.ne.s32.totalorder %s12123_s2, %s10148_s23  ;;  %p10155_p10 = scmp.lt.u32.totalorder %s10148_s23, %s12123_s2 }
  0x24   : > { %p10151_p8 = pnand %p10791_p7, %p10149_p6 }
  0x26   : > { %p10152_p9 = pneg %p10151_p8 }
  0x28   : > { %p10157_p11 = pnand %p10155_p10, %p10152_p9 }
  0x2a   : > { %10160 = shalt.err (!%p10157_p11)
}
  0x2b   : > { %s10161_s21 = scalar_lea.vmem %s10763_s26, 16  ;;  %s10168_s22 = scalar_lea.vmem %s10763_s26, 32 }
  0x2c   : > { %p10162_p12 = scmp.ne.s32.totalorder %s10763_s26, %s10161_s21  ;;  %p10169_p1 = scmp.lt.s32.totalorder %s10763_s26, %s10763_s26 }
  0x2d   : > { %p10170_p4 = scmp.lt.s32.totalorder %s10168_s22, %s10161_s21 }
  0x2e   : > { %p10164_p13 = pnand %p10162_p12, %p10791_p7 }
  0x2f   : > { %p10171_p6 = por %p10170_p4, %p10169_p1 }
  0x30   : > { %p10165_p0 = pneg %p10164_p13 }
  0x32   : > { %p10172_p8 = pnand %p10171_p6, %p10165_p0 }
  0x34   : > { %10175 = shalt.err (!%p10172_p8)
}
  0x35   : > { %9713 = dma.hbm_to_vmem [thread:$0]  (!%p10775_p5), %s12123_s2, 16, %s10763_s26, [#allocation7]  }
  0x36   : > { %s12125_s4 = sld [smem:[#allocation43_spill]] }
  0x3c   : > { %s10176_s1 = scalar_lea.hbm %s12125_s4, 1024 }
  0x3d   : > { %p10177_p9 = scmp.ne.s32.totalorder %s12125_s4, %s10176_s1  ;;  %p10183_p12 = scmp.lt.u32.totalorder %s10176_s1, %s12125_s4 }
  0x3f   : > { %p10179_p10 = pnand %p10177_p9, %p10791_p7 }
  0x41   : > { %p10180_p11 = pneg %p10179_p10 }
  0x43   : > { %p10185_p13 = pnand %p10183_p12, %p10180_p11 }
  0x45   : > { %10188 = shalt.err (!%p10185_p13)
}
  0x46   : > { %s10189_s26 = scalar_lea.vmem %s10771_s0, 1024  ;;  %p10197_p6 = scmp.lt.s32.totalorder %s10771_s0, %s10771_s0 }
  0x47   : > { %p10190_p0 = scmp.ne.s32.totalorder %s10771_s0, %s10189_s26  ;;  %p10198_p8 = scmp.lt.s32.totalorder %s10189_s26, %s10189_s26 }
  0x49   : > { %p10192_p1 = pnand %p10190_p0, %p10791_p7  ;;  %p10199_p9 = por %p10198_p8, %p10197_p6 }
  0x4b   : > { %p10193_p4 = pneg %p10192_p1 }
  0x4d   : > { %p10200_p10 = pnand %p10199_p9, %p10193_p4 }
  0x4f   : > { %10203 = shalt.err (!%p10200_p10)
}
  0x50   : > { %s12108_s17 = smov 128   ;;  %s12110_s27 = smov 8  }
  0x51   : > { %9719 = dma.hbm_to_vmem [thread:$0]  (!%p10775_p5), %s12125_s4, 1024, %s10771_s0, [#allocation10], %s12108_s17, %s12108_s17, %s12110_s27  }
  0x52   : > { %s12126_s6 = sld [smem:[#allocation44_spill]] }
  0x58   : > { %s10204_s1 = scalar_lea.hbm %s12126_s6, 16 }
  0x59   : > { %p10205_p11 = scmp.ne.s32.totalorder %s12126_s6, %s10204_s1  ;;  %p10211_p0 = scmp.lt.u32.totalorder %s10204_s1, %s12126_s6 }
  0x5b   : > { %p10207_p12 = pnand %p10205_p11, %p10791_p7 }
  0x5d   : > { %p10208_p13 = pneg %p10207_p12 }
  0x5f   : > { %p10213_p1 = pnand %p10211_p0, %p10208_p13 }
  0x61   : > { %10216 = shalt.err (!%p10213_p1)
}
  0x62   : > { %s10217_s0 = scalar_lea.vmem %s10779_s19, 16  ;;  %s10224_s23 = scalar_lea.vmem %s10779_s19, 32 }
  0x63   : > { %p10218_p4 = scmp.ne.s32.totalorder %s10779_s19, %s10217_s0  ;;  %p10225_p9 = scmp.lt.s32.totalorder %s10779_s19, %s10779_s19 }
  0x64   : > { %p10226_p10 = scmp.lt.s32.totalorder %s10224_s23, %s10217_s0 }
  0x65   : > { %p10220_p6 = pnand %p10218_p4, %p10791_p7 }
  0x66   : > { %p10227_p11 = por %p10226_p10, %p10225_p9 }
  0x67   : > { %p10221_p8 = pneg %p10220_p6 }
  0x69   : > { %p10228_p12 = pnand %p10227_p11, %p10221_p8 }
  0x6b   : > { %10231 = shalt.err (!%p10228_p12)
}
  0x6c   : > { %9725 = dma.hbm_to_vmem [thread:$0]  (!%p10775_p5), %s12126_s6, 16, %s10779_s19, [#allocation13]  }
  0x6d   : > { %s12127_s8 = sld [smem:[#allocation45_spill]] }
  0x73   : > { %s10232_s1 = scalar_lea.hbm %s12127_s8, 16 }
  0x74   : > { %p10233_p13 = scmp.ne.s32.totalorder %s12127_s8, %s10232_s1  ;;  %p10239_p4 = scmp.lt.u32.totalorder %s10232_s1, %s12127_s8 }
  0x76   : > { %p10235_p0 = pnand %p10233_p13, %p10791_p7 }
  0x78   : > { %p10236_p1 = pneg %p10235_p0 }
  0x7a   : > { %p10241_p6 = pnand %p10239_p4, %p10236_p1 }
  0x7c   : > { %10244 = shalt.err (!%p10241_p6)
}
  0x7d   : > { %s10245_s23 = scalar_lea.vmem %s530_s20, 16  ;;  %s10252_s19 = scalar_lea.vmem %s530_s20, 32 }
  0x7e   : > { %p10246_p8 = scmp.ne.s32.totalorder %s530_s20, %s10245_s23  ;;  %p10253_p11 = scmp.lt.s32.totalorder %s530_s20, %s530_s20 }
  0x7f   : > { %p10254_p12 = scmp.lt.s32.totalorder %s10252_s19, %s10245_s23 }
  0x80   : > { %p10248_p9 = pnand %p10246_p8, %p10791_p7 }
  0x81   : > { %p10255_p2 = por %p10254_p12, %p10253_p11 }
  0x82   : > { %p10249_p10 = pneg %p10248_p9 }
  0x84   : > { %p10256_p3 = pnand %p10255_p2, %p10249_p10 }
  0x86   : > { %10259 = shalt.err (!%p10256_p3)
}
  0x87   : > { %9731 = dma.hbm_to_vmem [thread:$0]  (!%p10775_p5), %s12127_s8, 16, %s530_s20, [#allocation16]  }
  0x88   : > { %s10646_s29 = smov [#allocation18]   ;;  %s10647_s1 = smov [#allocation21]  }
  0x89   : > { %s552_s18 = sshll.u32 %s10646_s29, 4  ;;  %s579_s21 = sshll.u32 %s10647_s1, 4  ;;  %s553_s18 = int_to_ptr.vmem [resolvable:$true] %s552_s18  ;;  %s580_s21 = int_to_ptr.vmem [resolvable:$true] %s579_s21 }
  0x8a   : > { %s12128_s10 = sld [smem:[#allocation46_spill]] }
  0x90   : > { %s10260_s0 = scalar_lea.hbm %s12128_s10, 1024 }
  0x91   : > { %p10261_p2 = scmp.ne.s32.totalorder %s12128_s10, %s10260_s0  ;;  %p10267_p0 = scmp.lt.u32.totalorder %s10260_s0, %s12128_s10 }
  0x93   : > { %p10263_p3 = pnand %p10261_p2, %p10791_p7 }
  0x95   : > { %p10264_p13 = pneg %p10263_p3 }
  0x97   : > { %p10269_p1 = pnand %p10267_p0, %p10264_p13 }
  0x99   : > { %10272 = shalt.err (!%p10269_p1)
}
  0x9a   : > { %s10273_s20 = scalar_lea.vmem %s553_s18, 1024  ;;  %p10281_p9 = scmp.lt.s32.totalorder %s553_s18, %s553_s18 }
  0x9b   : > { %p10274_p4 = scmp.ne.s32.totalorder %s553_s18, %s10273_s20  ;;  %p10282_p10 = scmp.lt.s32.totalorder %s10273_s20, %s10273_s20 }
  0x9d   : > { %p10276_p6 = pnand %p10274_p4, %p10791_p7  ;;  %p10283_p11 = por %p10282_p10, %p10281_p9 }
  0x9f   : > { %p10277_p8 = pneg %p10276_p6 }
  0xa1   : > { %p10284_p12 = pnand %p10283_p11, %p10277_p8 }
  0xa3   : > { %10287 = shalt.err (!%p10284_p12)
}
  0xa4   : > { %s12129_s25 = smov 128   ;;  %s10288_s26 = scalar_lea.hbm %s12096_s12, 16 }
  0xa5   : > { %9737 = dma.hbm_to_vmem [thread:$0]  (!%p10775_p5), %s12128_s10, 1024, %s553_s18, [#allocation19], %s12129_s25, %s12129_s25, %s12110_s27  }
  0xa6   : > { %p10289_p2 = scmp.ne.s32.totalorder %s12096_s12, %s10288_s26  ;;  %p10295_p0 = scmp.lt.u32.totalorder %s10288_s26, %s12096_s12 }
  0xa8   : > { %p10291_p3 = pnand %p10289_p2, %p10791_p7 }
  0xaa   : > { %p10292_p13 = pneg %p10291_p3 }
  0xac   : > { %p10297_p1 = pnand %p10295_p0, %p10292_p13 }
  0xae   : > { %10300 = shalt.err (!%p10297_p1)
}
  0xaf   : > { %s10301_s20 = scalar_lea.vmem %s580_s21, 16  ;;  %s10308_s18 = scalar_lea.vmem %s580_s21, 32 }
  0xb0   : > { %p10302_p4 = scmp.ne.s32.totalorder %s580_s21, %s10301_s20  ;;  %p10309_p9 = scmp.lt.s32.totalorder %s580_s21, %s580_s21 }
  0xb1   : > { %p10310_p10 = scmp.lt.s32.totalorder %s10308_s18, %s10301_s20 }
  0xb2   : > { %p10304_p6 = pnand %p10302_p4, %p10791_p7 }
  0xb3   : > { %p10311_p11 = por %p10310_p10, %p10309_p9 }
  0xb4   : > { %p10305_p8 = pneg %p10304_p6 }
  0xb6   : > { %p10312_p12 = pnand %p10311_p11, %p10305_p8 }
  0xb8   : > { %10315 = shalt.err (!%p10312_p12)
}
  0xb9   : > { %9743 = dma.hbm_to_vmem [thread:$0]  (!%p10775_p5), %s12096_s12, 16, %s580_s21, [#allocation22]  }
  0xba   : > { %s10648_s1 = smov [#allocation24]   ;;  %s10649_s26 = smov [#allocation4]  }
  0xbb   : > { %s603_s22 = sshll.u32 %s10648_s1, 4  ;;  %s441_s0 = sshll.u32 %s10649_s26, 4  ;;  %s604_s22 = int_to_ptr.vmem [resolvable:$true] %s603_s22  ;;  %s442_s0 = int_to_ptr.vmem [resolvable:$true] %s441_s0 }
  0xbc   : > { %s10316_s2 = scalar_lea.hbm %s12098_s14, 16 }
  0xbd   : > { %p10317_p2 = scmp.ne.s32.totalorder %s12098_s14, %s10316_s2  ;;  %p10323_p0 = scmp.lt.u32.totalorder %s10316_s2, %s12098_s14 }
  0xbf   : > { %p10319_p3 = pnand %p10317_p2, %p10791_p7 }
  0xc1   : > { %p10320_p13 = pneg %p10319_p3 }
  0xc3   : > { %p10325_p1 = pnand %p10323_p0, %p10320_p13 }
  0xc5   : > { %10328 = shalt.err (!%p10325_p1)
}
  0xc6   : > { %s10329_s21 = scalar_lea.vmem %s604_s22, 16  ;;  %s10336_s29 = scalar_lea.vmem %s604_s22, 32 }
  0xc7   : > { %p10330_p4 = scmp.ne.s32.totalorder %s604_s22, %s10329_s21  ;;  %p10337_p9 = scmp.lt.s32.totalorder %s604_s22, %s604_s22 }
  0xc8   : > { %p10338_p10 = scmp.lt.s32.totalorder %s10336_s29, %s10329_s21 }
  0xc9   : > { %p10332_p6 = pnand %p10330_p4, %p10791_p7 }
  0xca   : > { %p10339_p11 = por %p10338_p10, %p10337_p9 }
  0xcb   : > { %p10333_p8 = pneg %p10332_p6 }
  0xcd   : > { %p10340_p12 = pnand %p10339_p11, %p10333_p8 }
  0xcf   : > { %10343 = shalt.err (!%p10340_p12)
}
  0xd0   : > { %9749 = dma.hbm_to_vmem [thread:$0]  (!%p10775_p5), %s12098_s14, 16, %s604_s22, [#allocation25]  }
  0xd1   : > { %s12130_s19 = sld [smem:[#allocation41_spill]] }
  0xd7   : > { %s10344_s2 = scalar_lea.hbm %s12130_s19, 4608 }
  0xd8   : > { %p10345_p2 = scmp.ne.s32.totalorder %s12130_s19, %s10344_s2  ;;  %p10351_p0 = scmp.lt.u32.totalorder %s10344_s2, %s12130_s19 }
  0xda   : > { %p10347_p3 = pnand %p10345_p2, %p10791_p7 }
  0xdc   : > { %p10348_p13 = pneg %p10347_p3 }
  0xde   : > { %p10353_p1 = pnand %p10351_p0, %p10348_p13 }
  0xe0   : > { %10356 = shalt.err (!%p10353_p1)
}
  0xe1   : > { %s10357_s29 = scalar_lea.vmem %s442_s0, 4608  ;;  %p10365_p9 = scmp.lt.s32.totalorder %s442_s0, %s442_s0 }
  0xe2   : > { %p10358_p4 = scmp.ne.s32.totalorder %s442_s0, %s10357_s29  ;;  %p10366_p10 = scmp.lt.s32.totalorder %s10357_s29, %s10357_s29 }
  0xe4   : > { %p10360_p6 = pnand %p10358_p4, %p10791_p7  ;;  %p10367_p11 = por %p10366_p10, %p10365_p9 }
  0xe6   : > { %p10361_p8 = pneg %p10360_p6 }
  0xe8   : > { %p10368_p12 = pnand %p10367_p11, %p10361_p8 }
  0xea   : > { %10371 = shalt.err (!%p10368_p12)
}
  0xeb   : > { %s10650_s22 = smov 64   ;;  %s10651_s1 = smov 4  }
  0xec   : > { %9710 = dma.hbm_to_vmem [thread:$0]  (!%p10775_p5), %s12130_s19, 4608, %s442_s0, [#allocation5], %s10650_s22, %s10650_s22, %s10651_s1  }
  0xed   : > { %s10652_s23 = smov [#allocation8]   ;;  %s10653_s20 = smov [#allocation11]  }
  0xee   : > { %s465_s2 = sshll.u32 %s10652_s23, 4  ;;  %s491_s18 = sshll.u32 %s10653_s20, 4  ;;  %s466_s2 = int_to_ptr.vmem [resolvable:$true] %s465_s2  ;;  %s492_s18 = int_to_ptr.vmem [resolvable:$true] %s491_s18 }
  0xef   : > { %s10372_s29 = scalar_lea.hbm %s12087_s3, 4608 }
  0xf0   : > { %p10373_p2 = scmp.ne.s32.totalorder %s12087_s3, %s10372_s29  ;;  %p10379_p0 = scmp.lt.u32.totalorder %s10372_s29, %s12087_s3 }
  0xf2   : > { %p10375_p3 = pnand %p10373_p2, %p10791_p7 }
  0xf4   : > { %p10376_p13 = pneg %p10375_p3 }
  0xf6   : > { %p10381_p1 = pnand %p10379_p0, %p10376_p13 }
  0xf8   : > { %10384 = shalt.err (!%p10381_p1)
}
  0xf9   : > { %s10385_s0 = scalar_lea.vmem %s466_s2, 4608  ;;  %p10393_p9 = scmp.lt.s32.totalorder %s466_s2, %s466_s2 }
  0xfa   : > { %p10386_p4 = scmp.ne.s32.totalorder %s466_s2, %s10385_s0  ;;  %p10394_p10 = scmp.lt.s32.totalorder %s10385_s0, %s10385_s0 }
  0xfc   : > { %p10388_p6 = pnand %p10386_p4, %p10791_p7  ;;  %p10395_p11 = por %p10394_p10, %p10393_p9 }
  0xfe   : > { %p10389_p8 = pneg %p10388_p6 }
 0x100   : > { %p10396_p12 = pnand %p10395_p11, %p10389_p8 }
 0x102   : > { %10399 = shalt.err (!%p10396_p12)
}
 0x103   : > { %9716 = dma.hbm_to_vmem [thread:$0]  (!%p10775_p5), %s12087_s3, 4608, %s466_s2, [#allocation7], %s10650_s22, %s10650_s22, %s10651_s1  }
 0x104   : > { %s10400_s26 = scalar_lea.hbm %s12089_s5, 4608 }
 0x105   : > { %p10401_p2 = scmp.ne.s32.totalorder %s12089_s5, %s10400_s26  ;;  %p10407_p0 = scmp.lt.u32.totalorder %s10400_s26, %s12089_s5 }
 0x107   : > { %p10403_p3 = pnand %p10401_p2, %p10791_p7 }
 0x109   : > { %p10404_p13 = pneg %p10403_p3 }
 0x10b   : > { %p10409_p1 = pnand %p10407_p0, %p10404_p13 }
 0x10d   : > { %10412 = shalt.err (!%p10409_p1)
}
 0x10e   : > { %s10413_s21 = scalar_lea.vmem %s492_s18, 4608  ;;  %p10421_p9 = scmp.lt.s32.totalorder %s492_s18, %s492_s18 }
 0x10f   : > { %p10414_p4 = scmp.ne.s32.totalorder %s492_s18, %s10413_s21  ;;  %p10422_p10 = scmp.lt.s32.totalorder %s10413_s21, %s10413_s21 }
 0x111   : > { %p10416_p6 = pnand %p10414_p4, %p10791_p7  ;;  %p10423_p11 = por %p10422_p10, %p10421_p9 }
 0x113   : > { %p10417_p8 = pneg %p10416_p6 }
 0x115   : > { %p10424_p12 = pnand %p10423_p11, %p10417_p8 }
 0x117   : > { %10427 = shalt.err (!%p10424_p12)
}
 0x118   : > { %9722 = dma.hbm_to_vmem [thread:$0]  (!%p10775_p5), %s12089_s5, 4608, %s492_s18, [#allocation10], %s10650_s22, %s10650_s22, %s10651_s1  }
 0x119   : > { %s10654_s0 = smov [#allocation14]   ;;  %s10655_s6 = smov [#allocation17]  }
 0x11a   : > { %s515_s4 = sshll.u32 %s10654_s0, 4  ;;  %s539_s8 = sshll.u32 %s10655_s6, 4  ;;  %s516_s4 = int_to_ptr.vmem [resolvable:$true] %s515_s4  ;;  %s540_s8 = int_to_ptr.vmem [resolvable:$true] %s539_s8 }
 0x11b   : > { %s10428_s27 = scalar_lea.hbm %s12091_s7, 512 }
 0x11c   : > { %p10429_p2 = scmp.ne.s32.totalorder %s12091_s7, %s10428_s27  ;;  %p10435_p0 = scmp.lt.u32.totalorder %s10428_s27, %s12091_s7 }
 0x11e   : > { %p10431_p3 = pnand %p10429_p2, %p10791_p7 }
 0x120   : > { %p10432_p13 = pneg %p10431_p3 }
 0x122   : > { %p10437_p1 = pnand %p10435_p0, %p10432_p13 }
 0x124   : > { %10440 = shalt.err (!%p10437_p1)
}
 0x125   : > { %s10441_s18 = scalar_lea.vmem %s516_s4, 512  ;;  %p10449_p9 = scmp.lt.s32.totalorder %s516_s4, %s516_s4 }
 0x126   : > { %p10442_p4 = scmp.ne.s32.totalorder %s516_s4, %s10441_s18  ;;  %p10450_p10 = scmp.lt.s32.totalorder %s10441_s18, %s10441_s18 }
 0x128   : > { %p10444_p6 = pnand %p10442_p4, %p10791_p7  ;;  %p10451_p11 = por %p10450_p10, %p10449_p9 }
 0x12a   : > { %p10445_p8 = pneg %p10444_p6 }
 0x12c   : > { %p10452_p12 = pnand %p10451_p11, %p10445_p8 }
 0x12e   : > { %10455 = shalt.err (!%p10452_p12)
}
 0x12f   : > { %9728 = dma.hbm_to_vmem [thread:$0]  (!%p10775_p5), %s12091_s7, 512, %s516_s4, [#allocation13], %s10650_s22, %s10650_s22, %s10651_s1  }
 0x130   : > { %s10456_s10 = scalar_lea.hbm %s12093_s9, 4608 }
 0x131   : > { %p10457_p2 = scmp.ne.s32.totalorder %s12093_s9, %s10456_s10  ;;  %p10463_p0 = scmp.lt.u32.totalorder %s10456_s10, %s12093_s9 }
 0x133   : > { %p10459_p3 = pnand %p10457_p2, %p10791_p7 }
 0x135   : > { %p10460_p13 = pneg %p10459_p3 }
 0x137   : > { %p10465_p1 = pnand %p10463_p0, %p10460_p13 }
 0x139   : > { %10468 = shalt.err (!%p10465_p1)
}
 0x13a   : > { %s10469_s17 = scalar_lea.vmem %s540_s8, 4608  ;;  %p10477_p9 = scmp.lt.s32.totalorder %s540_s8, %s540_s8 }
 0x13b   : > { %p10470_p4 = scmp.ne.s32.totalorder %s540_s8, %s10469_s17  ;;  %p10478_p10 = scmp.lt.s32.totalorder %s10469_s17, %s10469_s17 }
 0x13d   : > { %p10472_p6 = pnand %p10470_p4, %p10791_p7  ;;  %p10479_p11 = por %p10478_p10, %p10477_p9 }
 0x13f   : > { %p10473_p8 = pneg %p10472_p6 }
 0x141   : > { %p10480_p12 = pnand %p10479_p11, %p10473_p8 }
 0x143   : > { %10483 = shalt.err (!%p10480_p12)
}
 0x144   : > { %9734 = dma.hbm_to_vmem [thread:$0]  (!%p10775_p5), %s12093_s9, 4608, %s540_s8, [#allocation16], %s10650_s22, %s10650_s22, %s10651_s1  }
 0x145   : > { %s10656_s18 = smov [#allocation20]   ;;  %s10657_s29 = smov [#allocation23]  }
 0x146   : > { %s565_s2 = sshll.u32 %s10656_s18, 4  ;;  %s589_s0 = sshll.u32 %s10657_s29, 4  ;;  %s566_s2 = int_to_ptr.vmem [resolvable:$true] %s565_s2  ;;  %s590_s0 = int_to_ptr.vmem [resolvable:$true] %s589_s0 }
 0x147   : > { %s10484_s26 = scalar_lea.hbm %s12095_s11, 4608 }
 0x148   : > { %p10485_p2 = scmp.ne.s32.totalorder %s12095_s11, %s10484_s26  ;;  %p10491_p0 = scmp.lt.u32.totalorder %s10484_s26, %s12095_s11 }
 0x14a   : > { %p10487_p3 = pnand %p10485_p2, %p10791_p7 }
 0x14c   : > { %p10488_p13 = pneg %p10487_p3 }
 0x14e   : > { %p10493_p1 = pnand %p10491_p0, %p10488_p13 }
 0x150   : > { %10496 = shalt.err (!%p10493_p1)
}
 0x151   : > { %s10497_s8 = scalar_lea.vmem %s566_s2, 4608  ;;  %p10505_p9 = scmp.lt.s32.totalorder %s566_s2, %s566_s2 }
 0x152   : > { %p10498_p4 = scmp.ne.s32.totalorder %s566_s2, %s10497_s8  ;;  %p10506_p10 = scmp.lt.s32.totalorder %s10497_s8, %s10497_s8 }
 0x154   : > { %p10500_p6 = pnand %p10498_p4, %p10791_p7  ;;  %p10507_p11 = por %p10506_p10, %p10505_p9 }
 0x156   : > { %p10501_p8 = pneg %p10500_p6 }
 0x158   : > { %p10508_p12 = pnand %p10507_p11, %p10501_p8 }
 0x15a   : > { %10511 = shalt.err (!%p10508_p12)
}
 0x15b   : > { %9740 = dma.hbm_to_vmem [thread:$0]  (!%p10775_p5), %s12095_s11, 4608, %s566_s2, [#allocation19], %s10650_s22, %s10650_s22, %s10651_s1  }
 0x15c   : > { %s10512_s6 = scalar_lea.hbm %s12097_s13, 512 }
 0x15d   : > { %p10513_p2 = scmp.ne.s32.totalorder %s12097_s13, %s10512_s6  ;;  %p10519_p0 = scmp.lt.u32.totalorder %s10512_s6, %s12097_s13 }
 0x15f   : > { %p10515_p3 = pnand %p10513_p2, %p10791_p7 }
 0x161   : > { %p10516_p13 = pneg %p10515_p3 }
 0x163   : > { %p10521_p1 = pnand %p10519_p0, %p10516_p13 }
 0x165   : > { %10524 = shalt.err (!%p10521_p1)
}
 0x166   : > { %s10525_s20 = scalar_lea.vmem %s590_s0, 512  ;;  %p10533_p9 = scmp.lt.s32.totalorder %s590_s0, %s590_s0 }
 0x167   : > { %p10526_p4 = scmp.ne.s32.totalorder %s590_s0, %s10525_s20  ;;  %p10534_p10 = scmp.lt.s32.totalorder %s10525_s20, %s10525_s20 }
 0x169   : > { %p10528_p6 = pnand %p10526_p4, %p10791_p7  ;;  %p10535_p11 = por %p10534_p10, %p10533_p9 }
 0x16b   : > { %p10529_p8 = pneg %p10528_p6 }
 0x16d   : > { %p10536_p12 = pnand %p10535_p11, %p10529_p8 }
 0x16f   : > { %10539 = shalt.err (!%p10536_p12)
}
 0x170   : > { %9746 = dma.hbm_to_vmem [thread:$0]  (!%p10775_p5), %s12097_s13, 512, %s590_s0, [#allocation22], %s10650_s22, %s10650_s22, %s10651_s1  }
 0x171   : > { %s10658_s8 = smov [#allocation26]   ;;  %s10659_s21 = smov [#allocation27]  }
 0x172   : > { %s613_s4 = sshll.u32 %s10658_s8, 4  ;;  %s627_s18 = sshll.u32 %s10659_s21, 4  ;;  %s614_s4 = int_to_ptr.vmem [resolvable:$true] %s613_s4  ;;  %s628_s18 = int_to_ptr.vmem [resolvable:$true] %s627_s18 }
 0x173   : > { %s10540_s10 = scalar_lea.hbm %s12099_s15, 1024 }
 0x174   : > { %p10541_p2 = scmp.ne.s32.totalorder %s12099_s15, %s10540_s10  ;;  %p10547_p0 = scmp.lt.u32.totalorder %s10540_s10, %s12099_s15 }
 0x176   : > { %p10543_p3 = pnand %p10541_p2, %p10791_p7 }
 0x178   : > { %p10544_p13 = pneg %p10543_p3 }
 0x17a   : > { %p10549_p1 = pnand %p10547_p0, %p10544_p13 }
 0x17c   : > { %10552 = shalt.err (!%p10549_p1)
}
 0x17d   : > { %s10553_s22 = scalar_lea.vmem %s614_s4, 1024  ;;  %p10561_p9 = scmp.lt.s32.totalorder %s614_s4, %s614_s4 }
 0x17e   : > { %p10554_p4 = scmp.ne.s32.totalorder %s614_s4, %s10553_s22  ;;  %p10562_p10 = scmp.lt.s32.totalorder %s10553_s22, %s10553_s22 }
 0x180   : > { %p10556_p6 = pnand %p10554_p4, %p10791_p7  ;;  %p10563_p11 = por %p10562_p10, %p10561_p9 }
 0x182   : > { %p10557_p8 = pneg %p10556_p6 }
 0x184   : > { %p10564_p12 = pnand %p10563_p11, %p10557_p8 }
 0x186   : > { %10567 = shalt.err (!%p10564_p12)
}
 0x187   : > { %s12131_s1 = smov 8   ;;  %s10568_s21 = scalar_lea.hbm %s12100_s16, 32 }
 0x188   : > { %9752 = dma.hbm_to_vmem [thread:$0]  (!%p10775_p5), %s12099_s15, 1024, %s614_s4, [#allocation25], %s12129_s25, %s12129_s25, %s12131_s1  }
 0x189   : > { %p10569_p2 = scmp.ne.s32.totalorder %s12100_s16, %s10568_s21  ;;  %p10575_p0 = scmp.lt.u32.totalorder %s10568_s21, %s12100_s16 }
 0x18b   : > { %p10571_p3 = pnand %p10569_p2, %p10791_p7 }
 0x18d   : > { %p10572_p13 = pneg %p10571_p3 }
 0x18f   : > { %p10577_p1 = pnand %p10575_p0, %p10572_p13 }
 0x191   : > { %10580 = shalt.err (!%p10577_p1)
}
 0x192   : > { %s10581_s27 = scalar_lea.vmem %s628_s18, 32  ;;  %p10589_p9 = scmp.lt.s32.totalorder %s628_s18, %s628_s18 }
 0x193   : > { %p10582_p4 = scmp.ne.s32.totalorder %s628_s18, %s10581_s27  ;;  %p10590_p10 = scmp.lt.s32.totalorder %s10581_s27, %s10581_s27 }
 0x195   : > { %p10584_p6 = pnand %p10582_p4, %p10791_p7  ;;  %p10591_p11 = por %p10590_p10, %p10589_p9 }
 0x197   : > { %p10585_p8 = pneg %p10584_p6 }
 0x199   : > { %p10592_p12 = pnand %p10591_p11, %p10585_p8 }
 0x19b   : > { %10595 = shalt.err (!%p10592_p12)
}
 0x19c   : > { %9755 = dma.hbm_to_vmem [thread:$0]  (!%p10775_p5), %s12100_s16, 32, %s628_s18, [#allocation28]  }
 0x19d   : > { %p12132_p2 = scmp.ne.s32.totalorder %s12121_s28, 0 }
 0x19e   : > { %s12133_s23 = sld [smem:[#allocation39_spill]] (!%p12132_p2) }
 0x19f   : > { %648 = sbr.rel (%p12132_p2) target bundleno = 3025 (0xbd1), region = 88 }
 0x1a4   : > { %p12134_p3 = scmp.eq.s32.totalorder (!%p12132_p2), %s12133_s23, 0 }
 0x1a6   : > { %10601 = dma.done.wait (%p12134_p3), [#allocation5], 4608   ;;  %p12135_p7 = pmov %p12134_p3 }
 0x1a7   : > { %p12136_p13 = pmov %p12134_p3 }
 0x1a8   : > { %10603 = vsyncadd (%p12135_p7), [#allocation5], 4294962688 }
 0x1a9   : > { %10605 = dma.done.wait (%p12136_p13), [#allocation7], 4624   ;;  %p12137_p0 = pmov %p12134_p3 }
 0x1ab   : > { %10607 = vsyncadd (%p12137_p0), [#allocation7], 4294962672  ;;  %p12138_p1 = pmov %p12137_p0 }
 0x1ac   : > { %p12139_p5 = pmov %p12137_p0 }
 0x1ad   : > { %10609 = dma.done.wait (%p12138_p1), [#allocation10], 5632  }
 0x1ae   : > { %10611 = vsyncadd (%p12139_p5), [#allocation10], 4294961664  ;;  %p12140_p4 = pmov %p12137_p0 }
 0x1af   : > { %p12141_p6 = pmov %p12137_p0 }
 0x1b0   : > { %10613 = dma.done.wait (%p12140_p4), [#allocation13], 528  }
 0x1b1   : > { %10615 = vsyncadd (%p12141_p6), [#allocation13], 4294966768  ;;  %p12142_p8 = pmov %p12137_p0 }
 0x1b2   : > { %p12143_p9 = pmov %p12137_p0 }
 0x1b3   : > { %10617 = dma.done.wait (%p12142_p8), [#allocation16], 4624  }
 0x1b4   : > { %10619 = vsyncadd (%p12143_p9), [#allocation16], 4294962672  ;;  %p12144_p10 = pmov %p12137_p0 }
 0x1b5   : > { %p12145_p11 = pmov %p12137_p0 }
 0x1b6   : > { %10621 = dma.done.wait (%p12144_p10), [#allocation19], 5632  }
 0x1b7   : > { %10623 = vsyncadd (%p12145_p11), [#allocation19], 4294961664  ;;  %p12146_p12 = pmov %p12137_p0 }
 0x1b8   : > { %p12147_p2 = pmov %p12137_p0 }
 0x1b9   : > { %10625 = dma.done.wait (%p12146_p12), [#allocation22], 528  }
 0x1ba   : > { %10627 = vsyncadd (%p12147_p2), [#allocation22], 4294966768  ;;  %p12148_p3 = pmov %p12137_p0 }
 0x1bb   : > { %p12149_p7 = pmov %p12137_p0 }
 0x1bc   : > { %10629 = dma.done.wait (%p12148_p3), [#allocation25], 1040  }
 0x1bd   : > { %10631 = vsyncadd (%p12149_p7), [#allocation25], 4294966256  ;;  %p12150_p13 = pmov %p12137_p0 }
 0x1bf   : > { %10633 = dma.done.wait (%p12150_p13), [#allocation28], 32  }
 0x1c0   : > { %10635 = vsyncadd (%p12137_p0), [#allocation28], 4294967264  ;;  %p760_p1 = scmp.lt.s32.totalorder %s12133_s23, 1  ;;  %vm771_vm0 = vcmask 523264   ;;  %vm773_vm1 = vcmask 517120   ;;  %v10660_v0 = vmov 0.0  }
 0x1c1   : > { %772 = vst.msk [vmem:[#allocation2] sm:$0xff] %vm771_vm0, %v10660_v0  ;;  %775 = vst.msk [vmem:[#allocation2 + $0x10] sm:$0xff] %vm771_vm0, %v10660_v0  ;;  %v9818_v1 = vld [vmem:[#allocation4 + $0x40] sm:$0xff]   ;;  %v9819_v2 = vld [vmem:[#allocation4 + $0x48] sm:$0xff]   ;;  %s12151_s18 = sld [smem:[#allocation40_spill]]  ;;  %s12152_s2 = sld [smem:[#allocation47_spill]] }
 0x1c2   : > { %774 = vst.msk [vmem:[#allocation2 + $0x8] sm:$0x3] %vm773_vm1, %v10660_v0  ;;  %776 = vst.msk [vmem:[#allocation2 + $0x18] sm:$0x3] %vm773_vm1, %v10660_v0  ;;  %s12155_s23 = smov (!%p760_p1, %s12133_s23), 1  ;;  %8563 = vmatprep.subr.bf16.mxu0 %v9818_v1  ;;  %v9820_v3 = vld [vmem:[#allocation4 + $0x50] sm:$0xff]  }
 0x1c3   : > { %777 = vst.msk [vmem:[#allocation2 + $0x20] sm:$0xff] %vm771_vm0, %v10660_v0  ;;  %779 = vst.msk [vmem:[#allocation2 + $0x30] sm:$0xff] %vm771_vm0, %v10660_v0  ;;  %s8153_s24 = sshll.u32 %s12155_s23, 6  ;;  %8564 = vmatpush3.bf16.msra.mxu0 %v9818_v1  ;;  %v9821_v7 = vld [vmem:[#allocation4 + $0x58] sm:$0xff]   ;;  %v9822_v15 = vld [vmem:[#allocation4 + $0x60] sm:$0xff]   ;;  %s8154_s22 = sshll.u32 %s12155_s23, 7 }
 0x1c4   : > { %778 = vst.msk [vmem:[#allocation2 + $0x28] sm:$0x3] %vm773_vm1, %v10660_v0  ;;  %780 = vst.msk [vmem:[#allocation2 + $0x38] sm:$0x3] %vm773_vm1, %v10660_v0  ;;  %8565 = vmatprep.subr.bf16.mxu0 %v9819_v2  ;;  %v9823_v22 = vld [vmem:[#allocation4 + $0x68] sm:$0xff]   ;;  %v9824_v26 = vld [vmem:[#allocation4 + $0x70] sm:$0xff]  }
 0x1c5   : > { %781 = vst.msk [vmem:[#allocation2 + $0x40] sm:$0xff] %vm771_vm0, %v10660_v0  ;;  %783 = vst.msk [vmem:[#allocation2 + $0x50] sm:$0xff] %vm771_vm0, %v10660_v0  ;;  %v9825_v31 = vld [vmem:[#allocation4 + $0x78] sm:$0xff]   ;;  %v9826_v34 = vld [vmem:[#allocation4 + $0x80] sm:$0xff]  }
 0x1c6   : > { %782 = vst.msk [vmem:[#allocation2 + $0x48] sm:$0x3] %vm773_vm1, %v10660_v0  ;;  %784 = vst.msk [vmem:[#allocation2 + $0x58] sm:$0x3] %vm773_vm1, %v10660_v0  ;;  %v9833_v36 = vld [vmem:[#allocation4] sm:$0xff]   ;;  %v9835_v38 = vld [vmem:[#allocation4 + $0x8] sm:$0xff]  }
 0x1c7   : > { %785 = vst.msk [vmem:[#allocation2 + $0x60] sm:$0xff] %vm771_vm0, %v10660_v0  ;;  %787 = vst.msk [vmem:[#allocation2 + $0x70] sm:$0xff] %vm771_vm0, %v10660_v0  ;;  %s11193_s20 = scalar_lea.vmem %s12151_s18, %s8153_s24  ;;  %8566 = vmatpush3.bf16.msra.mxu0 %v9819_v2  ;;  %8531 = vmatprep.subr.bf16.mxu1 %v9833_v36  ;;  %v9837_v40 = vld [vmem:[#allocation4 + $0x10] sm:$0xff]   ;;  %v9827_v42 = vld [vmem:[#allocation4 + $0x88] sm:$0xff]   ;;  %s12063_s17 = scalar_lea.vmem %s12152_s2, %s8154_s22 }
 0x1c8   : > { %786 = vst.msk [vmem:[#allocation2 + $0x68] sm:$0x3] %vm773_vm1, %v10660_v0  ;;  %788 = vst.msk [vmem:[#allocation2 + $0x78] sm:$0x3] %vm773_vm1, %v10660_v0  ;;  %v793_v4 = vld [vmem:[%s11193_s20] sm:$0xff]  ;;  %v794_v5 = vld [vmem:[%s11193_s20 + $0x8] sm:$0xff]  ;;  %8567 = vmatprep.subr.bf16.mxu0 %v9820_v3  ;;  %8532 = vmatpush3.bf16.msra.mxu1 %v9833_v36 }
 0x1c9   : > { %789 = vst.msk [vmem:[#allocation2 + $0x80] sm:$0xff] %vm771_vm0, %v10660_v0  ;;  %791 = vst.msk [vmem:[#allocation2 + $0x90] sm:$0xff] %vm771_vm0, %v10660_v0  ;;  %v795_v6 = vld [vmem:[%s11193_s20 + $0x10] sm:$0xff]  ;;  %v796_v8 = vld [vmem:[%s11193_s20 + $0x18] sm:$0xff]  ;;  %8533 = vmatprep.subr.bf16.mxu1 %v9835_v38 }
 0x1ca   : > { %790 = vst.msk [vmem:[#allocation2 + $0x88] sm:$0x3] %vm773_vm1, %v10660_v0  ;;  %792 = vst.msk [vmem:[#allocation2 + $0x98] sm:$0x3] %vm773_vm1, %v10660_v0  ;;  %v797_v9 = vld [vmem:[%s11193_s20 + $0x20] sm:$0xff]  ;;  %v798_v10 = vld [vmem:[%s11193_s20 + $0x28] sm:$0xff] }
 0x1cb   : > { %802 = vst.msk [vmem:[#allocation2 + $0x11] sm:$0xff] %vm771_vm0, %v793_v4  ;;  %803 = vst.msk [vmem:[#allocation2 + $0x21] sm:$0xff] %vm771_vm0, %v794_v5  ;;  %v799_v11 = vld [vmem:[%s11193_s20 + $0x30] sm:$0xff]  ;;  %v1076_v12 = vld [vmem:[#allocation2 + $0x2] sm:$0xff]  ;;  %8568 = vmatpush3.bf16.msra.mxu0 %v9820_v3 }
 0x1cc   : > { %804 = vst.msk [vmem:[#allocation2 + $0x31] sm:$0xff] %vm771_vm0, %v795_v6  ;;  %805 = vst.msk [vmem:[#allocation2 + $0x41] sm:$0xff] %vm771_vm0, %v796_v8  ;;  %8569 = vmatprep.subr.bf16.mxu0 %v9821_v7  ;;  %v800_v19 = vld [vmem:[%s11193_s20 + $0x38] sm:$0xff]  ;;  %8534 = vmatpush3.bf16.msra.mxu1 %v9835_v38  ;;  %v9828_v45 = vld [vmem:[#allocation4 + $0x90] sm:$0xff]  }
 0x1cd   : > { %806 = vst.msk [vmem:[#allocation2 + $0x51] sm:$0xff] %vm771_vm0, %v797_v9  ;;  %807 = vst.msk [vmem:[#allocation2 + $0x61] sm:$0xff] %vm771_vm0, %v798_v10  ;;  %v9839_v44 = vld [vmem:[#allocation4 + $0x18] sm:$0xff]   ;;  %8535 = vmatprep.subr.bf16.mxu1 %v9837_v40  ;;  %v811_v47 = vld [vmem:[#allocation2] sm:$0xff] }
 0x1ce   : > { %808 = vst.msk [vmem:[#allocation2 + $0x71] sm:$0xff] %vm771_vm0, %v799_v11  ;;  %809 = vst.msk [vmem:[#allocation2 + $0x81] sm:$0xff] %vm771_vm0, %v800_v19  ;;  %v9841_v52 = vld [vmem:[#allocation4 + $0x20] sm:$0xff]   ;;  %v9829_v54 = vld [vmem:[#allocation4 + $0x98] sm:$0xff]  }
 0x1cf   : > { %8570 = vmatpush3.bf16.msra.mxu0 %v9821_v7  ;;  %v9830_v58 = vld [vmem:[#allocation4 + $0xa0] sm:$0xff]   ;;  %v9843_v59 = vld [vmem:[#allocation4 + $0x28] sm:$0xff]   ;;  %v9845_v63 = vld [vmem:[#allocation4 + $0x30] sm:$0xff]  }
 0x1d0   : > { %8579 = vmatprep.subr.bf16.mxu0 %v9822_v15  ;;  %8536 = vmatpush3.bf16.msra.mxu1 %v9837_v40  ;;  %v11262_v1 = vld [vmem:[#allocation2 + $0x1] sm:$0xff]  ;;  %v9847_v5 = vld [vmem:[#allocation4 + $0x38] sm:$0xff]   ;;  %v9832_v9 = vld [vmem:[#allocation4 + $0xb0] sm:$0xff]  }
 0x1d1   : > { %8537 = vmatprep.subr.bf16.mxu1 %v9839_v44  ;;  %v9831_v3 = vld [vmem:[#allocation4 + $0xa8] sm:$0xff]   ;;  %v9834_v11 = vld [vmem:[#allocation4 + $0xb8] sm:$0xff]   ;;  %v9852_v36 = vld [vmem:[#allocation4 + $0x110] sm:$0xff]  }
 0x1d2   : > { %v11209_v13 = vld [vmem:[#allocation2 + $0x12] sm:$0xff]  ;;  %v11211_v14 = vld [vmem:[#allocation2 + $0x22] sm:$0xff] }
 0x1d3   : > { %v1084_v16 = vpack.c.bf16 %v11209_v13, %v1076_v12  ;;  %v11214_v17 = vld [vmem:[#allocation2 + $0x32] sm:$0xff]  ;;  %v11222_v20 = vld [vmem:[#allocation2 + $0x42] sm:$0xff]  ;;  %v1474_v12 = vpack.c.bf16 %v11211_v14, %v11209_v13 }
 0x1d4   : > { %v11218_v18 = vpack.c.bf16 %v11214_v17, %v11211_v14  ;;  %v11224_v21 = vld [vmem:[#allocation2 + $0x52] sm:$0xff]  ;;  %v11235_v24 = vld [vmem:[#allocation2 + $0x62] sm:$0xff]  ;;  %8538 = vmatpush3.bf16.msra.mxu1 %v9839_v44 }
 0x1d5   : > { %8571 = vmatprep.mubr.msk.bf16.mxu0 %vm771_vm0, %v1084_v16  ;;  %v11229_v23 = vpack.c.bf16 %v11224_v21, %v11222_v20  ;;  %v11237_v25 = vld [vmem:[#allocation2 + $0x72] sm:$0xff]  ;;  %v1207_v28 = vld [vmem:[#allocation2 + $0x20] sm:$0xff]  ;;  %8547 = vmatprep.subr.bf16.mxu1 %v9841_v52  ;;  %v1476_v13 = vpack.c.bf16 %v11235_v24, %v11224_v21  ;;  %v9846_v21 = vld [vmem:[#allocation4 + $0xe8] sm:$0xff]  }
 0x1d6   : > { %8572 = vmatmul.mubr.msk.bf16.vlgmr.msra.gmra.mrb[0].mxu0 %vm771_vm0, %v11218_v18  ;;  %v1206_v27 = vld [vmem:[#allocation2 + $0x10] sm:$0xff]  ;;  %v11241_v29 = vpack.c.bf16 %v11237_v25, %v11235_v24  ;;  %v1209_v33 = vld [vmem:[#allocation2 + $0x40] sm:$0xff]  ;;  %v9853_v38 = vld [vmem:[#allocation4 + $0x118] sm:$0xff]  }
 0x1d7   : > { %8580 = vmatpush3.bf16.msra.mxu0 %v9822_v15  ;;  %8575 = vmatprep.mubr.msk.bf16.mxu0 %vm771_vm0, %v11229_v23  ;;  %v1214_v30 = vpack.c.bf16 %v1207_v28, %v1206_v27  ;;  %v1208_v32 = vld [vmem:[#allocation2 + $0x30] sm:$0xff]  ;;  %v1211_v37 = vld [vmem:[#allocation2 + $0x60] sm:$0xff]  ;;  %v819_v49 = vpack.c.bf16 %v1206_v27, %v811_v47 }
 0x1d8   : > { %8581 = vmatprep.subr.bf16.mxu0 %v9823_v22  ;;  %v1210_v35 = vld [vmem:[#allocation2 + $0x50] sm:$0xff]  ;;  %v1215_v39 = vpack.c.bf16 %v1209_v33, %v1208_v32  ;;  %v11248_v48 = vld [vmem:[#allocation2 + $0x80] sm:$0xff]  ;;  %v11252_v55 = vpack.c.bf16 %v1208_v32, %v1207_v28  ;;  %v9849_v32 = vld [vmem:[#allocation4 + $0xf8] sm:$0xff]  }
 0x1d9   : > { %v1216_v41 = vpack.c.bf16 %v1211_v37, %v1210_v35  ;;  %v1212_v43 = vld [vmem:[#allocation2 + $0x70] sm:$0xff]  ;;  %v1337_v50 = vld [vmem:[#allocation2 + $0x21] sm:$0xff]  ;;  %8539 = vmatprep.mubr.msk.bf16.mxu1 %vm771_vm0, %v819_v49  ;;  %v11256_v61 = vpack.c.bf16 %v1210_v35, %v1209_v33 }
 0x1da   : > { %v1336_v46 = vld [vmem:[#allocation2 + $0x11] sm:$0xff]  ;;  %v1217_v51 = vpack.c.bf16 %v11248_v48, %v1212_v43  ;;  %v1339_v57 = vld [vmem:[#allocation2 + $0x41] sm:$0xff]  ;;  %8540 = vmatmul.mubr.msk.bf16.vlgmr.msra.gmra.mrb[0].mxu1 %vm771_vm0, %v11252_v55  ;;  %v822_v4 = vpack.c.bf16 %v1212_v43, %v1211_v37 }
 0x1db   : > { %8582 = vmatpush3.bf16.msra.mxu0 %v9823_v22  ;;  %v1344_v53 = vpack.c.bf16 %v1337_v50, %v1336_v46  ;;  %v1338_v56 = vld [vmem:[#allocation2 + $0x31] sm:$0xff]  ;;  %v1341_v62 = vld [vmem:[#allocation2 + $0x61] sm:$0xff]  ;;  %8548 = vmatpush3.bf16.msra.mxu1 %v9841_v52  ;;  %v954_v8 = vpack.c.bf16 %v1336_v46, %v11262_v1  ;;  %v1475_v22 = vpack.c.bf16 %v11222_v20, %v11214_v17 }
 0x1dc   : > { %8583 = vmatprep.subr.bf16.mxu0 %v9824_v26  ;;  %v1340_v60 = vld [vmem:[#allocation2 + $0x51] sm:$0xff]  ;;  %8543 = vmatprep.mubr.msk.bf16.mxu1 %vm771_vm0, %v11256_v61  ;;  %v1345_v0 = vpack.c.bf16 %v1339_v57, %v1338_v56  ;;  %v11264_v7 = vld [vmem:[#allocation2 + $0x81] sm:$0xff]  ;;  %v955_v15 = vpack.c.bf16 %v1338_v56, %v1337_v50 }
 0x1dd   : > { %8549 = vmatprep.subr.bf16.mxu1 %v9843_v59  ;;  %v1346_v2 = vpack.c.bf16 %v1341_v62, %v1340_v60  ;;  %v1342_v6 = vld [vmem:[#allocation2 + $0x71] sm:$0xff]  ;;  %v9836_v16 = vld [vmem:[#allocation4 + $0xc0] sm:$0xff]   ;;  %v1736_v19 = vpack.c.bf16 %v1340_v60, %v1339_v57 }
 0x1de   : > { %8576 = vmatmul.mubr.msk.bf16.gmra.mrb[4].mxu0 %vm771_vm0, %v11241_v29  ;;  %v1347_v10 = vpack.c.bf16 %v11264_v7, %v1342_v6  ;;  %v957_v14 = vpack.c.bf16 %v1342_v6, %v1341_v62  ;;  %v1473_v27 = vld [vmem:[#allocation2 + $0x82] sm:$0xff]  ;;  %v9840_v28 = vld [vmem:[#allocation4 + $0xd0] sm:$0xff]   ;;  %v9842_v17 = vld [vmem:[#allocation4 + $0xd8] sm:$0xff]  }
 0x1df   : > { %8584 = vmatpush3.bf16.msra.mxu0 %v9824_v26  ;;  %8587 = vmatprep.mubr.msk.bf16.mxu0 %vm771_vm0, %v1214_v30  ;;  %v9838_v26 = vld [vmem:[#allocation4 + $0xc8] sm:$0xff]   ;;  %v1477_v30 = vpack.c.bf16 %v1473_v27, %v11237_v25  ;;  %v9844_v20 = vld [vmem:[#allocation4 + $0xe0] sm:$0xff]   ;;  %v11289_v24 = vld [vmem:[#allocation2 + $0x90] sm:$0xff] }
 0x1e0   : > { %8585 = vmatprep.subr.bf16.mxu0 %v9825_v31  ;;  %8550 = vmatpush3.bf16.msra.mxu1 %v9843_v59  ;;  %v9848_v25 = vld [vmem:[#allocation4 + $0xf0] sm:$0xff]   ;;  %v9850_v33 = vld [vmem:[#allocation4 + $0x100] sm:$0xff]  }
 0x1e1   : > { %8551 = vmatprep.subr.bf16.mxu1 %v9845_v63  ;;  %v11298_v35 = vld [vmem:[#allocation2 + $0x91] sm:$0xff]  ;;  %v9857_v43 = vld [vmem:[#allocation8 + $0x18] sm:$0xff]  }
 0x1e2   : > { %8544 = vmatmul.mubr.msk.bf16.gmra.mrb[4].mxu1 %vm771_vm0, %v822_v4  ;;  %v1738_v37 = vpack.c.bf16 %v11298_v35, %v11264_v7 }
 0x1e3   : > { %8586 = vmatpush3.bf16.msra.mxu0 %v9825_v31  ;;  %8555 = vmatprep.mubr.msk.bf16.mxu1 %vm771_vm0, %v954_v8  ;;  %v1608_v31 = vpack.c.bf16 %v11289_v24, %v11248_v48 }
 0x1e4   : > { %8595 = vmatprep.subr.bf16.mxu0 %v9826_v34  ;;  %8552 = vmatpush3.bf16.msra.mxu1 %v9845_v63 }
 0x1e5   : > { %8553 = vmatprep.subr.bf16.mxu1 %v9847_v5 }
 0x1e6   : > { %8588 = vmatmul.mubr.msk.bf16.vlgmr.msra.gmra.mrb[0].mxu0 %vm771_vm0, %v1215_v39  ;;  %v11307_v39 = vld [vmem:[#allocation2 + $0x92] sm:$0xff] }
 0x1e7   : > { %8596 = vmatpush3.bf16.msra.mxu0 %v9826_v34  ;;  %8591 = vmatprep.mubr.msk.bf16.mxu0 %vm771_vm0, %v1216_v41  ;;  %v9851_v34 = vld [vmem:[#allocation4 + $0x108] sm:$0xff]   ;;  %v1868_v40 = vpack.c.bf16 %v11307_v39, %v1473_v27 }
 0x1e8   : > { %8597 = vmatprep.subr.bf16.mxu0 %v9827_v42  ;;  %8554 = vmatpush3.bf16.msra.mxu1 %v9847_v5  ;;  %v9854_v41 = vld [vmem:[#allocation8] sm:$0xff]  }
 0x1e9   : > { %8675 = vmatprep.subr.bf16.mxu1 %v9854_v41 }
 0x1eb   : > { %8598 = vmatpush3.bf16.msra.mxu0 %v9827_v42  ;;  %8556 = vmatmul.mubr.msk.bf16.vlgmr.msra.gmra.mrb[0].mxu1 %vm771_vm0, %v955_v15  ;;  %v9855_v42 = vld [vmem:[#allocation8 + $0x8] sm:$0xff]  }
 0x1ec   : > { %8599 = vmatprep.subr.bf16.mxu0 %v9828_v45  ;;  %8559 = vmatprep.mubr.msk.bf16.mxu1 %vm771_vm0, %v1736_v19 }
 0x1ed   : > { %8676 = vmatpush3.bf16.msra.mxu1 %v9854_v41 }
 0x1ee   : > { %8592 = vmatmul.mubr.msk.bf16.gmra.mrb[4].mxu0 %vm771_vm0, %v1217_v51  ;;  %8677 = vmatprep.subr.bf16.mxu1 %v9855_v42  ;;  %v7726_v51 = vld [vmem:[#allocation6] ss:$0 sm:$0xff] }
 0x1ef   : > { %8600 = vmatpush3.bf16.msra.mxu0 %v9828_v45  ;;  %8603 = vmatprep.mubr.msk.bf16.mxu0 %vm771_vm0, %v1344_v53 }
 0x1f0   : > { %8601 = vmatprep.subr.bf16.mxu0 %v9829_v54 }
 0x1f1   : > { %8678 = vmatpush3.bf16.msra.mxu1 %v9855_v42  ;;  %v9861_v42 = vld [vmem:[#allocation8 + $0x38] sm:$0xff]  }
 0x1f3   : > { %8602 = vmatpush3.bf16.msra.mxu0 %v9829_v54  ;;  %8560 = vmatmul.mubr.msk.bf16.gmra.mrb[4].mxu1 %vm771_vm0, %v957_v14 }
 0x1f4   : > { %8611 = vmatprep.subr.bf16.mxu0 %v9830_v58 }
 0x1f6   : > { %8604 = vmatmul.mubr.msk.bf16.vlgmr.msra.gmra.mrb[0].mxu0 %vm771_vm0, %v1345_v0 }
 0x1f7   : > { %8612 = vmatpush3.bf16.msra.mxu0 %v9830_v58  ;;  %8607 = vmatprep.mubr.msk.bf16.mxu0 %vm771_vm0, %v1346_v2 }
 0x1f8   : > { %8613 = vmatprep.subr.bf16.mxu0 %v9831_v3 }
 0x1fb   : > { %8614 = vmatpush3.bf16.msra.mxu0 %v9831_v3 }
 0x1fc   : > { %8615 = vmatprep.subr.bf16.mxu0 %v9832_v9 }
 0x1fe   : > { %8608 = vmatmul.mubr.msk.bf16.gmra.mrb[4].mxu0 %vm771_vm0, %v1347_v10 }
 0x1ff   : > { %8616 = vmatpush3.bf16.msra.mxu0 %v9832_v9  ;;  %8619 = vmatprep.mubr.msk.bf16.mxu0 %vm771_vm0, %v1474_v12 }
 0x200   : > { %8617 = vmatprep.subr.bf16.mxu0 %v9834_v11 }
 0x203   : > { %8618 = vmatpush3.bf16.msra.mxu0 %v9834_v11 }
 0x204   : > { %8627 = vmatprep.subr.bf16.mxu0 %v9836_v16 }
 0x206   : > { %8620 = vmatmul.mubr.msk.bf16.vlgmr.msra.gmra.mrb[0].mxu0 %vm771_vm0, %v1475_v22 }
 0x207   : > { %8628 = vmatpush3.bf16.msra.mxu0 %v9836_v16  ;;  %8623 = vmatprep.mubr.msk.bf16.mxu0 %vm771_vm0, %v1476_v13 }
 0x208   : > { %8629 = vmatprep.subr.bf16.mxu0 %v9838_v26 }
 0x20b   : > { %8630 = vmatpush3.bf16.msra.mxu0 %v9838_v26 }
 0x20c   : > { %8631 = vmatprep.subr.bf16.mxu0 %v9840_v28 }
 0x20e   : > { %8624 = vmatmul.mubr.msk.bf16.gmra.mrb[4].mxu0 %vm771_vm0, %v1477_v30 }
 0x20f   : > { %8632 = vmatpush3.bf16.msra.mxu0 %v9840_v28  ;;  %8635 = vmatprep.mubr.msk.bf16.mxu0 %vm771_vm0, %v11252_v55  ;;  %v10146_v28 = vld [vmem:[#allocation2] sm:$0xff] }
 0x210   : > { %8633 = vmatprep.subr.bf16.mxu0 %v9842_v17 }
 0x213   : > { %8634 = vmatpush3.bf16.msra.mxu0 %v9842_v17 }
 0x214   : > { %8643 = vmatprep.subr.bf16.mxu0 %v9844_v20 }
 0x216   : > { %8636 = vmatmul.mubr.msk.bf16.vlgmr.msra.gmra.mrb[0].mxu0 %vm771_vm0, %v11256_v61 }
 0x217   : > { %8644 = vmatpush3.bf16.msra.mxu0 %v9844_v20  ;;  %8639 = vmatprep.mubr.msk.bf16.mxu0 %vm771_vm0, %v822_v4 }
 0x218   : > { %8645 = vmatprep.subr.bf16.mxu0 %v9846_v21 }
 0x21b   : > { %8646 = vmatpush3.bf16.msra.mxu0 %v9846_v21 }
 0x21c   : > { %8647 = vmatprep.subr.bf16.mxu0 %v9848_v25 }
 0x21e   : > { %8640 = vmatmul.mubr.msk.bf16.gmra.mrb[4].mxu0 %vm771_vm0, %v1608_v31  ;;  %v9859_v31 = vld [vmem:[#allocation8 + $0x28] sm:$0xff]  }
 0x21f   : > { %8648 = vmatpush3.bf16.msra.mxu0 %v9848_v25  ;;  %8651 = vmatprep.mubr.msk.bf16.mxu0 %vm771_vm0, %v955_v15 }
 0x220   : > { %8649 = vmatprep.subr.bf16.mxu0 %v9849_v32 }
 0x223   : > { %8650 = vmatpush3.bf16.msra.mxu0 %v9849_v32  ;;  %v9860_v32 = vld [vmem:[#allocation8 + $0x30] sm:$0xff]  }
 0x224   : > { %8659 = vmatprep.subr.bf16.mxu0 %v9850_v33 }
 0x226   : > { %8652 = vmatmul.mubr.msk.bf16.vlgmr.msra.gmra.mrb[0].mxu0 %vm771_vm0, %v1736_v19 }
 0x227   : > { %8660 = vmatpush3.bf16.msra.mxu0 %v9850_v33  ;;  %8655 = vmatprep.mubr.msk.bf16.mxu0 %vm771_vm0, %v957_v14 }
 0x228   : > { %8661 = vmatprep.subr.bf16.mxu0 %v9851_v34 }
 0x22b   : > { %8662 = vmatpush3.bf16.msra.mxu0 %v9851_v34 }
 0x22c   : > { %8663 = vmatprep.subr.bf16.mxu0 %v9852_v36 }
 0x22e   : > { %8656 = vmatmul.mubr.msk.bf16.gmra.mrb[4].mxu0 %vm771_vm0, %v1738_v37 }
 0x22f   : > { %8664 = vmatpush3.bf16.msra.mxu0 %v9852_v36  ;;  %8667 = vmatprep.mubr.msk.bf16.mxu0 %vm771_vm0, %v11218_v18  ;;  %v9856_v18 = vld [vmem:[#allocation8 + $0x10] sm:$0xff]  }
 0x230   : > { %8665 = vmatprep.subr.bf16.mxu0 %v9853_v38  ;;  %8679 = vmatprep.subr.bf16.mxu1 %v9856_v18 }
 0x231   : > { %8680 = vmatpush3.bf16.msra.mxu1 %v9856_v18 }
 0x232   : > { %8681 = vmatprep.subr.bf16.mxu1 %v9857_v43 }
 0x233   : > { %8666 = vmatpush3.bf16.msra.mxu0 %v9853_v38 }
 0x235   : > { %8682 = vmatpush3.bf16.msra.mxu1 %v9857_v43  ;;  %v9862_v43 = vld [vmem:[#allocation8 + $0x40] sm:$0xff]  }
 0x236   : > { %8668 = vmatmul.mubr.msk.bf16.vlgmr.msra.gmra.mrb[0].mxu0 %vm771_vm0, %v11229_v23  ;;  %v11315_v23 = vld [vmem:[#allocation8 + $0x20] sm:$0xff]  }
 0x237   : > { %8671 = vmatprep.mubr.msk.bf16.mxu0 %vm771_vm0, %v11241_v29  ;;  %8691 = vmatprep.subr.bf16.mxu1 %v11315_v23 }
 0x23e   : > { %8672 = vmatmul.mubr.msk.bf16.gmra.mrb[4].mxu0 %vm771_vm0, %v1868_v40 }
 0x2be   : > { %v8557_v29 = vpop.f32.mrb[0].mxu1 }
 0x2bf   : > { %v1037_v44 = vpop.f32.mrb[1].mxu1  ;;  %v9283_v52 = vadd.f32 %v8557_v29, %v7726_v51 }
 0x2c0   : > { %v8558_v45 = vpop.f32.mrb[2].mxu1  ;;  %v9285_v53 = vadd.f32 %v7726_v51, %v1037_v44 }
 0x2c1   : > { %v1040_v46 = vpop.f32.mrb[3].mxu1  ;;  %v9287_v55 = vadd.f32 %v8558_v45, %v7726_v51 }
 0x2c2   : > { %v9289_v58 = vadd.f32 %v7726_v51, %v1040_v46  ;;  %v9863_v46 = vld [vmem:[#allocation8 + $0x48] sm:$0xff]  }
 0x2c6   : > { %v8561_v47 = vpop.f32.mrb[4].mxu1 }
 0x2c7   : > { %v1053_v48 = vpop.f32.mrb[5].mxu1  ;;  %v9291_v0 = vadd.f32 %v8561_v47, %v7726_v51 }
 0x2c8   : > { %v8562_v49 = vpop.f32.mrb[6].mxu1  ;;  %v9293_v2 = vadd.f32 %v7726_v51, %v1053_v48  ;;  %v9864_v48 = vld [vmem:[#allocation8 + $0x50] sm:$0xff]  }
 0x2c9   : > { %v1056_v50 = vpop.f32.mrb[7].mxu1  ;;  %v9295_v4 = vadd.f32 %v8562_v49, %v7726_v51 }
 0x2ca   : > { %v9297_v7 = vadd.f32 %v7726_v51, %v1056_v50 }
 0x309   : > { %v8669_v54 = vpop.f32.mrb[0].mxu0 }
 0x30a   : > { %v9284_v56 = vadd.f32 %v9283_v52, %v8669_v54  ;;  %v1948_v57 = vpop.f32.mrb[1].mxu0  ;;  %v10147_v54 = vld [vmem:[#allocation2 + $0x2] sm:$0xff] }
 0x30b   : > { %v9286_v59 = vadd.f32 %v9285_v53, %v1948_v57  ;;  %v8670_v60 = vpop.f32.mrb[2].mxu0  ;;  %v9865_v53 = vld [vmem:[#allocation8 + $0x58] sm:$0xff]  }
 0x30c   : > { %1989 = vst.msk [vmem:[#allocation3 + $0x10] sm:$0xff] %vm771_vm0, %v9284_v56  ;;  %v9288_v61 = vadd.f32 %v9287_v55, %v8670_v60  ;;  %v1951_v62 = vpop.f32.mrb[3].mxu0  ;;  %v9866_v56 = vld [vmem:[#allocation8 + $0x60] sm:$0xff]  }
 0x30d   : > { %1987 = vst.msk [vmem:[#allocation3] sm:$0xff] %vm771_vm0, %v9286_v59  ;;  %v9290_v63 = vadd.f32 %v9289_v58, %v1951_v62  ;;  %v9867_v62 = vld [vmem:[#allocation8 + $0x68] sm:$0xff]  }
 0x30e   : > { %1990 = vst.msk [vmem:[#allocation3 + $0x18] sm:$0xff] %vm771_vm0, %v9288_v61 }
 0x30f   : > { %1988 = vst.msk [vmem:[#allocation3 + $0x8] sm:$0xff] %vm771_vm0, %v9290_v63 }
 0x311   : > { %v8673_v3 = vpop.f32.mrb[4].mxu0 }
 0x312   : > { %v9292_v5 = vadd.f32 %v9291_v0, %v8673_v3  ;;  %v1964_v6 = vpop.f32.mrb[5].mxu0  ;;  %v9868_v0 = vld [vmem:[#allocation8 + $0x70] sm:$0xff]  }
 0x313   : > { %v1997_v8 = vld [vmem:[#allocation3 + $0x10] sm:$0xff]  ;;  %v9294_v9 = vadd.f32 %v9293_v2, %v1964_v6  ;;  %v8674_v10 = vpop.f32.mrb[6].mxu0 }
 0x314   : > { %2005 = vst.msk [vmem:[#allocation2 + $0x31] sm:$0xff] %vm771_vm0, %v1997_v8  ;;  %v1995_v11 = vld [vmem:[#allocation3] sm:$0xff]  ;;  %1993 = vst.msk [vmem:[#allocation3 + $0x30] sm:$0xff] %vm771_vm0, %v9292_v5  ;;  %v9296_v12 = vadd.f32 %v9295_v4, %v8674_v10  ;;  %v1967_v15 = vpop.f32.mrb[7].mxu0 }
 0x315   : > { %2003 = vst.msk [vmem:[#allocation2 + $0x11] sm:$0xff] %vm771_vm0, %v1995_v11  ;;  %v1998_v16 = vld [vmem:[#allocation3 + $0x18] sm:$0xff]  ;;  %1991 = vst.msk [vmem:[#allocation3 + $0x20] sm:$0xff] %vm771_vm0, %v9294_v9  ;;  %v9298_v19 = vadd.f32 %v9297_v7, %v1967_v15  ;;  %v9870_v7 = vld [vmem:[#allocation8 + $0x80] sm:$0xff]  }
 0x316   : > { %2006 = vst.msk [vmem:[#allocation2 + $0x41] sm:$0xff] %vm771_vm0, %v1998_v16  ;;  %v1996_v22 = vld [vmem:[#allocation3 + $0x8] sm:$0xff]  ;;  %1994 = vst.msk [vmem:[#allocation3 + $0x38] sm:$0xff] %vm771_vm0, %v9296_v12  ;;  %v9869_v5 = vld [vmem:[#allocation8 + $0x78] sm:$0xff]  }
 0x317   : > { %2004 = vst.msk [vmem:[#allocation2 + $0x21] sm:$0xff] %vm771_vm0, %v1996_v22  ;;  %1992 = vst.msk [vmem:[#allocation3 + $0x28] sm:$0xff] %vm771_vm0, %v9298_v19  ;;  %v9871_v9 = vld [vmem:[#allocation8 + $0x88] sm:$0xff]   ;;  %v9872_v11 = vld [vmem:[#allocation8 + $0x90] sm:$0xff]  }
 0x318   : > { %v9873_v16 = vld [vmem:[#allocation8 + $0x98] sm:$0xff]   ;;  %v9874_v22 = vld [vmem:[#allocation8 + $0xa0] sm:$0xff]  }
 0x31b   : > { %v2001_v26 = vld [vmem:[#allocation3 + $0x30] sm:$0xff] }
 0x31c   : > { %2009 = vst.msk [vmem:[#allocation2 + $0x71] sm:$0xff] %vm771_vm0, %v2001_v26  ;;  %v1999_v13 = vld [vmem:[#allocation3 + $0x20] sm:$0xff]  ;;  %v11331_v14 = vld [vmem:[#allocation2 + $0x10] sm:$0xff] }
 0x31d   : > { %2007 = vst.msk [vmem:[#allocation2 + $0x51] sm:$0xff] %vm771_vm0, %v1999_v13  ;;  %v2002_v27 = vld [vmem:[#allocation3 + $0x38] sm:$0xff]  ;;  %v2027_v30 = vpack.c.bf16 %v11331_v14, %v10146_v28  ;;  %v11338_v21 = vld [vmem:[#allocation2 + $0x30] sm:$0xff]  ;;  %v11349_v33 = vld [vmem:[#allocation2 + $0x40] sm:$0xff] }
 0x31e   : > { %2010 = vst.msk [vmem:[#allocation2 + $0x81] sm:$0xff] %vm771_vm0, %v2002_v27  ;;  %v2000_v17 = vld [vmem:[#allocation3 + $0x28] sm:$0xff]  ;;  %v11336_v20 = vld [vmem:[#allocation2 + $0x20] sm:$0xff]  ;;  %v11357_v37 = vld [vmem:[#allocation2 + $0x11] sm:$0xff]  ;;  %v2417_v8 = vpack.c.bf16 %v11349_v33, %v11338_v21 }
 0x31f   : > { %2008 = vst.msk [vmem:[#allocation2 + $0x61] sm:$0xff] %vm771_vm0, %v2000_v17  ;;  %8683 = vmatprep.mubr.msk.bf16.mxu1 %vm771_vm0, %v2027_v30  ;;  %v11344_v25 = vpack.c.bf16 %v11338_v21, %v11336_v20  ;;  %v2156_v18 = vpack.c.bf16 %v11357_v37, %v11262_v1  ;;  %v11378_v44 = vld [vmem:[#allocation2 + $0x31] sm:$0xff]  ;;  %v11384_v1 = vld [vmem:[#allocation2 + $0x41] sm:$0xff]  ;;  %v2416_v6 = vpack.c.bf16 %v11336_v20, %v11331_v14 }
 0x320   : > { %v11396_v50 = vld [vmem:[#allocation2 + $0x12] sm:$0xff]  ;;  %v11408_v57 = vld [vmem:[#allocation2 + $0x22] sm:$0xff]  ;;  %v2547_v26 = vpack.c.bf16 %v11384_v1, %v11378_v44  ;;  %v9875_v13 = vld [vmem:[#allocation8 + $0xa8] sm:$0xff]  }
 0x321   : > { %8684 = vmatmul.mubr.msk.bf16.vlgmr.msra.gmra.mrb[8].mxu1 %vm771_vm0, %v11344_v25  ;;  %v2286_v55 = vpack.c.bf16 %v11396_v50, %v10147_v54  ;;  %v11412_v59 = vld [vmem:[#allocation2 + $0x32] sm:$0xff]  ;;  %v11418_v61 = vld [vmem:[#allocation2 + $0x42] sm:$0xff]  ;;  %v9877_v17 = vld [vmem:[#allocation8 + $0xb8] sm:$0xff]   ;;  %v2676_v20 = vpack.c.bf16 %v11408_v57, %v11396_v50 }
 0x322   : > { %8692 = vmatpush3.bf16.msra.mxu1 %v11315_v23  ;;  %v11374_v23 = vld [vmem:[#allocation2 + $0x21] sm:$0xff]  ;;  %v11416_v60 = vpack.c.bf16 %v11412_v59, %v11408_v57  ;;  %v9876_v27 = vld [vmem:[#allocation8 + $0xb0] sm:$0xff]   ;;  %v2012_v54 = vld [vmem:[#allocation9 + $0x8] sm:$0xff] }
 0x323   : > { %8693 = vmatprep.subr.bf16.mxu1 %v9859_v31  ;;  %v11361_v40 = vld [vmem:[#allocation2 + $0x70] sm:$0xff]  ;;  %v11382_v45 = vpack.c.bf16 %v11378_v44, %v11374_v23  ;;  %v2546_v19 = vpack.c.bf16 %v11374_v23, %v11357_v37  ;;  %v9878_v21 = vld [vmem:[#allocation8 + $0xc0] sm:$0xff]   ;;  %v9889_v44 = vld [vmem:[#allocation8 + $0x118] sm:$0xff]  }
 0x324   : > { %v11351_v34 = vld [vmem:[#allocation2 + $0x50] sm:$0xff] }
 0x325   : > { %v11355_v36 = vpack.c.bf16 %v11351_v34, %v11349_v33  ;;  %v11376_v29 = vld [vmem:[#allocation2 + $0x51] sm:$0xff]  ;;  %v11444_v12 = vld [vmem:[#allocation2 + $0x80] sm:$0xff] }
 0x326   : > { %8694 = vmatpush3.bf16.msra.mxu1 %v9859_v31  ;;  %v11359_v38 = vld [vmem:[#allocation2 + $0x60] sm:$0xff]  ;;  %v11388_v47 = vpack.c.bf16 %v11376_v29, %v11384_v1  ;;  %v11398_v51 = vld [vmem:[#allocation2 + $0x71] sm:$0xff]  ;;  %v2419_v15 = vpack.c.bf16 %v11444_v12, %v11361_v40  ;;  %v2677_v31 = vpack.c.bf16 %v11418_v61, %v11412_v59  ;;  %v2809_v23 = vpack.c.bf16 %v11289_v24, %v11444_v12 }
 0x327   : > { %8687 = vmatprep.mubr.msk.bf16.mxu1 %vm771_vm0, %v11355_v36  ;;  %v11367_v41 = vpack.c.bf16 %v11361_v40, %v11359_v38  ;;  %8695 = vmatprep.subr.bf16.mxu1 %v9860_v32  ;;  %v11394_v49 = vld [vmem:[#allocation2 + $0x61] sm:$0xff]  ;;  %v11410_v58 = vld [vmem:[#allocation2 + $0x52] sm:$0xff]  ;;  %v2418_v10 = vpack.c.bf16 %v11359_v38, %v11351_v34  ;;  %v9891_v1 = vld [vmem:[#allocation11 + $0x8] sm:$0xff]  }
 0x328   : > { %v11402_v52 = vpack.c.bf16 %v11398_v51, %v11394_v49  ;;  %v11422_v63 = vpack.c.bf16 %v11410_v58, %v11418_v61  ;;  %v2284_v2 = vld [vmem:[#allocation2 + $0x62] sm:$0xff]  ;;  %v11428_v3 = vld [vmem:[#allocation2 + $0x72] sm:$0xff]  ;;  %v2548_v14 = vpack.c.bf16 %v11394_v49, %v11376_v29  ;;  %v9881_v40 = vld [vmem:[#allocation8 + $0xd8] sm:$0xff]  }
 0x329   : > { %8688 = vmatmul.mubr.msk.bf16.gmra.mrb[12].mxu1 %vm771_vm0, %v11367_v41  ;;  %v11431_v4 = vpack.c.bf16 %v11428_v3, %v2284_v2  ;;  %v2545_v28 = vld [vmem:[#allocation2 + $0x81] sm:$0xff]  ;;  %v2678_v33 = vpack.c.bf16 %v2284_v2, %v11410_v58  ;;  %v9880_v34 = vld [vmem:[#allocation8 + $0xd0] sm:$0xff]  }
 0x32a   : > { %8696 = vmatpush3.bf16.msra.mxu1 %v9860_v32  ;;  %8699 = vmatprep.mubr.msk.bf16.mxu1 %vm771_vm0, %v2156_v18  ;;  %v2549_v30 = vpack.c.bf16 %v2545_v28, %v11398_v51  ;;  %v9879_v32 = vld [vmem:[#allocation8 + $0xc8] sm:$0xff]   ;;  %v2675_v37 = vld [vmem:[#allocation2 + $0x82] sm:$0xff]  ;;  %v9888_v24 = vld [vmem:[#allocation8 + $0x110] sm:$0xff]   ;;  %v2939_v29 = vpack.c.bf16 %v11298_v35, %v2545_v28 }
 0x32b   : > { %8697 = vmatprep.subr.bf16.mxu1 %v9861_v42  ;;  %v2679_v38 = vpack.c.bf16 %v2675_v37, %v11428_v3  ;;  %v9883_v18 = vld [vmem:[#allocation8 + $0xe8] sm:$0xff]   ;;  %v9890_v35 = vld [vmem:[#allocation11] sm:$0xff]   ;;  %v2013_v49 = vld [vmem:[#allocation9 + $0x10] sm:$0xff] }
 0x32c   : > { %8819 = vmatprep.subr.bf16.mxu0 %v9890_v35  ;;  %v2014_v51 = vld [vmem:[#allocation9 + $0x18] sm:$0xff]  ;;  %v2015_v2 = vld [vmem:[#allocation9 + $0x20] sm:$0xff] }
 0x32d   : > { %8820 = vmatpush3.bf16.msra.mxu0 %v9890_v35  ;;  %v11502_v35 = vld [vmem:[#allocation2] sm:$0xff] }
 0x32e   : > { %8698 = vmatpush3.bf16.msra.mxu1 %v9861_v42  ;;  %v9882_v42 = vld [vmem:[#allocation8 + $0xe0] sm:$0xff]   ;;  %8821 = vmatprep.subr.bf16.mxu0 %v9891_v1 }
 0x32f   : > { %8707 = vmatprep.subr.bf16.mxu1 %v9862_v43 }
 0x331   : > { %8700 = vmatmul.mubr.msk.bf16.vlgmr.msra.gmra.mrb[8].mxu1 %vm771_vm0, %v11382_v45  ;;  %8822 = vmatpush3.bf16.msra.mxu0 %v9891_v1 }
 0x332   : > { %8703 = vmatprep.mubr.msk.bf16.mxu1 %vm771_vm0, %v11388_v47  ;;  %8708 = vmatpush3.bf16.msra.mxu1 %v9862_v43  ;;  %v9884_v43 = vld [vmem:[#allocation8 + $0xf0] sm:$0xff]  }
 0x333   : > { %8709 = vmatprep.subr.bf16.mxu1 %v9863_v46 }
 0x336   : > { %8710 = vmatpush3.bf16.msra.mxu1 %v9863_v46  ;;  %v9892_v46 = vld [vmem:[#allocation11 + $0x10] sm:$0xff]  }
 0x337   : > { %8711 = vmatprep.subr.bf16.mxu1 %v9864_v48  ;;  %8823 = vmatprep.subr.bf16.mxu0 %v9892_v46 }
 0x338   : > { %8824 = vmatpush3.bf16.msra.mxu0 %v9892_v46 }
 0x339   : > { %8704 = vmatmul.mubr.msk.bf16.gmra.mrb[12].mxu1 %vm771_vm0, %v11402_v52 }
 0x33a   : > { %8712 = vmatpush3.bf16.msra.mxu1 %v9864_v48  ;;  %8715 = vmatprep.mubr.msk.bf16.mxu1 %vm771_vm0, %v2286_v55  ;;  %v11495_v48 = vld [vmem:[#allocation11 + $0x20] sm:$0xff]  }
 0x33b   : > { %8713 = vmatprep.subr.bf16.mxu1 %v9865_v53 }
 0x33e   : > { %8714 = vmatpush3.bf16.msra.mxu1 %v9865_v53 }
 0x33f   : > { %8723 = vmatprep.subr.bf16.mxu1 %v9866_v56 }
 0x341   : > { %8716 = vmatmul.mubr.msk.bf16.vlgmr.msra.gmra.mrb[8].mxu1 %vm771_vm0, %v11416_v60 }
 0x342   : > { %8719 = vmatprep.mubr.msk.bf16.mxu1 %vm771_vm0, %v11422_v63  ;;  %8724 = vmatpush3.bf16.msra.mxu1 %v9866_v56 }
 0x343   : > { %8725 = vmatprep.subr.bf16.mxu1 %v9867_v62 }
 0x346   : > { %8726 = vmatpush3.bf16.msra.mxu1 %v9867_v62 }
 0x347   : > { %8727 = vmatprep.subr.bf16.mxu1 %v9868_v0 }
 0x349   : > { %8720 = vmatmul.mubr.msk.bf16.gmra.mrb[12].mxu1 %vm771_vm0, %v11431_v4 }
 0x34a   : > { %8728 = vmatpush3.bf16.msra.mxu1 %v9868_v0  ;;  %8731 = vmatprep.mubr.msk.bf16.mxu1 %vm771_vm0, %v2416_v6  ;;  %v2017_v0 = vld [vmem:[#allocation9 + $0x30] sm:$0xff] }
 0x34b   : > { %8729 = vmatprep.subr.bf16.mxu1 %v9869_v5 }
 0x34e   : > { %8730 = vmatpush3.bf16.msra.mxu1 %v9869_v5 }
 0x34f   : > { %8739 = vmatprep.subr.bf16.mxu1 %v9870_v7 }
 0x351   : > { %8732 = vmatmul.mubr.msk.bf16.vlgmr.msra.gmra.mrb[8].mxu1 %vm771_vm0, %v2417_v8 }
 0x352   : > { %8735 = vmatprep.mubr.msk.bf16.mxu1 %vm771_vm0, %v2418_v10  ;;  %8740 = vmatpush3.bf16.msra.mxu1 %v9870_v7  ;;  %v2016_v7 = vld [vmem:[#allocation9 + $0x28] sm:$0xff] }
 0x353   : > { %8741 = vmatprep.subr.bf16.mxu1 %v9871_v9 }
 0x356   : > { %8742 = vmatpush3.bf16.msra.mxu1 %v9871_v9 }
 0x357   : > { %8743 = vmatprep.subr.bf16.mxu1 %v9872_v11 }
 0x359   : > { %8736 = vmatmul.mubr.msk.bf16.gmra.mrb[12].mxu1 %vm771_vm0, %v2419_v15 }
 0x35a   : > { %8744 = vmatpush3.bf16.msra.mxu1 %v9872_v11  ;;  %8747 = vmatprep.mubr.msk.bf16.mxu1 %vm771_vm0, %v2546_v19 }
 0x35b   : > { %8745 = vmatprep.subr.bf16.mxu1 %v9873_v16 }
 0x35e   : > { %8746 = vmatpush3.bf16.msra.mxu1 %v9873_v16 }
 0x35f   : > { %8755 = vmatprep.subr.bf16.mxu1 %v9874_v22 }
 0x361   : > { %8748 = vmatmul.mubr.msk.bf16.vlgmr.msra.gmra.mrb[8].mxu1 %vm771_vm0, %v2547_v26 }
 0x362   : > { %8751 = vmatprep.mubr.msk.bf16.mxu1 %vm771_vm0, %v2548_v14  ;;  %8756 = vmatpush3.bf16.msra.mxu1 %v9874_v22 }
 0x363   : > { %8757 = vmatprep.subr.bf16.mxu1 %v9875_v13 }
 0x366   : > { %8758 = vmatpush3.bf16.msra.mxu1 %v9875_v13 }
 0x367   : > { %8759 = vmatprep.subr.bf16.mxu1 %v9876_v27 }
 0x369   : > { %8752 = vmatmul.mubr.msk.bf16.gmra.mrb[12].mxu1 %vm771_vm0, %v2549_v30 }
 0x36a   : > { %8760 = vmatpush3.bf16.msra.mxu1 %v9876_v27  ;;  %8763 = vmatprep.mubr.msk.bf16.mxu1 %vm771_vm0, %v2676_v20 }
 0x36b   : > { %8761 = vmatprep.subr.bf16.mxu1 %v9877_v17 }
 0x36e   : > { %8762 = vmatpush3.bf16.msra.mxu1 %v9877_v17 }
 0x36f   : > { %8771 = vmatprep.subr.bf16.mxu1 %v9878_v21 }
 0x371   : > { %8764 = vmatmul.mubr.msk.bf16.vlgmr.msra.gmra.mrb[8].mxu1 %vm771_vm0, %v2677_v31 }
 0x372   : > { %8767 = vmatprep.mubr.msk.bf16.mxu1 %vm771_vm0, %v2678_v33  ;;  %8772 = vmatpush3.bf16.msra.mxu1 %v9878_v21 }
 0x373   : > { %8773 = vmatprep.subr.bf16.mxu1 %v9879_v32 }
 0x376   : > { %8774 = vmatpush3.bf16.msra.mxu1 %v9879_v32 }
 0x377   : > { %8775 = vmatprep.subr.bf16.mxu1 %v9880_v34 }
 0x379   : > { %8768 = vmatmul.mubr.msk.bf16.gmra.mrb[12].mxu1 %vm771_vm0, %v2679_v38 }
 0x37a   : > { %8776 = vmatpush3.bf16.msra.mxu1 %v9880_v34  ;;  %8779 = vmatprep.mubr.msk.bf16.mxu1 %vm771_vm0, %v11344_v25  ;;  %v9885_v25 = vld [vmem:[#allocation8 + $0xf8] sm:$0xff]  }
 0x37b   : > { %8777 = vmatprep.subr.bf16.mxu1 %v9881_v40 }
 0x37e   : > { %8778 = vmatpush3.bf16.msra.mxu1 %v9881_v40 }
 0x37f   : > { %8787 = vmatprep.subr.bf16.mxu1 %v9882_v42 }
 0x381   : > { %8780 = vmatmul.mubr.msk.bf16.vlgmr.msra.gmra.mrb[8].mxu1 %vm771_vm0, %v11355_v36  ;;  %v9886_v36 = vld [vmem:[#allocation8 + $0x100] sm:$0xff]  }
 0x382   : > { %8783 = vmatprep.mubr.msk.bf16.mxu1 %vm771_vm0, %v11367_v41  ;;  %8788 = vmatpush3.bf16.msra.mxu1 %v9882_v42  ;;  %v9887_v41 = vld [vmem:[#allocation8 + $0x108] sm:$0xff]  }
 0x383   : > { %8789 = vmatprep.subr.bf16.mxu1 %v9883_v18 }
 0x386   : > { %8790 = vmatpush3.bf16.msra.mxu1 %v9883_v18 }
 0x387   : > { %8791 = vmatprep.subr.bf16.mxu1 %v9884_v43 }
 0x389   : > { %8784 = vmatmul.mubr.msk.bf16.gmra.mrb[12].mxu1 %vm771_vm0, %v2809_v23 }
 0x38a   : > { %8792 = vmatpush3.bf16.msra.mxu1 %v9884_v43  ;;  %8795 = vmatprep.mubr.msk.bf16.mxu1 %vm771_vm0, %v11382_v45  ;;  %v3069_v45 = vpack.c.bf16 %v11307_v39, %v2675_v37  ;;  %v2011_v39 = vld [vmem:[#allocation9] sm:$0xff] }
 0x38b   : > { %8793 = vmatprep.subr.bf16.mxu1 %v9885_v25 }
 0x38e   : > { %8794 = vmatpush3.bf16.msra.mxu1 %v9885_v25 }
 0x38f   : > { %8803 = vmatprep.subr.bf16.mxu1 %v9886_v36 }
 0x391   : > { %8796 = vmatmul.mubr.msk.bf16.vlgmr.msra.gmra.mrb[8].mxu1 %vm771_vm0, %v11388_v47  ;;  %v9893_v47 = vld [vmem:[#allocation11 + $0x18] sm:$0xff]  }
 0x392   : > { %8799 = vmatprep.mubr.msk.bf16.mxu1 %vm771_vm0, %v11402_v52  ;;  %8804 = vmatpush3.bf16.msra.mxu1 %v9886_v36 }
 0x393   : > { %8805 = vmatprep.subr.bf16.mxu1 %v9887_v41  ;;  %8825 = vmatprep.subr.bf16.mxu0 %v9893_v47 }
 0x394   : > { %8826 = vmatpush3.bf16.msra.mxu0 %v9893_v47 }
 0x395   : > { %8835 = vmatprep.subr.bf16.mxu0 %v11495_v48 }
 0x396   : > { %8806 = vmatpush3.bf16.msra.mxu1 %v9887_v41 }
 0x397   : > { %8807 = vmatprep.subr.bf16.mxu1 %v9888_v24 }
 0x399   : > { %8800 = vmatmul.mubr.msk.bf16.gmra.mrb[12].mxu1 %vm771_vm0, %v2939_v29 }
 0x39a   : > { %8808 = vmatpush3.bf16.msra.mxu1 %v9888_v24  ;;  %8811 = vmatprep.mubr.msk.bf16.mxu1 %vm771_vm0, %v11416_v60 }
 0x39b   : > { %8809 = vmatprep.subr.bf16.mxu1 %v9889_v44 }
 0x39e   : > { %8810 = vmatpush3.bf16.msra.mxu1 %v9889_v44 }
 0x3a1   : > { %8812 = vmatmul.mubr.msk.bf16.vlgmr.msra.gmra.mrb[8].mxu1 %vm771_vm0, %v11422_v63 }
 0x3a2   : > { %8815 = vmatprep.mubr.msk.bf16.mxu1 %vm771_vm0, %v11431_v4  ;;  %v2018_v4 = vld [vmem:[#allocation9 + $0x38] sm:$0xff] }
 0x3a9   : > { %8816 = vmatmul.mubr.msk.bf16.gmra.mrb[12].mxu1 %vm771_vm0, %v3069_v45 }
 0x474   : > { %v8813_v50 = vpop.f32.mrb[8].mxu1 }
 0x475   : > { %v9299_v52 = vadd.f32 %v8813_v50, %v2013_v49  ;;  %v3149_v53 = vpop.f32.mrb[9].mxu1 }
 0x476   : > { %v9300_v55 = vadd.f32 %v3149_v53, %v2011_v39  ;;  %v8814_v56 = vpop.f32.mrb[10].mxu1 }
 0x477   : > { %v7865_v57 = vmul.f32 -1.442695, %v9299_v52  ;;  %v9301_v58 = vadd.f32 %v8814_v56, %v2014_v51  ;;  %v3152_v59 = vpop.f32.mrb[11].mxu1  ;;  %v9896_v56 = vld [vmem:[#allocation11 + $0x30] sm:$0xff]  }
 0x478   : > { %v7863_v60 = vmul.f32 -1.442695, %v9300_v55  ;;  %v9302_v61 = vadd.f32 %v3152_v59, %v2012_v54 }
 0x479   : > { %10018 = vpow2.f32 %v7865_v57  ;;  %v7866_v62 = vmul.f32 -1.442695, %v9301_v58 }
 0x47a   : > { %10020 = vpow2.f32 %v7863_v60  ;;  %v7864_v63 = vmul.f32 -1.442695, %v9302_v61  ;;  %v11532_v60 = vld [vmem:[#allocation2 + $0x1] sm:$0xff] }
 0x47b   : > { %10022 = vpow2.f32 %v7866_v62 }
 0x47c   : > { %10024 = vpow2.f32 %v7864_v63  ;;  %v8817_v3 = vpop.f32.mrb[12].mxu1 }
 0x47d   : > { %v9303_v5 = vadd.f32 %v8817_v3, %v2017_v0  ;;  %v3165_v6 = vpop.f32.mrb[13].mxu1  ;;  %v9897_v0 = vld [vmem:[#allocation11 + $0x38] sm:$0xff]   ;;  %v9898_v3 = vld [vmem:[#allocation11 + $0x40] sm:$0xff]  }
 0x47e   : > { %v9304_v8 = vadd.f32 %v3165_v6, %v2015_v2  ;;  %v8818_v9 = vpop.f32.mrb[14].mxu1 }
 0x47f   : > { %v7869_v10 = vmul.f32 -1.442695, %v9303_v5  ;;  %v9305_v11 = vadd.f32 %v8818_v9, %v2018_v4  ;;  %v3168_v12 = vpop.f32.mrb[15].mxu1  ;;  %v9899_v9 = vld [vmem:[#allocation11 + $0x48] sm:$0xff]  }
 0x480   : > { %v7867_v15 = vmul.f32 -1.442695, %v9304_v8  ;;  %v9306_v16 = vadd.f32 %v3168_v12, %v2016_v7 }
 0x481   : > { %10026 = vpow2.f32 %v7869_v10  ;;  %v7870_v19 = vmul.f32 -1.442695, %v9305_v11 }
 0x482   : > { %10028 = vpow2.f32 %v7867_v15  ;;  %v7868_v22 = vmul.f32 -1.442695, %v9306_v16  ;;  %v11573_v15 = vld [vmem:[#allocation2 + $0x2] sm:$0xff] }
 0x483   : > { %v10019_v26 = vpop.eup %10018  ;;  %10030 = vpow2.f32 %v7870_v19 }
 0x484   : > { %v10021_v13 = vpop.eup %10020  ;;  %v3214_v14 = vadd.f32 1.0, %v10019_v26  ;;  %10032 = vpow2.f32 %v7868_v22  ;;  %v9901_v26 = vld [vmem:[#allocation11 + $0x58] sm:$0xff]  }
 0x485   : > { %v10023_v27 = vpop.eup %10022  ;;  %v3212_v28 = vadd.f32 1.0, %v10021_v13 }
 0x486   : > { %v10025_v30 = vpop.eup %10024  ;;  %10034 = vrcp.f32 %v3214_v14  ;;  %v3215_v17 = vadd.f32 1.0, %v10023_v27  ;;  %v9902_v14 = vld [vmem:[#allocation11 + $0x60] sm:$0xff]  }
 0x487   : > { %10036 = vrcp.f32 %v3212_v28  ;;  %v3213_v20 = vadd.f32 1.0, %v10025_v30 }
 0x488   : > { %10038 = vrcp.f32 %v3215_v17 }
 0x489   : > { %10040 = vrcp.f32 %v3213_v20 }
 0x48b   : > { %v10027_v21 = vpop.eup %10026 }
 0x48c   : > { %v10029_v31 = vpop.eup %10028  ;;  %v3218_v32 = vadd.f32 1.0, %v10027_v21  ;;  %v9903_v21 = vld [vmem:[#allocation11 + $0x68] sm:$0xff]  }
 0x48d   : > { %v10031_v33 = vpop.eup %10030  ;;  %v3216_v34 = vadd.f32 1.0, %v10029_v31 }
 0x48e   : > { %v10033_v37 = vpop.eup %10032  ;;  %10042 = vrcp.f32 %v3218_v32  ;;  %v3219_v38 = vadd.f32 1.0, %v10031_v33  ;;  %v9904_v32 = vld [vmem:[#allocation11 + $0x70] sm:$0xff]  }
 0x48f   : > { %10044 = vrcp.f32 %v3216_v34  ;;  %v3217_v40 = vadd.f32 1.0, %v10033_v37 }
 0x490   : > { %v10035_v42 = vpop.eup %10034  ;;  %10046 = vrcp.f32 %v3219_v38  ;;  %v9905_v38 = vld [vmem:[#allocation11 + $0x78] sm:$0xff]  }
 0x491   : > { %v10037_v18 = vpop.eup %10036  ;;  %v3238_v43 = vmul.f32 %v10035_v42, %v9299_v52  ;;  %10048 = vrcp.f32 %v3217_v40  ;;  %v9906_v42 = vld [vmem:[#allocation11 + $0x80] sm:$0xff]  }
 0x492   : > { %v10039_v23 = vpop.eup %10038  ;;  %v3236_v25 = vmul.f32 %v10037_v18, %v9300_v55  ;;  %v9895_v55 = vld [vmem:[#allocation11 + $0x28] sm:$0xff]  }
 0x493   : > { %v10041_v36 = vpop.eup %10040  ;;  %3246 = vst.msk [vmem:[#allocation2 + $0x31] sm:$0xff] %vm771_vm0, %v3238_v43  ;;  %v3239_v41 = vmul.f32 %v10039_v23, %v9301_v58  ;;  %v9907_v43 = vld [vmem:[#allocation11 + $0x88] sm:$0xff]  }
 0x494   : > { %3244 = vst.msk [vmem:[#allocation2 + $0x11] sm:$0xff] %vm771_vm0, %v3236_v25  ;;  %v3237_v24 = vmul.f32 %v10041_v36, %v9302_v61  ;;  %v9908_v25 = vld [vmem:[#allocation11 + $0x90] sm:$0xff]  }
 0x495   : > { %3247 = vst.msk [vmem:[#allocation2 + $0x41] sm:$0xff] %vm771_vm0, %v3239_v41 }
 0x496   : > { %3245 = vst.msk [vmem:[#allocation2 + $0x21] sm:$0xff] %vm771_vm0, %v3237_v24  ;;  %v9909_v24 = vld [vmem:[#allocation11 + $0x98] sm:$0xff]  }
 0x498   : > { %v10043_v29 = vpop.eup %10042 }
 0x499   : > { %v10045_v44 = vpop.eup %10044  ;;  %v3242_v45 = vmul.f32 %v10043_v29, %v9303_v5 }
 0x49a   : > { %v10047_v1 = vpop.eup %10046  ;;  %v3240_v46 = vmul.f32 %v10045_v44, %v9304_v8  ;;  %v11513_v53 = vld [vmem:[#allocation2 + $0x30] sm:$0xff]  ;;  %v9910_v44 = vld [vmem:[#allocation11 + $0xa0] sm:$0xff]  }
 0x49b   : > { %v10049_v47 = vpop.eup %10048  ;;  %3250 = vst.msk [vmem:[#allocation2 + $0x71] sm:$0xff] %vm771_vm0, %v3242_v45  ;;  %v3243_v49 = vmul.f32 %v10047_v1, %v9305_v11  ;;  %v11505_v39 = vld [vmem:[#allocation2 + $0x10] sm:$0xff] }
 0x49c   : > { %3248 = vst.msk [vmem:[#allocation2 + $0x51] sm:$0xff] %vm771_vm0, %v3240_v46  ;;  %v3241_v50 = vmul.f32 %v10049_v47, %v9306_v16  ;;  %v3261_v51 = vpack.c.bf16 %v11505_v39, %v11502_v35  ;;  %v11524_v57 = vld [vmem:[#allocation2 + $0x40] sm:$0xff]  ;;  %v11534_v61 = vld [vmem:[#allocation2 + $0x11] sm:$0xff] }
 0x49d   : > { %3251 = vst.msk [vmem:[#allocation2 + $0x81] sm:$0xff] %vm771_vm0, %v3243_v49  ;;  %v11511_v52 = vld [vmem:[#allocation2 + $0x20] sm:$0xff]  ;;  %v3396_v2 = vpack.c.bf16 %v11534_v61, %v11532_v60  ;;  %v11555_v6 = vld [vmem:[#allocation2 + $0x31] sm:$0xff]  ;;  %v3657_v18 = vpack.c.bf16 %v11524_v57, %v11513_v53 }
 0x49e   : > { %3249 = vst.msk [vmem:[#allocation2 + $0x61] sm:$0xff] %vm771_vm0, %v3241_v50  ;;  %8827 = vmatprep.mubr.msk.bf16.mxu0 %vm771_vm0, %v3261_v51  ;;  %v11519_v54 = vpack.c.bf16 %v11513_v53, %v11511_v52  ;;  %v11551_v4 = vld [vmem:[#allocation2 + $0x21] sm:$0xff]  ;;  %v9900_v11 = vld [vmem:[#allocation11 + $0x50] sm:$0xff]   ;;  %v3656_v40 = vpack.c.bf16 %v11511_v52, %v11505_v39  ;;  %v9911_v1 = vld [vmem:[#allocation11 + $0xa8] sm:$0xff]  }
 0x49f   : > { %v11559_v7 = vpack.c.bf16 %v11555_v6, %v11551_v4  ;;  %v11561_v8 = vld [vmem:[#allocation2 + $0x41] sm:$0xff]  ;;  %v11575_v16 = vld [vmem:[#allocation2 + $0x12] sm:$0xff]  ;;  %v3786_v29 = vpack.c.bf16 %v11551_v4, %v11534_v61 }
 0x4a0   : > { %8828 = vmatmul.mubr.msk.bf16.vlgmr.msra.gmra.mrb[8].mxu0 %vm771_vm0, %v11519_v54  ;;  %v3526_v13 = vpack.c.bf16 %v11575_v16, %v11573_v15  ;;  %v11588_v27 = vld [vmem:[#allocation2 + $0x22] sm:$0xff]  ;;  %v11592_v30 = vld [vmem:[#allocation2 + $0x32] sm:$0xff]  ;;  %v3787_v45 = vpack.c.bf16 %v11561_v8, %v11555_v6  ;;  %v9913_v50 = vld [vmem:[#allocation11 + $0xb8] sm:$0xff]  }
 0x4a1   : > { %8836 = vmatpush3.bf16.msra.mxu0 %v11495_v48  ;;  %v11596_v17 = vpack.c.bf16 %v11592_v30, %v11588_v27  ;;  %v11598_v20 = vld [vmem:[#allocation2 + $0x42] sm:$0xff]  ;;  %v9912_v47 = vld [vmem:[#allocation11 + $0xb0] sm:$0xff]   ;;  %v3916_v51 = vpack.c.bf16 %v11588_v27, %v11575_v16  ;;  %v9921_v4 = vld [vmem:[#allocation11 + $0xf8] sm:$0xff]  }
 0x4a2   : > { %8837 = vmatprep.subr.bf16.mxu0 %v9895_v55  ;;  %v11538_v63 = vld [vmem:[#allocation2 + $0x70] sm:$0xff]  ;;  %v9914_v52 = vld [vmem:[#allocation11 + $0xc0] sm:$0xff]   ;;  %v3917_v53 = vpack.c.bf16 %v11598_v20, %v11592_v30 }
 0x4a3   : > { %v11526_v58 = vld [vmem:[#allocation2 + $0x50] sm:$0xff] }
 0x4a4   : > { %v11530_v59 = vpack.c.bf16 %v11526_v58, %v11524_v57  ;;  %v11553_v5 = vld [vmem:[#allocation2 + $0x51] sm:$0xff]  ;;  %v11624_v36 = vld [vmem:[#allocation2 + $0x80] sm:$0xff] }
 0x4a5   : > { %8838 = vmatpush3.bf16.msra.mxu0 %v9895_v55  ;;  %v11536_v62 = vld [vmem:[#allocation2 + $0x60] sm:$0xff]  ;;  %v11565_v10 = vpack.c.bf16 %v11553_v5, %v11561_v8  ;;  %v11577_v19 = vld [vmem:[#allocation2 + $0x71] sm:$0xff]  ;;  %v3659_v41 = vpack.c.bf16 %v11624_v36, %v11538_v63 }
 0x4a6   : > { %8831 = vmatprep.mubr.msk.bf16.mxu0 %vm771_vm0, %v11530_v59  ;;  %v11544_v48 = vpack.c.bf16 %v11538_v63, %v11536_v62  ;;  %8839 = vmatprep.subr.bf16.mxu0 %v9896_v56  ;;  %v11571_v12 = vld [vmem:[#allocation2 + $0x61] sm:$0xff]  ;;  %v11590_v28 = vld [vmem:[#allocation2 + $0x52] sm:$0xff]  ;;  %v3658_v23 = vpack.c.bf16 %v11536_v62, %v11526_v58  ;;  %v9915_v55 = vld [vmem:[#allocation11 + $0xc8] sm:$0xff]  }
 0x4a7   : > { %v11581_v22 = vpack.c.bf16 %v11577_v19, %v11571_v12  ;;  %v11602_v31 = vpack.c.bf16 %v11590_v28, %v11598_v20  ;;  %v3524_v33 = vld [vmem:[#allocation2 + $0x62] sm:$0xff]  ;;  %v11608_v34 = vld [vmem:[#allocation2 + $0x72] sm:$0xff]  ;;  %v3788_v46 = vpack.c.bf16 %v11571_v12, %v11553_v5  ;;  %v9917_v62 = vld [vmem:[#allocation11 + $0xd8] sm:$0xff]  }
 0x4a8   : > { %8832 = vmatmul.mubr.msk.bf16.gmra.mrb[12].mxu0 %vm771_vm0, %v11544_v48  ;;  %v11611_v37 = vpack.c.bf16 %v11608_v34, %v3524_v33  ;;  %v11638_v49 = vld [vmem:[#allocation2 + $0x81] sm:$0xff]  ;;  %v9916_v57 = vld [vmem:[#allocation11 + $0xd0] sm:$0xff]  }
 0x4a9   : > { %8840 = vmatpush3.bf16.msra.mxu0 %v9896_v56  ;;  %8843 = vmatprep.mubr.msk.bf16.mxu0 %vm771_vm0, %v3396_v2  ;;  %v3789_v39 = vpack.c.bf16 %v11638_v49, %v11577_v19  ;;  %v3918_v56 = vpack.c.bf16 %v3524_v33, %v11590_v28  ;;  %v3915_v58 = vld [vmem:[#allocation2 + $0x82] sm:$0xff]  ;;  %v9920_v2 = vld [vmem:[#allocation11 + $0xf0] sm:$0xff]   ;;  %v9925_v8 = vld [vmem:[#allocation11 + $0x118] sm:$0xff]  }
 0x4aa   : > { %8841 = vmatprep.subr.bf16.mxu0 %v9897_v0  ;;  %v3919_v61 = vpack.c.bf16 %v3915_v58, %v11608_v34  ;;  %v9918_v63 = vld [vmem:[#allocation11 + $0xe0] sm:$0xff]   ;;  %v9924_v5 = vld [vmem:[#allocation11 + $0x110] sm:$0xff]  }
 0x4ab   : > { %v11670_v6 = vld [vmem:[#allocation2 + $0x91] sm:$0xff]  ;;  %v9929_v19 = vld [vmem:[#allocation14 + $0x18] sm:$0xff]  }
 0x4ac   : > { %v9927_v12 = vld [vmem:[#allocation14 + $0x8] sm:$0xff]   ;;  %v9928_v16 = vld [vmem:[#allocation14 + $0x10] sm:$0xff]  }
 0x4ad   : > { %8842 = vmatpush3.bf16.msra.mxu0 %v9897_v0  ;;  %v9919_v0 = vld [vmem:[#allocation11 + $0xe8] sm:$0xff]  }
 0x4ae   : > { %8851 = vmatprep.subr.bf16.mxu0 %v9898_v3 }
 0x4b0   : > { %8844 = vmatmul.mubr.msk.bf16.vlgmr.msra.gmra.mrb[8].mxu0 %vm771_vm0, %v11559_v7 }
 0x4b1   : > { %8847 = vmatprep.mubr.msk.bf16.mxu0 %vm771_vm0, %v11565_v10  ;;  %8852 = vmatpush3.bf16.msra.mxu0 %v9898_v3  ;;  %v11659_v3 = vld [vmem:[#allocation2 + $0x90] sm:$0xff] }
 0x4b2   : > { %8853 = vmatprep.subr.bf16.mxu0 %v9899_v9 }
 0x4b5   : > { %8854 = vmatpush3.bf16.msra.mxu0 %v9899_v9  ;;  %v11681_v9 = vld [vmem:[#allocation2 + $0x92] sm:$0xff] }
 0x4b6   : > { %8855 = vmatprep.subr.bf16.mxu0 %v9900_v11 }
 0x4b8   : > { %8848 = vmatmul.mubr.msk.bf16.gmra.mrb[12].mxu0 %vm771_vm0, %v11581_v22 }
 0x4b9   : > { %8856 = vmatpush3.bf16.msra.mxu0 %v9900_v11  ;;  %8859 = vmatprep.mubr.msk.bf16.mxu0 %vm771_vm0, %v3526_v13  ;;  %v9926_v11 = vld [vmem:[#allocation14] sm:$0xff]  }
 0x4ba   : > { %8857 = vmatprep.subr.bf16.mxu0 %v9901_v26  ;;  %8963 = vmatprep.subr.bf16.mxu1 %v9926_v11 }
 0x4bb   : > { %8964 = vmatpush3.bf16.msra.mxu1 %v9926_v11 }
 0x4bc   : > { %8965 = vmatprep.subr.bf16.mxu1 %v9927_v12 }
 0x4bd   : > { %8858 = vmatpush3.bf16.msra.mxu0 %v9901_v26 }
 0x4be   : > { %8867 = vmatprep.subr.bf16.mxu0 %v9902_v14 }
 0x4bf   : > { %8966 = vmatpush3.bf16.msra.mxu1 %v9927_v12 }
 0x4c0   : > { %8860 = vmatmul.mubr.msk.bf16.vlgmr.msra.gmra.mrb[8].mxu0 %vm771_vm0, %v11596_v17  ;;  %8967 = vmatprep.subr.bf16.mxu1 %v9928_v16 }
 0x4c1   : > { %8863 = vmatprep.mubr.msk.bf16.mxu0 %vm771_vm0, %v11602_v31  ;;  %8868 = vmatpush3.bf16.msra.mxu0 %v9902_v14 }
 0x4c2   : > { %8869 = vmatprep.subr.bf16.mxu0 %v9903_v21 }
 0x4c3   : > { %8968 = vmatpush3.bf16.msra.mxu1 %v9928_v16 }
 0x4c4   : > { %8969 = vmatprep.subr.bf16.mxu1 %v9929_v19 }
 0x4c5   : > { %8870 = vmatpush3.bf16.msra.mxu0 %v9903_v21 }
 0x4c6   : > { %8871 = vmatprep.subr.bf16.mxu0 %v9904_v32 }
 0x4c7   : > { %8970 = vmatpush3.bf16.msra.mxu1 %v9929_v19 }
 0x4c8   : > { %8864 = vmatmul.mubr.msk.bf16.gmra.mrb[12].mxu0 %vm771_vm0, %v11611_v37 }
 0x4c9   : > { %8872 = vmatpush3.bf16.msra.mxu0 %v9904_v32  ;;  %8875 = vmatprep.mubr.msk.bf16.mxu0 %vm771_vm0, %v3656_v40 }
 0x4ca   : > { %8873 = vmatprep.subr.bf16.mxu0 %v9905_v38 }
 0x4cd   : > { %8874 = vmatpush3.bf16.msra.mxu0 %v9905_v38 }
 0x4ce   : > { %8883 = vmatprep.subr.bf16.mxu0 %v9906_v42 }
 0x4d0   : > { %8876 = vmatmul.mubr.msk.bf16.vlgmr.msra.gmra.mrb[8].mxu0 %vm771_vm0, %v3657_v18 }
 0x4d1   : > { %8879 = vmatprep.mubr.msk.bf16.mxu0 %vm771_vm0, %v3658_v23  ;;  %8884 = vmatpush3.bf16.msra.mxu0 %v9906_v42 }
 0x4d2   : > { %8885 = vmatprep.subr.bf16.mxu0 %v9907_v43 }
 0x4d5   : > { %8886 = vmatpush3.bf16.msra.mxu0 %v9907_v43 }
 0x4d6   : > { %8887 = vmatprep.subr.bf16.mxu0 %v9908_v25 }
 0x4d8   : > { %8880 = vmatmul.mubr.msk.bf16.gmra.mrb[12].mxu0 %vm771_vm0, %v3659_v41 }
 0x4d9   : > { %8888 = vmatpush3.bf16.msra.mxu0 %v9908_v25  ;;  %8891 = vmatprep.mubr.msk.bf16.mxu0 %vm771_vm0, %v3786_v29 }
 0x4da   : > { %8889 = vmatprep.subr.bf16.mxu0 %v9909_v24 }
 0x4dd   : > { %8890 = vmatpush3.bf16.msra.mxu0 %v9909_v24 }
 0x4de   : > { %8899 = vmatprep.subr.bf16.mxu0 %v9910_v44 }
 0x4e0   : > { %8892 = vmatmul.mubr.msk.bf16.vlgmr.msra.gmra.mrb[8].mxu0 %vm771_vm0, %v3787_v45 }
 0x4e1   : > { %8895 = vmatprep.mubr.msk.bf16.mxu0 %vm771_vm0, %v3788_v46  ;;  %8900 = vmatpush3.bf16.msra.mxu0 %v9910_v44 }
 0x4e2   : > { %8901 = vmatprep.subr.bf16.mxu0 %v9911_v1 }
 0x4e5   : > { %8902 = vmatpush3.bf16.msra.mxu0 %v9911_v1 }
 0x4e6   : > { %8903 = vmatprep.subr.bf16.mxu0 %v9912_v47 }
 0x4e8   : > { %8896 = vmatmul.mubr.msk.bf16.gmra.mrb[12].mxu0 %vm771_vm0, %v3789_v39 }
 0x4e9   : > { %8904 = vmatpush3.bf16.msra.mxu0 %v9912_v47  ;;  %8907 = vmatprep.mubr.msk.bf16.mxu0 %vm771_vm0, %v3916_v51 }
 0x4ea   : > { %8905 = vmatprep.subr.bf16.mxu0 %v9913_v50 }
 0x4ed   : > { %8906 = vmatpush3.bf16.msra.mxu0 %v9913_v50 }
 0x4ee   : > { %8915 = vmatprep.subr.bf16.mxu0 %v9914_v52 }
 0x4f0   : > { %8908 = vmatmul.mubr.msk.bf16.vlgmr.msra.gmra.mrb[8].mxu0 %vm771_vm0, %v3917_v53 }
 0x4f1   : > { %8911 = vmatprep.mubr.msk.bf16.mxu0 %vm771_vm0, %v3918_v56  ;;  %8916 = vmatpush3.bf16.msra.mxu0 %v9914_v52 }
 0x4f2   : > { %8917 = vmatprep.subr.bf16.mxu0 %v9915_v55 }
 0x4f5   : > { %8918 = vmatpush3.bf16.msra.mxu0 %v9915_v55 }
 0x4f6   : > { %8919 = vmatprep.subr.bf16.mxu0 %v9916_v57 }
 0x4f8   : > { %8912 = vmatmul.mubr.msk.bf16.gmra.mrb[12].mxu0 %vm771_vm0, %v3919_v61 }
 0x4f9   : > { %8920 = vmatpush3.bf16.msra.mxu0 %v9916_v57  ;;  %8923 = vmatprep.mubr.msk.bf16.mxu0 %vm771_vm0, %v11519_v54  ;;  %v4049_v54 = vpack.c.bf16 %v11659_v3, %v11624_v36 }
 0x4fa   : > { %8921 = vmatprep.subr.bf16.mxu0 %v9917_v62 }
 0x4fd   : > { %8922 = vmatpush3.bf16.msra.mxu0 %v9917_v62 }
 0x4fe   : > { %8931 = vmatprep.subr.bf16.mxu0 %v9918_v63 }
 0x500   : > { %8924 = vmatmul.mubr.msk.bf16.vlgmr.msra.gmra.mrb[8].mxu0 %vm771_vm0, %v11530_v59  ;;  %v9922_v59 = vld [vmem:[#allocation11 + $0x100] sm:$0xff]  }
 0x501   : > { %8927 = vmatprep.mubr.msk.bf16.mxu0 %vm771_vm0, %v11544_v48  ;;  %8932 = vmatpush3.bf16.msra.mxu0 %v9918_v63  ;;  %v9923_v48 = vld [vmem:[#allocation11 + $0x108] sm:$0xff]  }
 0x502   : > { %8933 = vmatprep.subr.bf16.mxu0 %v9919_v0 }
 0x505   : > { %8934 = vmatpush3.bf16.msra.mxu0 %v9919_v0 }
 0x506   : > { %8935 = vmatprep.subr.bf16.mxu0 %v9920_v2 }
 0x508   : > { %8928 = vmatmul.mubr.msk.bf16.gmra.mrb[12].mxu0 %vm771_vm0, %v4049_v54 }
 0x509   : > { %8936 = vmatpush3.bf16.msra.mxu0 %v9920_v2  ;;  %8939 = vmatprep.mubr.msk.bf16.mxu0 %vm771_vm0, %v11559_v7  ;;  %v4179_v7 = vpack.c.bf16 %v11670_v6, %v11638_v49 }
 0x50a   : > { %8937 = vmatprep.subr.bf16.mxu0 %v9921_v4 }
 0x50d   : > { %8938 = vmatpush3.bf16.msra.mxu0 %v9921_v4 }
 0x50e   : > { %8947 = vmatprep.subr.bf16.mxu0 %v9922_v59 }
 0x510   : > { %8940 = vmatmul.mubr.msk.bf16.vlgmr.msra.gmra.mrb[8].mxu0 %vm771_vm0, %v11565_v10  ;;  %v4309_v10 = vpack.c.bf16 %v11681_v9, %v3915_v58 }
 0x511   : > { %8943 = vmatprep.mubr.msk.bf16.mxu0 %vm771_vm0, %v11581_v22  ;;  %8948 = vmatpush3.bf16.msra.mxu0 %v9922_v59  ;;  %v7879_v22 = vld [vmem:[#allocation12] ss:$0 sm:$0xff] }
 0x512   : > { %8949 = vmatprep.subr.bf16.mxu0 %v9923_v48 }
 0x515   : > { %8950 = vmatpush3.bf16.msra.mxu0 %v9923_v48 }
 0x516   : > { %8951 = vmatprep.subr.bf16.mxu0 %v9924_v5 }
 0x518   : > { %8944 = vmatmul.mubr.msk.bf16.gmra.mrb[12].mxu0 %vm771_vm0, %v4179_v7 }
 0x519   : > { %8952 = vmatpush3.bf16.msra.mxu0 %v9924_v5  ;;  %8955 = vmatprep.mubr.msk.bf16.mxu0 %vm771_vm0, %v11596_v17 }
 0x51a   : > { %8953 = vmatprep.subr.bf16.mxu0 %v9925_v8 }
 0x51d   : > { %8954 = vmatpush3.bf16.msra.mxu0 %v9925_v8 }
 0x520   : > { %8956 = vmatmul.mubr.msk.bf16.vlgmr.msra.gmra.mrb[8].mxu0 %vm771_vm0, %v11602_v31 }
 0x521   : > { %8959 = vmatprep.mubr.msk.bf16.mxu0 %vm771_vm0, %v11611_v37 }
 0x528   : > { %8960 = vmatmul.mubr.msk.bf16.gmra.mrb[12].mxu0 %vm771_vm0, %v4309_v10 }
 0x5f3   : > { %v8957_v26 = vpop.f32.mrb[8].mxu0 }
 0x5f4   : > { %v9307_v13 = vadd.f32 %v8957_v26, %v7879_v22  ;;  %v4389_v14 = vpop.f32.mrb[9].mxu0 }
 0x5f5   : > { %v9308_v27 = vadd.f32 %v7879_v22, %v4389_v14  ;;  %v8958_v28 = vpop.f32.mrb[10].mxu0 }
 0x5f6   : > { %v7946_v30 = vmul.f32 -1.442695, %v9307_v13  ;;  %v9309_v17 = vadd.f32 %v8958_v28, %v7879_v22  ;;  %v4392_v20 = vpop.f32.mrb[11].mxu0  ;;  %v9932_v28 = vld [vmem:[#allocation17 + $0x10] sm:$0xff]  }
 0x5f7   : > { %v7944_v21 = vmul.f32 -1.442695, %v9308_v27  ;;  %v9310_v31 = vadd.f32 %v7879_v22, %v4392_v20  ;;  %v4486_v20 = vld [vmem:[#allocation3 + $0x10] sm:$0xff] }
 0x5f8   : > { %10050 = vpow2.f32 %v7946_v30  ;;  %v7947_v32 = vmul.f32 -1.442695, %v9309_v17  ;;  %v9933_v30 = vld [vmem:[#allocation17 + $0x18] sm:$0xff]  }
 0x5f9   : > { %10052 = vpow2.f32 %v7944_v21  ;;  %v7945_v33 = vmul.f32 -1.442695, %v9310_v31  ;;  %v7952_v21 = vld [vmem:[#allocation15] ss:$0 sm:$0xff] }
 0x5fa   : > { %10054 = vpow2.f32 %v7947_v32  ;;  %v4487_v32 = vld [vmem:[#allocation3 + $0x18] sm:$0xff] }
 0x5fb   : > { %10056 = vpow2.f32 %v7945_v33  ;;  %v8961_v34 = vpop.f32.mrb[12].mxu0  ;;  %v4501_v33 = vadd.f32 %v7952_v21, %v4486_v20 }
 0x5fc   : > { %v9311_v37 = vadd.f32 %v8961_v34, %v7879_v22  ;;  %v4405_v38 = vpop.f32.mrb[13].mxu0  ;;  %v4485_v34 = vld [vmem:[#allocation3 + $0x8] sm:$0xff] }
 0x5fd   : > { %v9312_v40 = vadd.f32 %v7879_v22, %v4405_v38  ;;  %v8962_v42 = vpop.f32.mrb[14].mxu0 }
 0x5fe   : > { %v7950_v18 = vmul.f32 -1.442695, %v9311_v37  ;;  %v9313_v43 = vadd.f32 %v8962_v42, %v7879_v22  ;;  %v4408_v23 = vpop.f32.mrb[15].mxu0 }
 0x5ff   : > { %v7948_v25 = vmul.f32 -1.442695, %v9312_v40  ;;  %v9314_v36 = vadd.f32 %v7879_v22, %v4408_v23 }
 0x600   : > { %10058 = vpow2.f32 %v7950_v18  ;;  %v7951_v41 = vmul.f32 -1.442695, %v9313_v43  ;;  %v4502_v18 = vadd.f32 %v7952_v21, %v4487_v32  ;;  %v9939_v32 = vld [vmem:[#allocation17 + $0x48] sm:$0xff]  }
 0x601   : > { %10060 = vpow2.f32 %v7948_v25  ;;  %v7949_v24 = vmul.f32 -1.442695, %v9314_v36  ;;  %v4500_v25 = vadd.f32 %v7952_v21, %v4485_v34  ;;  %v9940_v34 = vld [vmem:[#allocation17 + $0x50] sm:$0xff]  }
 0x602   : > { %v10051_v29 = vpop.eup %10050  ;;  %10062 = vpow2.f32 %v7951_v41 }
 0x603   : > { %v10053_v44 = vpop.eup %10052  ;;  %v4454_v45 = vadd.f32 1.0, %v10051_v29  ;;  %10064 = vpow2.f32 %v7949_v24  ;;  %v4490_v29 = vld [vmem:[#allocation3 + $0x30] sm:$0xff] }
 0x604   : > { %v10055_v1 = vpop.eup %10054  ;;  %v4452_v46 = vadd.f32 1.0, %v10053_v44  ;;  %v4488_v44 = vld [vmem:[#allocation3 + $0x20] sm:$0xff] }
 0x605   : > { %v10057_v47 = vpop.eup %10056  ;;  %10066 = vrcp.f32 %v4454_v45  ;;  %v4455_v49 = vadd.f32 1.0, %v10055_v1  ;;  %v4491_v45 = vld [vmem:[#allocation3 + $0x38] sm:$0xff]  ;;  %v4505_v1 = vadd.f32 %v7952_v21, %v4490_v29  ;;  %v9943_v29 = vld [vmem:[#allocation17 + $0x68] sm:$0xff]  }
 0x606   : > { %10068 = vrcp.f32 %v4452_v46  ;;  %v4453_v39 = vadd.f32 1.0, %v10057_v47  ;;  %v4489_v46 = vld [vmem:[#allocation3 + $0x28] sm:$0xff] }
 0x607   : > { %10070 = vrcp.f32 %v4455_v49  ;;  %v4503_v49 = vadd.f32 %v7952_v21, %v4488_v44 }
 0x608   : > { %10072 = vrcp.f32 %v4453_v39 }
 0x60a   : > { %v10059_v50 = vpop.eup %10058 }
 0x60b   : > { %v10061_v51 = vpop.eup %10060  ;;  %v4458_v52 = vadd.f32 1.0, %v10059_v50 }
 0x60c   : > { %v10063_v53 = vpop.eup %10062  ;;  %v4456_v55 = vadd.f32 1.0, %v10061_v51  ;;  %v4506_v51 = vadd.f32 %v7952_v21, %v4491_v45  ;;  %v9944_v45 = vld [vmem:[#allocation17 + $0x70] sm:$0xff]  }
 0x60d   : > { %v10065_v56 = vpop.eup %10064  ;;  %10074 = vrcp.f32 %v4458_v52  ;;  %v4459_v57 = vadd.f32 1.0, %v10063_v53 }
 0x60e   : > { %10076 = vrcp.f32 %v4456_v55  ;;  %v4457_v58 = vadd.f32 1.0, %v10065_v56  ;;  %v4504_v56 = vadd.f32 %v7952_v21, %v4489_v46 }
 0x60f   : > { %v10067_v61 = vpop.eup %10066  ;;  %10078 = vrcp.f32 %v4459_v57 }
 0x610   : > { %v10069_v62 = vpop.eup %10068  ;;  %10080 = vrcp.f32 %v4457_v58  ;;  %v4478_v2 = vmul.f32 %v10067_v61, %v9307_v13  ;;  %v9930_v13 = vld [vmem:[#allocation17] sm:$0xff]  }
 0x611   : > { %v10071_v63 = vpop.eup %10070  ;;  %v4476_v4 = vmul.f32 %v10069_v62, %v9308_v27  ;;  %8979 = vmatprep.subr.bf16.mxu1 %v9930_v13  ;;  %v9931_v27 = vld [vmem:[#allocation17 + $0x8] sm:$0xff]  }
 0x612   : > { %v10073_v0 = vpop.eup %10072  ;;  %v4479_v54 = vmul.f32 %v10071_v63, %v9309_v17  ;;  %v11689_v17 = vld [vmem:[#allocation17 + $0x20] sm:$0xff]  }
 0x613   : > { %v4477_v59 = vmul.f32 %v10073_v0, %v9310_v31  ;;  %v4484_v31 = vld [vmem:[#allocation3] sm:$0xff] }
 0x614   : > { %v4508_v48 = vpack.c.bf16 %v4479_v54, %v4478_v2  ;;  %v4499_v38 = vadd.f32 %v7952_v21, %v4484_v31 }
 0x615   : > { %v4507_v5 = vpack.c.bf16 %v4477_v59, %v4476_v4 }
 0x617   : > { %v10075_v7 = vpop.eup %10074  ;;  %8971 = vmatprep.mubr.msk.bf16.mxu1 %vm771_vm0, %v4507_v5 }
 0x618   : > { %v10077_v8 = vpop.eup %10076  ;;  %8972 = vmatmul.mubr.msk.bf16.vlgmr.msra.gmra.mrb[16].mxu1 %vm771_vm0, %v4508_v48  ;;  %v4482_v12 = vmul.f32 %v10075_v7, %v9311_v37 }
 0x619   : > { %v10079_v10 = vpop.eup %10078  ;;  %v4480_v19 = vmul.f32 %v10077_v8, %v9312_v40  ;;  %8980 = vmatpush3.bf16.msra.mxu1 %v9930_v13 }
 0x61a   : > { %v10081_v11 = vpop.eup %10080  ;;  %v4483_v16 = vmul.f32 %v10079_v10, %v9313_v43  ;;  %8981 = vmatprep.subr.bf16.mxu1 %v9931_v27 }
 0x61b   : > { %v4481_v22 = vmul.f32 %v10081_v11, %v9314_v36  ;;  %v9935_v11 = vld [vmem:[#allocation17 + $0x28] sm:$0xff]  }
 0x61c   : > { %v4510_v26 = vpack.c.bf16 %v4483_v16, %v4482_v12 }
 0x61d   : > { %v4509_v14 = vpack.c.bf16 %v4481_v22, %v4480_v19  ;;  %8982 = vmatpush3.bf16.msra.mxu1 %v9931_v27  ;;  %v9937_v27 = vld [vmem:[#allocation17 + $0x38] sm:$0xff]  }
 0x61e   : > { %8983 = vmatprep.subr.bf16.mxu1 %v9932_v28 }
 0x61f   : > { %8975 = vmatprep.mubr.msk.bf16.mxu1 %vm771_vm0, %v4509_v14 }
 0x620   : > { %8976 = vmatmul.mubr.msk.bf16.gmra.mrb[20].mxu1 %vm771_vm0, %v4510_v26 }
 0x621   : > { %8984 = vmatpush3.bf16.msra.mxu1 %v9932_v28 }
 0x622   : > { %8985 = vmatprep.subr.bf16.mxu1 %v9933_v30 }
 0x625   : > { %8986 = vmatpush3.bf16.msra.mxu1 %v9933_v30  ;;  %v9938_v30 = vld [vmem:[#allocation17 + $0x40] sm:$0xff]  }
 0x626   : > { %8995 = vmatprep.subr.bf16.mxu1 %v11689_v17 }
 0x6eb   : > { %v8973_v37 = vpop.f32.mrb[16].mxu1 }
 0x6ec   : > { %v4622_v40 = vadd.f32 %v8973_v37, %v4501_v33  ;;  %v4589_v42 = vpop.f32.mrb[17].mxu1 }
 0x6ed   : > { %v4620_v43 = vadd.f32 %v4589_v42, %v4499_v38  ;;  %v8974_v23 = vpop.f32.mrb[18].mxu1 }
 0x6ee   : > { %4630 = vst.msk [vmem:[#allocation3 + $0x10] sm:$0xff] %vm771_vm0, %v4622_v40  ;;  %v4623_v36 = vadd.f32 %v8974_v23, %v4502_v18  ;;  %v4592_v41 = vpop.f32.mrb[19].mxu1  ;;  %v9941_v18 = vld [vmem:[#allocation17 + $0x58] sm:$0xff]   ;;  %v9942_v23 = vld [vmem:[#allocation17 + $0x60] sm:$0xff]  }
 0x6ef   : > { %4628 = vst.msk [vmem:[#allocation3] sm:$0xff] %vm771_vm0, %v4620_v43  ;;  %v4621_v24 = vadd.f32 %v4592_v41, %v4500_v25 }
 0x6f0   : > { %4631 = vst.msk [vmem:[#allocation3 + $0x18] sm:$0xff] %vm771_vm0, %v4623_v36 }
 0x6f1   : > { %4629 = vst.msk [vmem:[#allocation3 + $0x8] sm:$0xff] %vm771_vm0, %v4621_v24 }
 0x6f3   : > { %v8977_v47 = vpop.f32.mrb[20].mxu1 }
 0x6f4   : > { %v4626_v39 = vadd.f32 %v8977_v47, %v4505_v1  ;;  %v4605_v50 = vpop.f32.mrb[21].mxu1 }
 0x6f5   : > { %v4638_v52 = vld [vmem:[#allocation3 + $0x10] sm:$0xff]  ;;  %v4624_v53 = vadd.f32 %v4605_v50, %v4503_v49  ;;  %v8978_v55 = vpop.f32.mrb[22].mxu1  ;;  %v9945_v49 = vld [vmem:[#allocation17 + $0x78] sm:$0xff]   ;;  %v9946_v50 = vld [vmem:[#allocation17 + $0x80] sm:$0xff]  }
 0x6f6   : > { %4646 = vst.msk [vmem:[#allocation2 + $0x31] sm:$0xff] %vm771_vm0, %v4638_v52  ;;  %v4636_v57 = vld [vmem:[#allocation3] sm:$0xff]  ;;  %4634 = vst.msk [vmem:[#allocation3 + $0x30] sm:$0xff] %vm771_vm0, %v4626_v39  ;;  %v4627_v58 = vadd.f32 %v8978_v55, %v4506_v51  ;;  %v4608_v61 = vpop.f32.mrb[23].mxu1  ;;  %v9947_v52 = vld [vmem:[#allocation17 + $0x88] sm:$0xff]  }
 0x6f7   : > { %4644 = vst.msk [vmem:[#allocation2 + $0x11] sm:$0xff] %vm771_vm0, %v4636_v57  ;;  %v4639_v62 = vld [vmem:[#allocation3 + $0x18] sm:$0xff]  ;;  %4632 = vst.msk [vmem:[#allocation3 + $0x20] sm:$0xff] %vm771_vm0, %v4624_v53  ;;  %v4625_v63 = vadd.f32 %v4608_v61, %v4504_v56 }
 0x6f8   : > { %4647 = vst.msk [vmem:[#allocation2 + $0x41] sm:$0xff] %vm771_vm0, %v4639_v62  ;;  %v4637_v0 = vld [vmem:[#allocation3 + $0x8] sm:$0xff]  ;;  %4635 = vst.msk [vmem:[#allocation3 + $0x38] sm:$0xff] %vm771_vm0, %v4627_v58  ;;  %v9948_v55 = vld [vmem:[#allocation17 + $0x90] sm:$0xff]  }
 0x6f9   : > { %4645 = vst.msk [vmem:[#allocation2 + $0x21] sm:$0xff] %vm771_vm0, %v4637_v0  ;;  %4633 = vst.msk [vmem:[#allocation3 + $0x28] sm:$0xff] %vm771_vm0, %v4625_v63  ;;  %v9949_v58 = vld [vmem:[#allocation17 + $0x98] sm:$0xff]   ;;  %v9950_v62 = vld [vmem:[#allocation17 + $0xa0] sm:$0xff]  }
 0x6fa   : > { %v9951_v0 = vld [vmem:[#allocation17 + $0xa8] sm:$0xff]  }
 0x6fd   : > { %v4642_v2 = vld [vmem:[#allocation3 + $0x30] sm:$0xff] }
 0x6fe   : > { %4650 = vst.msk [vmem:[#allocation2 + $0x71] sm:$0xff] %vm771_vm0, %v4642_v2  ;;  %v4640_v54 = vld [vmem:[#allocation3 + $0x20] sm:$0xff]  ;;  %v11705_v4 = vld [vmem:[#allocation2 + $0x10] sm:$0xff] }
 0x6ff   : > { %4648 = vst.msk [vmem:[#allocation2 + $0x51] sm:$0xff] %vm771_vm0, %v4640_v54  ;;  %v4643_v59 = vld [vmem:[#allocation3 + $0x38] sm:$0xff]  ;;  %v4668_v48 = vpack.c.bf16 %v11705_v4, %v11502_v35  ;;  %v11713_v8 = vld [vmem:[#allocation2 + $0x30] sm:$0xff]  ;;  %v11724_v12 = vld [vmem:[#allocation2 + $0x40] sm:$0xff] }
 0x700   : > { %4651 = vst.msk [vmem:[#allocation2 + $0x81] sm:$0xff] %vm771_vm0, %v4643_v59  ;;  %v4641_v5 = vld [vmem:[#allocation3 + $0x28] sm:$0xff]  ;;  %v11711_v7 = vld [vmem:[#allocation2 + $0x20] sm:$0xff]  ;;  %v9936_v35 = vld [vmem:[#allocation17 + $0x30] sm:$0xff]   ;;  %v5058_v51 = vpack.c.bf16 %v11724_v12, %v11713_v8 }
 0x701   : > { %4649 = vst.msk [vmem:[#allocation2 + $0x61] sm:$0xff] %vm771_vm0, %v4641_v5  ;;  %8987 = vmatprep.mubr.msk.bf16.mxu1 %vm771_vm0, %v4668_v48  ;;  %v11719_v10 = vpack.c.bf16 %v11713_v8, %v11711_v7  ;;  %v11732_v22 = vld [vmem:[#allocation2 + $0x11] sm:$0xff]  ;;  %v11784_v25 = vld [vmem:[#allocation2 + $0x22] sm:$0xff]  ;;  %v5057_v39 = vpack.c.bf16 %v11711_v7, %v11705_v4 }
 0x702   : > { %v4797_v28 = vpack.c.bf16 %v11732_v22, %v11532_v60  ;;  %v11753_v21 = vld [vmem:[#allocation2 + $0x31] sm:$0xff]  ;;  %v11759_v60 = vld [vmem:[#allocation2 + $0x41] sm:$0xff] }
 0x703   : > { %8988 = vmatmul.mubr.msk.bf16.vlgmr.msra.gmra.mrb[24].mxu1 %vm771_vm0, %v11719_v10  ;;  %v11771_v38 = vld [vmem:[#allocation2 + $0x12] sm:$0xff]  ;;  %v5188_v63 = vpack.c.bf16 %v11759_v60, %v11753_v21  ;;  %v9953_v48 = vld [vmem:[#allocation17 + $0xb8] sm:$0xff]   ;;  %v9954_v7 = vld [vmem:[#allocation17 + $0xc0] sm:$0xff]  }
 0x704   : > { %8996 = vmatpush3.bf16.msra.mxu1 %v11689_v17  ;;  %v11749_v17 = vld [vmem:[#allocation2 + $0x21] sm:$0xff]  ;;  %v4927_v43 = vpack.c.bf16 %v11771_v38, %v11573_v15  ;;  %v11788_v41 = vld [vmem:[#allocation2 + $0x32] sm:$0xff]  ;;  %v5317_v5 = vpack.c.bf16 %v11784_v25, %v11771_v38 }
 0x705   : > { %8997 = vmatprep.subr.bf16.mxu1 %v9935_v11  ;;  %v11736_v14 = vld [vmem:[#allocation2 + $0x70] sm:$0xff]  ;;  %v11757_v31 = vpack.c.bf16 %v11753_v21, %v11749_v17  ;;  %v11792_v24 = vpack.c.bf16 %v11788_v41, %v11784_v25  ;;  %v11794_v15 = vld [vmem:[#allocation2 + $0x42] sm:$0xff]  ;;  %v5187_v61 = vpack.c.bf16 %v11749_v17, %v11732_v22 }
 0x706   : > { %v11726_v16 = vld [vmem:[#allocation2 + $0x50] sm:$0xff]  ;;  %v5318_v8 = vpack.c.bf16 %v11794_v15, %v11788_v41  ;;  %v4655_v38 = vld [vmem:[#allocation18 + $0x18] sm:$0xff] }
 0x707   : > { %v11730_v19 = vpack.c.bf16 %v11726_v16, %v11724_v12  ;;  %v11751_v20 = vld [vmem:[#allocation2 + $0x51] sm:$0xff]  ;;  %v11820_v56 = vld [vmem:[#allocation2 + $0x80] sm:$0xff] }
 0x708   : > { %8998 = vmatpush3.bf16.msra.mxu1 %v9935_v11  ;;  %v11734_v26 = vld [vmem:[#allocation2 + $0x60] sm:$0xff]  ;;  %v11763_v33 = vpack.c.bf16 %v11751_v20, %v11759_v60  ;;  %v11773_v40 = vld [vmem:[#allocation2 + $0x71] sm:$0xff]  ;;  %v5060_v57 = vpack.c.bf16 %v11820_v56, %v11736_v14 }
 0x709   : > { %8991 = vmatprep.mubr.msk.bf16.mxu1 %vm771_vm0, %v11730_v19  ;;  %v11742_v13 = vpack.c.bf16 %v11736_v14, %v11734_v26  ;;  %8999 = vmatprep.subr.bf16.mxu1 %v9936_v35  ;;  %v11769_v37 = vld [vmem:[#allocation2 + $0x61] sm:$0xff]  ;;  %v11786_v36 = vld [vmem:[#allocation2 + $0x52] sm:$0xff]  ;;  %v5059_v53 = vpack.c.bf16 %v11734_v26, %v11726_v16 }
 0x70a   : > { %v11777_v42 = vpack.c.bf16 %v11773_v40, %v11769_v37  ;;  %v11798_v44 = vpack.c.bf16 %v11786_v36, %v11794_v15  ;;  %v4925_v1 = vld [vmem:[#allocation2 + $0x62] sm:$0xff]  ;;  %v11804_v46 = vld [vmem:[#allocation2 + $0x72] sm:$0xff]  ;;  %v5189_v2 = vpack.c.bf16 %v11769_v37, %v11751_v20 }
 0x70b   : > { %8992 = vmatmul.mubr.msk.bf16.gmra.mrb[28].mxu1 %vm771_vm0, %v11742_v13  ;;  %v11807_v47 = vpack.c.bf16 %v11804_v46, %v4925_v1  ;;  %v9952_v54 = vld [vmem:[#allocation17 + $0xb0] sm:$0xff]   ;;  %v5186_v4 = vld [vmem:[#allocation2 + $0x81] sm:$0xff]  ;;  %v9955_v11 = vld [vmem:[#allocation17 + $0xc8] sm:$0xff]  }
 0x70c   : > { %9000 = vmatpush3.bf16.msra.mxu1 %v9936_v35  ;;  %9003 = vmatprep.mubr.msk.bf16.mxu1 %vm771_vm0, %v4797_v28  ;;  %v5190_v59 = vpack.c.bf16 %v5186_v4, %v11773_v40  ;;  %v5319_v35 = vpack.c.bf16 %v4925_v1, %v11786_v36  ;;  %v9956_v12 = vld [vmem:[#allocation17 + $0xd0] sm:$0xff]   ;;  %v5316_v16 = vld [vmem:[#allocation2 + $0x82] sm:$0xff]  ;;  %v5580_v17 = vpack.c.bf16 %v11670_v6, %v5186_v4 }
 0x70d   : > { %9001 = vmatprep.subr.bf16.mxu1 %v9937_v27  ;;  %v5320_v22 = vpack.c.bf16 %v5316_v16, %v11804_v46  ;;  %v9957_v26 = vld [vmem:[#allocation17 + $0xd8] sm:$0xff]   ;;  %v9958_v14 = vld [vmem:[#allocation17 + $0xe0] sm:$0xff]   ;;  %v9960_v28 = vld [vmem:[#allocation17 + $0xf0] sm:$0xff]   ;;  %v5710_v21 = vpack.c.bf16 %v11681_v9, %v5316_v16 }
 0x70e   : > { %v9965_v20 = vld [vmem:[#allocation17 + $0x118] sm:$0xff]   ;;  %v9966_v6 = vld [vmem:[#allocation20] sm:$0xff]   ;;  %v9968_v60 = vld [vmem:[#allocation20 + $0x10] sm:$0xff]  }
 0x70f   : > { %9123 = vmatprep.subr.bf16.mxu0 %v9966_v6  ;;  %v4652_v9 = vld [vmem:[#allocation18] sm:$0xff] }
 0x710   : > { %9002 = vmatpush3.bf16.msra.mxu1 %v9937_v27  ;;  %v9959_v27 = vld [vmem:[#allocation17 + $0xe8] sm:$0xff]   ;;  %9124 = vmatpush3.bf16.msra.mxu0 %v9966_v6  ;;  %v4656_v1 = vld [vmem:[#allocation18 + $0x20] sm:$0xff] }
 0x711   : > { %9011 = vmatprep.subr.bf16.mxu1 %v9938_v30  ;;  %v5894_v6 = vld [vmem:[#allocation2] sm:$0xff] }
 0x713   : > { %9004 = vmatmul.mubr.msk.bf16.vlgmr.msra.gmra.mrb[24].mxu1 %vm771_vm0, %v11757_v31 }
 0x714   : > { %9007 = vmatprep.mubr.msk.bf16.mxu1 %vm771_vm0, %v11763_v33  ;;  %9012 = vmatpush3.bf16.msra.mxu1 %v9938_v30  ;;  %v5450_v30 = vpack.c.bf16 %v11659_v3, %v11820_v56  ;;  %v9964_v3 = vld [vmem:[#allocation17 + $0x110] sm:$0xff]  }
 0x715   : > { %9013 = vmatprep.subr.bf16.mxu1 %v9939_v32 }
 0x718   : > { %9014 = vmatpush3.bf16.msra.mxu1 %v9939_v32  ;;  %v9969_v32 = vld [vmem:[#allocation20 + $0x18] sm:$0xff]  }
 0x719   : > { %9015 = vmatprep.subr.bf16.mxu1 %v9940_v34 }
 0x71b   : > { %9008 = vmatmul.mubr.msk.bf16.gmra.mrb[28].mxu1 %vm771_vm0, %v11777_v42 }
 0x71c   : > { %9016 = vmatpush3.bf16.msra.mxu1 %v9940_v34  ;;  %9019 = vmatprep.mubr.msk.bf16.mxu1 %vm771_vm0, %v4927_v43  ;;  %v4654_v34 = vld [vmem:[#allocation18 + $0x10] sm:$0xff] }
 0x71d   : > { %9017 = vmatprep.subr.bf16.mxu1 %v9941_v18 }
 0x720   : > { %9018 = vmatpush3.bf16.msra.mxu1 %v9941_v18  ;;  %v4653_v18 = vld [vmem:[#allocation18 + $0x8] sm:$0xff] }
 0x721   : > { %9027 = vmatprep.subr.bf16.mxu1 %v9942_v23 }
 0x723   : > { %9020 = vmatmul.mubr.msk.bf16.vlgmr.msra.gmra.mrb[24].mxu1 %vm771_vm0, %v11792_v24 }
 0x724   : > { %9023 = vmatprep.mubr.msk.bf16.mxu1 %vm771_vm0, %v11798_v44  ;;  %9028 = vmatpush3.bf16.msra.mxu1 %v9942_v23 }
 0x725   : > { %9029 = vmatprep.subr.bf16.mxu1 %v9943_v29 }
 0x728   : > { %9030 = vmatpush3.bf16.msra.mxu1 %v9943_v29 }
 0x729   : > { %9031 = vmatprep.subr.bf16.mxu1 %v9944_v45 }
 0x72b   : > { %9024 = vmatmul.mubr.msk.bf16.gmra.mrb[28].mxu1 %vm771_vm0, %v11807_v47 }
 0x72c   : > { %9032 = vmatpush3.bf16.msra.mxu1 %v9944_v45  ;;  %9035 = vmatprep.mubr.msk.bf16.mxu1 %vm771_vm0, %v5057_v39  ;;  %v4658_v45 = vld [vmem:[#allocation18 + $0x30] sm:$0xff] }
 0x72d   : > { %9033 = vmatprep.subr.bf16.mxu1 %v9945_v49 }
 0x730   : > { %9034 = vmatpush3.bf16.msra.mxu1 %v9945_v49 }
 0x731   : > { %9043 = vmatprep.subr.bf16.mxu1 %v9946_v50 }
 0x733   : > { %9036 = vmatmul.mubr.msk.bf16.vlgmr.msra.gmra.mrb[24].mxu1 %vm771_vm0, %v5058_v51 }
 0x734   : > { %9039 = vmatprep.mubr.msk.bf16.mxu1 %vm771_vm0, %v5059_v53  ;;  %9044 = vmatpush3.bf16.msra.mxu1 %v9946_v50  ;;  %v4657_v50 = vld [vmem:[#allocation18 + $0x28] sm:$0xff] }
 0x735   : > { %9045 = vmatprep.subr.bf16.mxu1 %v9947_v52 }
 0x738   : > { %9046 = vmatpush3.bf16.msra.mxu1 %v9947_v52 }
 0x739   : > { %9047 = vmatprep.subr.bf16.mxu1 %v9948_v55 }
 0x73b   : > { %9040 = vmatmul.mubr.msk.bf16.gmra.mrb[28].mxu1 %vm771_vm0, %v5060_v57 }
 0x73c   : > { %9048 = vmatpush3.bf16.msra.mxu1 %v9948_v55  ;;  %9051 = vmatprep.mubr.msk.bf16.mxu1 %vm771_vm0, %v5187_v61 }
 0x73d   : > { %9049 = vmatprep.subr.bf16.mxu1 %v9949_v58 }
 0x740   : > { %9050 = vmatpush3.bf16.msra.mxu1 %v9949_v58 }
 0x741   : > { %9059 = vmatprep.subr.bf16.mxu1 %v9950_v62 }
 0x743   : > { %9052 = vmatmul.mubr.msk.bf16.vlgmr.msra.gmra.mrb[24].mxu1 %vm771_vm0, %v5188_v63 }
 0x744   : > { %9055 = vmatprep.mubr.msk.bf16.mxu1 %vm771_vm0, %v5189_v2  ;;  %9060 = vmatpush3.bf16.msra.mxu1 %v9950_v62 }
 0x745   : > { %9061 = vmatprep.subr.bf16.mxu1 %v9951_v0 }
 0x748   : > { %9062 = vmatpush3.bf16.msra.mxu1 %v9951_v0 }
 0x749   : > { %9063 = vmatprep.subr.bf16.mxu1 %v9952_v54 }
 0x74b   : > { %9056 = vmatmul.mubr.msk.bf16.gmra.mrb[28].mxu1 %vm771_vm0, %v5190_v59 }
 0x74c   : > { %9064 = vmatpush3.bf16.msra.mxu1 %v9952_v54  ;;  %9067 = vmatprep.mubr.msk.bf16.mxu1 %vm771_vm0, %v5317_v5 }
 0x74d   : > { %9065 = vmatprep.subr.bf16.mxu1 %v9953_v48 }
 0x750   : > { %9066 = vmatpush3.bf16.msra.mxu1 %v9953_v48 }
 0x751   : > { %9075 = vmatprep.subr.bf16.mxu1 %v9954_v7 }
 0x753   : > { %9068 = vmatmul.mubr.msk.bf16.vlgmr.msra.gmra.mrb[24].mxu1 %vm771_vm0, %v5318_v8 }
 0x754   : > { %9071 = vmatprep.mubr.msk.bf16.mxu1 %vm771_vm0, %v5319_v35  ;;  %9076 = vmatpush3.bf16.msra.mxu1 %v9954_v7 }
 0x755   : > { %9077 = vmatprep.subr.bf16.mxu1 %v9955_v11 }
 0x758   : > { %9078 = vmatpush3.bf16.msra.mxu1 %v9955_v11 }
 0x759   : > { %9079 = vmatprep.subr.bf16.mxu1 %v9956_v12 }
 0x75b   : > { %9072 = vmatmul.mubr.msk.bf16.gmra.mrb[28].mxu1 %vm771_vm0, %v5320_v22 }
 0x75c   : > { %9080 = vmatpush3.bf16.msra.mxu1 %v9956_v12  ;;  %9083 = vmatprep.mubr.msk.bf16.mxu1 %vm771_vm0, %v11719_v10  ;;  %v9961_v10 = vld [vmem:[#allocation17 + $0xf8] sm:$0xff]  }
 0x75d   : > { %9081 = vmatprep.subr.bf16.mxu1 %v9957_v26 }
 0x760   : > { %9082 = vmatpush3.bf16.msra.mxu1 %v9957_v26 }
 0x761   : > { %9091 = vmatprep.subr.bf16.mxu1 %v9958_v14 }
 0x763   : > { %9084 = vmatmul.mubr.msk.bf16.vlgmr.msra.gmra.mrb[24].mxu1 %vm771_vm0, %v11730_v19  ;;  %v9962_v19 = vld [vmem:[#allocation17 + $0x100] sm:$0xff]  }
 0x764   : > { %9087 = vmatprep.mubr.msk.bf16.mxu1 %vm771_vm0, %v11742_v13  ;;  %9092 = vmatpush3.bf16.msra.mxu1 %v9958_v14  ;;  %v9963_v13 = vld [vmem:[#allocation17 + $0x108] sm:$0xff]  }
 0x765   : > { %9093 = vmatprep.subr.bf16.mxu1 %v9959_v27 }
 0x768   : > { %9094 = vmatpush3.bf16.msra.mxu1 %v9959_v27 }
 0x769   : > { %9095 = vmatprep.subr.bf16.mxu1 %v9960_v28 }
 0x76b   : > { %9088 = vmatmul.mubr.msk.bf16.gmra.mrb[28].mxu1 %vm771_vm0, %v5450_v30 }
 0x76c   : > { %9096 = vmatpush3.bf16.msra.mxu1 %v9960_v28  ;;  %9099 = vmatprep.mubr.msk.bf16.mxu1 %vm771_vm0, %v11757_v31  ;;  %v9967_v31 = vld [vmem:[#allocation20 + $0x8] sm:$0xff]  }
 0x76d   : > { %9097 = vmatprep.subr.bf16.mxu1 %v9961_v10  ;;  %9125 = vmatprep.subr.bf16.mxu0 %v9967_v31 }
 0x76e   : > { %9126 = vmatpush3.bf16.msra.mxu0 %v9967_v31 }
 0x76f   : > { %9127 = vmatprep.subr.bf16.mxu0 %v9968_v60 }
 0x770   : > { %9098 = vmatpush3.bf16.msra.mxu1 %v9961_v10 }
 0x771   : > { %9107 = vmatprep.subr.bf16.mxu1 %v9962_v19 }
 0x772   : > { %9128 = vmatpush3.bf16.msra.mxu0 %v9968_v60 }
 0x773   : > { %9100 = vmatmul.mubr.msk.bf16.vlgmr.msra.gmra.mrb[24].mxu1 %vm771_vm0, %v11763_v33  ;;  %9129 = vmatprep.subr.bf16.mxu0 %v9969_v32  ;;  %v11871_v33 = vld [vmem:[#allocation20 + $0x20] sm:$0xff]  }
 0x774   : > { %9103 = vmatprep.mubr.msk.bf16.mxu1 %vm771_vm0, %v11777_v42  ;;  %9108 = vmatpush3.bf16.msra.mxu1 %v9962_v19 }
 0x775   : > { %9109 = vmatprep.subr.bf16.mxu1 %v9963_v13 }
 0x776   : > { %9130 = vmatpush3.bf16.msra.mxu0 %v9969_v32 }
 0x777   : > { %9139 = vmatprep.subr.bf16.mxu0 %v11871_v33 }
 0x778   : > { %9110 = vmatpush3.bf16.msra.mxu1 %v9963_v13 }
 0x779   : > { %9111 = vmatprep.subr.bf16.mxu1 %v9964_v3 }
 0x77b   : > { %9104 = vmatmul.mubr.msk.bf16.gmra.mrb[28].mxu1 %vm771_vm0, %v5580_v17 }
 0x77c   : > { %9112 = vmatpush3.bf16.msra.mxu1 %v9964_v3  ;;  %9115 = vmatprep.mubr.msk.bf16.mxu1 %vm771_vm0, %v11792_v24 }
 0x77d   : > { %9113 = vmatprep.subr.bf16.mxu1 %v9965_v20 }
 0x780   : > { %9114 = vmatpush3.bf16.msra.mxu1 %v9965_v20 }
 0x783   : > { %9116 = vmatmul.mubr.msk.bf16.vlgmr.msra.gmra.mrb[24].mxu1 %vm771_vm0, %v11798_v44 }
 0x784   : > { %9119 = vmatprep.mubr.msk.bf16.mxu1 %vm771_vm0, %v11807_v47  ;;  %v4659_v47 = vld [vmem:[#allocation18 + $0x38] sm:$0xff] }
 0x78b   : > { %9120 = vmatmul.mubr.msk.bf16.gmra.mrb[28].mxu1 %vm771_vm0, %v5710_v21 }
 0x856   : > { %v9117_v37 = vpop.f32.mrb[24].mxu1 }
 0x857   : > { %v9315_v40 = vadd.f32 %v9117_v37, %v4654_v34  ;;  %v5790_v42 = vpop.f32.mrb[25].mxu1 }
 0x858   : > { %v9316_v43 = vadd.f32 %v5790_v42, %v4652_v9  ;;  %v9118_v23 = vpop.f32.mrb[26].mxu1 }
 0x859   : > { %v8035_v25 = vmul.f32 -1.442695, %v9315_v40  ;;  %v9317_v36 = vadd.f32 %v9118_v23, %v4655_v38  ;;  %v5793_v41 = vpop.f32.mrb[27].mxu1  ;;  %v9972_v23 = vld [vmem:[#allocation20 + $0x30] sm:$0xff]  }
 0x85a   : > { %v8033_v24 = vmul.f32 -1.442695, %v9316_v43  ;;  %v9318_v15 = vadd.f32 %v5793_v41, %v4653_v18 }
 0x85b   : > { %10082 = vpow2.f32 %v8035_v25  ;;  %v8036_v29 = vmul.f32 -1.442695, %v9317_v36 }
 0x85c   : > { %10084 = vpow2.f32 %v8033_v24  ;;  %v8034_v44 = vmul.f32 -1.442695, %v9318_v15  ;;  %v6029_v24 = vld [vmem:[#allocation2 + $0x1] sm:$0xff] }
 0x85d   : > { %10086 = vpow2.f32 %v8036_v29 }
 0x85e   : > { %10088 = vpow2.f32 %v8034_v44  ;;  %v9121_v46 = vpop.f32.mrb[28].mxu1 }
 0x85f   : > { %v9319_v49 = vadd.f32 %v9121_v46, %v4658_v45  ;;  %v5806_v39 = vpop.f32.mrb[29].mxu1  ;;  %v9973_v45 = vld [vmem:[#allocation20 + $0x38] sm:$0xff]   ;;  %v9974_v46 = vld [vmem:[#allocation20 + $0x40] sm:$0xff]  }
 0x860   : > { %v9320_v51 = vadd.f32 %v5806_v39, %v4656_v1  ;;  %v9122_v52 = vpop.f32.mrb[30].mxu1 }
 0x861   : > { %v8039_v53 = vmul.f32 -1.442695, %v9319_v49  ;;  %v9321_v55 = vadd.f32 %v9122_v52, %v4659_v47  ;;  %v5809_v56 = vpop.f32.mrb[31].mxu1  ;;  %v9975_v52 = vld [vmem:[#allocation20 + $0x48] sm:$0xff]  }
 0x862   : > { %v8037_v57 = vmul.f32 -1.442695, %v9320_v51  ;;  %v9322_v58 = vadd.f32 %v5809_v56, %v4657_v50 }
 0x863   : > { %10090 = vpow2.f32 %v8039_v53  ;;  %v8040_v61 = vmul.f32 -1.442695, %v9321_v55 }
 0x864   : > { %10092 = vpow2.f32 %v8037_v57  ;;  %v8038_v62 = vmul.f32 -1.442695, %v9322_v58  ;;  %v6159_v57 = vld [vmem:[#allocation2 + $0x2] sm:$0xff] }
 0x865   : > { %v10083_v63 = vpop.eup %10082  ;;  %10094 = vpow2.f32 %v8040_v61 }
 0x866   : > { %v10085_v0 = vpop.eup %10084  ;;  %v5855_v2 = vadd.f32 1.0, %v10083_v63  ;;  %10096 = vpow2.f32 %v8038_v62  ;;  %v9977_v63 = vld [vmem:[#allocation20 + $0x58] sm:$0xff]  }
 0x867   : > { %v10087_v54 = vpop.eup %10086  ;;  %v5853_v4 = vadd.f32 1.0, %v10085_v0 }
 0x868   : > { %v10089_v59 = vpop.eup %10088  ;;  %10098 = vrcp.f32 %v5855_v2  ;;  %v5856_v48 = vadd.f32 1.0, %v10087_v54  ;;  %v9978_v2 = vld [vmem:[#allocation20 + $0x60] sm:$0xff]  }
 0x869   : > { %10100 = vrcp.f32 %v5853_v4  ;;  %v5854_v5 = vadd.f32 1.0, %v10089_v59 }
 0x86a   : > { %10102 = vrcp.f32 %v5856_v48 }
 0x86b   : > { %10104 = vrcp.f32 %v5854_v5 }
 0x86d   : > { %v10091_v7 = vpop.eup %10090 }
 0x86e   : > { %v10093_v8 = vpop.eup %10092  ;;  %v5859_v11 = vadd.f32 1.0, %v10091_v7  ;;  %v9979_v7 = vld [vmem:[#allocation20 + $0x68] sm:$0xff]  }
 0x86f   : > { %v10095_v35 = vpop.eup %10094  ;;  %v5857_v12 = vadd.f32 1.0, %v10093_v8 }
 0x870   : > { %v10097_v16 = vpop.eup %10096  ;;  %10106 = vrcp.f32 %v5859_v11  ;;  %v5860_v22 = vadd.f32 1.0, %v10095_v35  ;;  %v9980_v11 = vld [vmem:[#allocation20 + $0x70] sm:$0xff]  }
 0x871   : > { %10108 = vrcp.f32 %v5857_v12  ;;  %v5858_v26 = vadd.f32 1.0, %v10097_v16 }
 0x872   : > { %v10099_v14 = vpop.eup %10098  ;;  %10110 = vrcp.f32 %v5860_v22  ;;  %v9981_v22 = vld [vmem:[#allocation20 + $0x78] sm:$0xff]  }
 0x873   : > { %v10101_v27 = vpop.eup %10100  ;;  %v5879_v28 = vmul.f32 %v10099_v14, %v9315_v40  ;;  %10112 = vrcp.f32 %v5858_v26  ;;  %v9982_v14 = vld [vmem:[#allocation20 + $0x80] sm:$0xff]  }
 0x874   : > { %v10103_v30 = vpop.eup %10102  ;;  %v5877_v10 = vmul.f32 %v10101_v27, %v9316_v43  ;;  %v9971_v43 = vld [vmem:[#allocation20 + $0x28] sm:$0xff]  }
 0x875   : > { %v10105_v19 = vpop.eup %10104  ;;  %5887 = vst.msk [vmem:[#allocation2 + $0x31] sm:$0xff] %vm771_vm0, %v5879_v28  ;;  %v5880_v13 = vmul.f32 %v10103_v30, %v9317_v36  ;;  %v9983_v28 = vld [vmem:[#allocation20 + $0x88] sm:$0xff]  }
 0x876   : > { %5885 = vst.msk [vmem:[#allocation2 + $0x11] sm:$0xff] %vm771_vm0, %v5877_v10  ;;  %v5878_v3 = vmul.f32 %v10105_v19, %v9318_v15  ;;  %v9984_v10 = vld [vmem:[#allocation20 + $0x90] sm:$0xff]  }
 0x877   : > { %5888 = vst.msk [vmem:[#allocation2 + $0x41] sm:$0xff] %vm771_vm0, %v5880_v13 }
 0x878   : > { %5886 = vst.msk [vmem:[#allocation2 + $0x21] sm:$0xff] %vm771_vm0, %v5878_v3  ;;  %v9985_v3 = vld [vmem:[#allocation20 + $0x98] sm:$0xff]  }
 0x87a   : > { %v10107_v17 = vpop.eup %10106 }
 0x87b   : > { %v10109_v20 = vpop.eup %10108  ;;  %v5883_v21 = vmul.f32 %v10107_v17, %v9319_v49 }
 0x87c   : > { %v10111_v31 = vpop.eup %10110  ;;  %v5881_v60 = vmul.f32 %v10109_v20, %v9320_v51  ;;  %v11886_v42 = vld [vmem:[#allocation2 + $0x30] sm:$0xff]  ;;  %v9986_v20 = vld [vmem:[#allocation20 + $0xa0] sm:$0xff]  }
 0x87d   : > { %v10113_v32 = vpop.eup %10112  ;;  %5891 = vst.msk [vmem:[#allocation2 + $0x71] sm:$0xff] %vm771_vm0, %v5883_v21  ;;  %v5884_v34 = vmul.f32 %v10111_v31, %v9321_v55  ;;  %v11879_v9 = vld [vmem:[#allocation2 + $0x10] sm:$0xff] }
 0x87e   : > { %5889 = vst.msk [vmem:[#allocation2 + $0x51] sm:$0xff] %vm771_vm0, %v5881_v60  ;;  %v5882_v37 = vmul.f32 %v10113_v32, %v9322_v58  ;;  %v5902_v38 = vpack.c.bf16 %v11879_v9, %v5894_v6  ;;  %v11897_v25 = vld [vmem:[#allocation2 + $0x40] sm:$0xff]  ;;  %v11905_v15 = vld [vmem:[#allocation2 + $0x11] sm:$0xff] }
 0x87f   : > { %5892 = vst.msk [vmem:[#allocation2 + $0x81] sm:$0xff] %vm771_vm0, %v5884_v34  ;;  %v11884_v40 = vld [vmem:[#allocation2 + $0x20] sm:$0xff]  ;;  %v6037_v1 = vpack.c.bf16 %v11905_v15, %v6029_v24  ;;  %v11925_v39 = vld [vmem:[#allocation2 + $0x31] sm:$0xff]  ;;  %v6298_v27 = vpack.c.bf16 %v11897_v25, %v11886_v42 }
 0x880   : > { %5890 = vst.msk [vmem:[#allocation2 + $0x61] sm:$0xff] %vm771_vm0, %v5882_v37  ;;  %9131 = vmatprep.mubr.msk.bf16.mxu0 %vm771_vm0, %v5902_v38  ;;  %v11892_v18 = vpack.c.bf16 %v11886_v42, %v11884_v40  ;;  %v11921_v47 = vld [vmem:[#allocation2 + $0x21] sm:$0xff]  ;;  %v9976_v55 = vld [vmem:[#allocation20 + $0x50] sm:$0xff]   ;;  %v6297_v26 = vpack.c.bf16 %v11884_v40, %v11879_v9  ;;  %v9987_v6 = vld [vmem:[#allocation20 + $0xa8] sm:$0xff]  }
 0x881   : > { %v11929_v50 = vpack.c.bf16 %v11925_v39, %v11921_v47  ;;  %v11931_v51 = vld [vmem:[#allocation2 + $0x41] sm:$0xff]  ;;  %v11943_v58 = vld [vmem:[#allocation2 + $0x12] sm:$0xff]  ;;  %v6427_v17 = vpack.c.bf16 %v11921_v47, %v11905_v15 }
 0x882   : > { %9132 = vmatmul.mubr.msk.bf16.vlgmr.msra.gmra.mrb[16].mxu0 %vm771_vm0, %v11892_v18  ;;  %v6167_v0 = vpack.c.bf16 %v11943_v58, %v6159_v57  ;;  %v11955_v54 = vld [vmem:[#allocation2 + $0x22] sm:$0xff]  ;;  %v11959_v59 = vld [vmem:[#allocation2 + $0x32] sm:$0xff]  ;;  %v6428_v21 = vpack.c.bf16 %v11931_v51, %v11925_v39 }
 0x883   : > { %9140 = vmatpush3.bf16.msra.mxu0 %v11871_v33  ;;  %v11963_v48 = vpack.c.bf16 %v11959_v59, %v11955_v54  ;;  %v11965_v5 = vld [vmem:[#allocation2 + $0x42] sm:$0xff]  ;;  %v9988_v60 = vld [vmem:[#allocation20 + $0xb0] sm:$0xff]   ;;  %v6557_v37 = vpack.c.bf16 %v11955_v54, %v11943_v58  ;;  %v9991_v42 = vld [vmem:[#allocation20 + $0xc8] sm:$0xff]  }
 0x884   : > { %9141 = vmatprep.subr.bf16.mxu0 %v9971_v43  ;;  %v11909_v44 = vld [vmem:[#allocation2 + $0x70] sm:$0xff]  ;;  %v9989_v9 = vld [vmem:[#allocation20 + $0xb8] sm:$0xff]   ;;  %v9990_v38 = vld [vmem:[#allocation20 + $0xc0] sm:$0xff]   ;;  %v6558_v40 = vpack.c.bf16 %v11965_v5, %v11959_v59 }
 0x885   : > { %v11899_v36 = vld [vmem:[#allocation2 + $0x50] sm:$0xff]  ;;  %v9993_v24 = vld [vmem:[#allocation20 + $0xd8] sm:$0xff]   ;;  %v9994_v15 = vld [vmem:[#allocation20 + $0xe0] sm:$0xff]  }
 0x886   : > { %v11903_v41 = vpack.c.bf16 %v11899_v36, %v11897_v25  ;;  %v11923_v49 = vld [vmem:[#allocation2 + $0x51] sm:$0xff]  ;;  %v11991_v19 = vld [vmem:[#allocation2 + $0x80] sm:$0xff] }
 0x887   : > { %9142 = vmatpush3.bf16.msra.mxu0 %v9971_v43  ;;  %v11907_v29 = vld [vmem:[#allocation2 + $0x60] sm:$0xff]  ;;  %v11935_v53 = vpack.c.bf16 %v11923_v49, %v11931_v51  ;;  %v11945_v61 = vld [vmem:[#allocation2 + $0x71] sm:$0xff]  ;;  %v6300_v13 = vpack.c.bf16 %v11991_v19, %v11909_v44 }
 0x888   : > { %9135 = vmatprep.mubr.msk.bf16.mxu0 %vm771_vm0, %v11903_v41  ;;  %v11915_v33 = vpack.c.bf16 %v11909_v44, %v11907_v29  ;;  %9143 = vmatprep.subr.bf16.mxu0 %v9972_v23  ;;  %v11941_v56 = vld [vmem:[#allocation2 + $0x61] sm:$0xff]  ;;  %v11957_v4 = vld [vmem:[#allocation2 + $0x52] sm:$0xff]  ;;  %v6299_v30 = vpack.c.bf16 %v11907_v29, %v11899_v36 }
 0x889   : > { %v11949_v62 = vpack.c.bf16 %v11945_v61, %v11941_v56  ;;  %v11969_v8 = vpack.c.bf16 %v11957_v4, %v11965_v5  ;;  %v6165_v35 = vld [vmem:[#allocation2 + $0x62] sm:$0xff]  ;;  %v11975_v12 = vld [vmem:[#allocation2 + $0x72] sm:$0xff]  ;;  %v6429_v31 = vpack.c.bf16 %v11941_v56, %v11923_v49 }
 0x88a   : > { %9136 = vmatmul.mubr.msk.bf16.gmra.mrb[20].mxu0 %vm771_vm0, %v11915_v33  ;;  %v11978_v16 = vpack.c.bf16 %v11975_v12, %v6165_v35  ;;  %v12005_v32 = vld [vmem:[#allocation2 + $0x81] sm:$0xff]  ;;  %v6559_v43 = vpack.c.bf16 %v6165_v35, %v11957_v4  ;;  %v9995_v29 = vld [vmem:[#allocation20 + $0xe8] sm:$0xff]   ;;  %v9996_v44 = vld [vmem:[#allocation20 + $0xf0] sm:$0xff]  }
 0x88b   : > { %9144 = vmatpush3.bf16.msra.mxu0 %v9972_v23  ;;  %9147 = vmatprep.mubr.msk.bf16.mxu0 %vm771_vm0, %v6037_v1  ;;  %v6430_v34 = vpack.c.bf16 %v12005_v32, %v11945_v61  ;;  %v9992_v23 = vld [vmem:[#allocation20 + $0xd0] sm:$0xff]   ;;  %v6556_v25 = vld [vmem:[#allocation2 + $0x82] sm:$0xff] }
 0x88c   : > { %9145 = vmatprep.subr.bf16.mxu0 %v9973_v45  ;;  %v6560_v36 = vpack.c.bf16 %v6556_v25, %v11975_v12  ;;  %v6816_v47 = vld [vmem:[#allocation2 + $0x91] sm:$0xff]  ;;  %v10001_v39 = vld [vmem:[#allocation20 + $0x118] sm:$0xff]   ;;  %v8049_v57 = vld [vmem:[#allocation21] ss:$0 sm:$0xff] }
 0x88d   : > { %v6820_v49 = vpack.c.bf16 %v6816_v47, %v12005_v32  ;;  %v10005_v56 = vld [vmem:[#allocation23 + $0x18] sm:$0xff]  }
 0x88f   : > { %9146 = vmatpush3.bf16.msra.mxu0 %v9973_v45  ;;  %v6686_v45 = vld [vmem:[#allocation2 + $0x90] sm:$0xff] }
 0x890   : > { %9155 = vmatprep.subr.bf16.mxu0 %v9974_v46  ;;  %v6690_v1 = vpack.c.bf16 %v6686_v45, %v11991_v19 }
 0x892   : > { %9148 = vmatmul.mubr.msk.bf16.vlgmr.msra.gmra.mrb[16].mxu0 %vm771_vm0, %v11929_v50 }
 0x893   : > { %9151 = vmatprep.mubr.msk.bf16.mxu0 %vm771_vm0, %v11935_v53  ;;  %9156 = vmatpush3.bf16.msra.mxu0 %v9974_v46  ;;  %v10000_v46 = vld [vmem:[#allocation20 + $0x110] sm:$0xff]  }
 0x894   : > { %9157 = vmatprep.subr.bf16.mxu0 %v9975_v52 }
 0x897   : > { %9158 = vmatpush3.bf16.msra.mxu0 %v9975_v52  ;;  %v10002_v52 = vld [vmem:[#allocation23] sm:$0xff]  }
 0x898   : > { %9159 = vmatprep.subr.bf16.mxu0 %v9976_v55  ;;  %9267 = vmatprep.subr.bf16.mxu1 %v10002_v52 }
 0x899   : > { %9268 = vmatpush3.bf16.msra.mxu1 %v10002_v52 }
 0x89a   : > { %9152 = vmatmul.mubr.msk.bf16.gmra.mrb[20].mxu0 %vm771_vm0, %v11949_v62 }
 0x89b   : > { %9160 = vmatpush3.bf16.msra.mxu0 %v9976_v55  ;;  %9163 = vmatprep.mubr.msk.bf16.mxu0 %vm771_vm0, %v6167_v0  ;;  %v10004_v55 = vld [vmem:[#allocation23 + $0x10] sm:$0xff]  }
 0x89c   : > { %9161 = vmatprep.subr.bf16.mxu0 %v9977_v63 }
 0x89f   : > { %9162 = vmatpush3.bf16.msra.mxu0 %v9977_v63 }
 0x8a0   : > { %9171 = vmatprep.subr.bf16.mxu0 %v9978_v2 }
 0x8a2   : > { %9164 = vmatmul.mubr.msk.bf16.vlgmr.msra.gmra.mrb[16].mxu0 %vm771_vm0, %v11963_v48 }
 0x8a3   : > { %9167 = vmatprep.mubr.msk.bf16.mxu0 %vm771_vm0, %v11969_v8  ;;  %9172 = vmatpush3.bf16.msra.mxu0 %v9978_v2 }
 0x8a4   : > { %9173 = vmatprep.subr.bf16.mxu0 %v9979_v7 }
 0x8a7   : > { %9174 = vmatpush3.bf16.msra.mxu0 %v9979_v7 }
 0x8a8   : > { %9175 = vmatprep.subr.bf16.mxu0 %v9980_v11 }
 0x8aa   : > { %9168 = vmatmul.mubr.msk.bf16.gmra.mrb[20].mxu0 %vm771_vm0, %v11978_v16 }
 0x8ab   : > { %9176 = vmatpush3.bf16.msra.mxu0 %v9980_v11  ;;  %9179 = vmatprep.mubr.msk.bf16.mxu0 %vm771_vm0, %v6297_v26 }
 0x8ac   : > { %9177 = vmatprep.subr.bf16.mxu0 %v9981_v22 }
 0x8af   : > { %9178 = vmatpush3.bf16.msra.mxu0 %v9981_v22 }
 0x8b0   : > { %9187 = vmatprep.subr.bf16.mxu0 %v9982_v14 }
 0x8b2   : > { %9180 = vmatmul.mubr.msk.bf16.vlgmr.msra.gmra.mrb[16].mxu0 %vm771_vm0, %v6298_v27 }
 0x8b3   : > { %9183 = vmatprep.mubr.msk.bf16.mxu0 %vm771_vm0, %v6299_v30  ;;  %9188 = vmatpush3.bf16.msra.mxu0 %v9982_v14 }
 0x8b4   : > { %9189 = vmatprep.subr.bf16.mxu0 %v9983_v28 }
 0x8b7   : > { %9190 = vmatpush3.bf16.msra.mxu0 %v9983_v28 }
 0x8b8   : > { %9191 = vmatprep.subr.bf16.mxu0 %v9984_v10 }
 0x8ba   : > { %9184 = vmatmul.mubr.msk.bf16.gmra.mrb[20].mxu0 %vm771_vm0, %v6300_v13 }
 0x8bb   : > { %9192 = vmatpush3.bf16.msra.mxu0 %v9984_v10  ;;  %9195 = vmatprep.mubr.msk.bf16.mxu0 %vm771_vm0, %v6427_v17 }
 0x8bc   : > { %9193 = vmatprep.subr.bf16.mxu0 %v9985_v3 }
 0x8bf   : > { %9194 = vmatpush3.bf16.msra.mxu0 %v9985_v3 }
 0x8c0   : > { %9203 = vmatprep.subr.bf16.mxu0 %v9986_v20 }
 0x8c2   : > { %9196 = vmatmul.mubr.msk.bf16.vlgmr.msra.gmra.mrb[16].mxu0 %vm771_vm0, %v6428_v21 }
 0x8c3   : > { %9199 = vmatprep.mubr.msk.bf16.mxu0 %vm771_vm0, %v6429_v31  ;;  %9204 = vmatpush3.bf16.msra.mxu0 %v9986_v20 }
 0x8c4   : > { %9205 = vmatprep.subr.bf16.mxu0 %v9987_v6 }
 0x8c7   : > { %9206 = vmatpush3.bf16.msra.mxu0 %v9987_v6 }
 0x8c8   : > { %9207 = vmatprep.subr.bf16.mxu0 %v9988_v60 }
 0x8ca   : > { %9200 = vmatmul.mubr.msk.bf16.gmra.mrb[20].mxu0 %vm771_vm0, %v6430_v34 }
 0x8cb   : > { %9208 = vmatpush3.bf16.msra.mxu0 %v9988_v60  ;;  %9211 = vmatprep.mubr.msk.bf16.mxu0 %vm771_vm0, %v6557_v37 }
 0x8cc   : > { %9209 = vmatprep.subr.bf16.mxu0 %v9989_v9 }
 0x8cf   : > { %9210 = vmatpush3.bf16.msra.mxu0 %v9989_v9 }
 0x8d0   : > { %9219 = vmatprep.subr.bf16.mxu0 %v9990_v38 }
 0x8d2   : > { %9212 = vmatmul.mubr.msk.bf16.vlgmr.msra.gmra.mrb[16].mxu0 %vm771_vm0, %v6558_v40 }
 0x8d3   : > { %9215 = vmatprep.mubr.msk.bf16.mxu0 %vm771_vm0, %v6559_v43  ;;  %9220 = vmatpush3.bf16.msra.mxu0 %v9990_v38 }
 0x8d4   : > { %9221 = vmatprep.subr.bf16.mxu0 %v9991_v42 }
 0x8d7   : > { %9222 = vmatpush3.bf16.msra.mxu0 %v9991_v42 }
 0x8d8   : > { %9223 = vmatprep.subr.bf16.mxu0 %v9992_v23 }
 0x8da   : > { %9216 = vmatmul.mubr.msk.bf16.gmra.mrb[20].mxu0 %vm771_vm0, %v6560_v36 }
 0x8db   : > { %9224 = vmatpush3.bf16.msra.mxu0 %v9992_v23  ;;  %9227 = vmatprep.mubr.msk.bf16.mxu0 %vm771_vm0, %v11892_v18  ;;  %v9997_v18 = vld [vmem:[#allocation20 + $0xf8] sm:$0xff]  }
 0x8dc   : > { %9225 = vmatprep.subr.bf16.mxu0 %v9993_v24 }
 0x8df   : > { %9226 = vmatpush3.bf16.msra.mxu0 %v9993_v24 }
 0x8e0   : > { %9235 = vmatprep.subr.bf16.mxu0 %v9994_v15 }
 0x8e2   : > { %9228 = vmatmul.mubr.msk.bf16.vlgmr.msra.gmra.mrb[16].mxu0 %vm771_vm0, %v11903_v41  ;;  %v9998_v41 = vld [vmem:[#allocation20 + $0x100] sm:$0xff]  }
 0x8e3   : > { %9231 = vmatprep.mubr.msk.bf16.mxu0 %vm771_vm0, %v11915_v33  ;;  %9236 = vmatpush3.bf16.msra.mxu0 %v9994_v15  ;;  %v9999_v33 = vld [vmem:[#allocation20 + $0x108] sm:$0xff]  }
 0x8e4   : > { %9237 = vmatprep.subr.bf16.mxu0 %v9995_v29 }
 0x8e7   : > { %9238 = vmatpush3.bf16.msra.mxu0 %v9995_v29 }
 0x8e8   : > { %9239 = vmatprep.subr.bf16.mxu0 %v9996_v44 }
 0x8ea   : > { %9232 = vmatmul.mubr.msk.bf16.gmra.mrb[20].mxu0 %vm771_vm0, %v6690_v1 }
 0x8eb   : > { %9240 = vmatpush3.bf16.msra.mxu0 %v9996_v44  ;;  %9243 = vmatprep.mubr.msk.bf16.mxu0 %vm771_vm0, %v11929_v50  ;;  %v6946_v50 = vld [vmem:[#allocation2 + $0x92] sm:$0xff] }
 0x8ec   : > { %9241 = vmatprep.subr.bf16.mxu0 %v9997_v18  ;;  %v6950_v51 = vpack.c.bf16 %v6946_v50, %v6556_v25 }
 0x8ef   : > { %9242 = vmatpush3.bf16.msra.mxu0 %v9997_v18 }
 0x8f0   : > { %9251 = vmatprep.subr.bf16.mxu0 %v9998_v41 }
 0x8f2   : > { %9244 = vmatmul.mubr.msk.bf16.vlgmr.msra.gmra.mrb[16].mxu0 %vm771_vm0, %v11935_v53  ;;  %v10003_v53 = vld [vmem:[#allocation23 + $0x8] sm:$0xff]  }
 0x8f3   : > { %9247 = vmatprep.mubr.msk.bf16.mxu0 %vm771_vm0, %v11949_v62  ;;  %9252 = vmatpush3.bf16.msra.mxu0 %v9998_v41 }
 0x8f4   : > { %9253 = vmatprep.subr.bf16.mxu0 %v9999_v33  ;;  %9269 = vmatprep.subr.bf16.mxu1 %v10003_v53 }
 0x8f5   : > { %9270 = vmatpush3.bf16.msra.mxu1 %v10003_v53  ;;  %v10006_v53 = vld [vmem:[#allocation26] ss:$8 sps:$4 sm:$0xff]  }
 0x8f6   : > { %9271 = vmatprep.subr.bf16.mxu1 %v10004_v55 }
 0x8f7   : > { %9254 = vmatpush3.bf16.msra.mxu0 %v9999_v33 }
 0x8f8   : > { %9255 = vmatprep.subr.bf16.mxu0 %v10000_v46 }
 0x8f9   : > { %9272 = vmatpush3.bf16.msra.mxu1 %v10004_v55  ;;  %v10008_v55 = vld [vmem:[#allocation26 + $0x4] ss:$8 sps:$4 sm:$0xff]  }
 0x8fa   : > { %9248 = vmatmul.mubr.msk.bf16.gmra.mrb[20].mxu0 %vm771_vm0, %v6820_v49  ;;  %9273 = vmatprep.subr.bf16.mxu1 %v10005_v56 }
 0x8fb   : > { %9256 = vmatpush3.bf16.msra.mxu0 %v10000_v46  ;;  %9259 = vmatprep.mubr.msk.bf16.mxu0 %vm771_vm0, %v11963_v48 }
 0x8fc   : > { %9257 = vmatprep.subr.bf16.mxu0 %v10001_v39 }
 0x8fd   : > { %9274 = vmatpush3.bf16.msra.mxu1 %v10005_v56  ;;  %v10009_v56 = vld [vmem:[#allocation26 + $0x10] ss:$8 sps:$4 sm:$0xff]  }
 0x8fe   : > { %7361 = vmatprep.subr.bf16.mxu1 %v10008_v55 }
 0x8ff   : > { %9258 = vmatpush3.bf16.msra.mxu0 %v10001_v39 }
 0x902   : > { %9260 = vmatmul.mubr.msk.bf16.vlgmr.msra.gmra.mrb[16].mxu0 %vm771_vm0, %v11969_v8 }
 0x903   : > { %9263 = vmatprep.mubr.msk.bf16.mxu0 %vm771_vm0, %v11978_v16 }
 0x90a   : > { %9264 = vmatmul.mubr.msk.bf16.gmra.mrb[20].mxu0 %vm771_vm0, %v6950_v51 }
 0x9d5   : > { %v9261_v58 = vpop.f32.mrb[16].mxu0 }
 0x9d6   : > { %v9323_v61 = vadd.f32 %v9261_v58, %v8049_v57  ;;  %v7030_v62 = vpop.f32.mrb[17].mxu0  ;;  %v10012_v58 = vld [vmem:[#allocation26 + $0x20] ss:$8 sps:$4 sm:$0xff]  }
 0x9d7   : > { %v9324_v63 = vadd.f32 %v8049_v57, %v7030_v62  ;;  %v9262_v0 = vpop.f32.mrb[18].mxu0  ;;  %v10015_v62 = vld [vmem:[#allocation26 + $0x30] ss:$8 sps:$4 sm:$0xff]  }
 0x9d8   : > { %v8116_v2 = vmul.f32 -1.442695, %v9323_v61  ;;  %v9325_v54 = vadd.f32 %v9262_v0, %v8049_v57  ;;  %v7033_v4 = vpop.f32.mrb[19].mxu0  ;;  %v10661_v0 = vmov 0  }
 0x9d9   : > { %v8114_v59 = vmul.f32 -1.442695, %v9324_v63  ;;  %v9326_v48 = vadd.f32 %v8049_v57, %v7033_v4  ;;  %v7125_v4 = vld [vmem:[#allocation3] sm:$0xff] }
 0x9da   : > { %10114 = vpow2.f32 %v8116_v2  ;;  %v8117_v5 = vmul.f32 -1.442695, %v9325_v54  ;;  %v7127_v2 = vld [vmem:[#allocation3 + $0x10] sm:$0xff] }
 0x9db   : > { %10116 = vpow2.f32 %v8114_v59  ;;  %v8115_v7 = vmul.f32 -1.442695, %v9326_v48  ;;  %v7128_v59 = vld [vmem:[#allocation3 + $0x18] sm:$0xff] }
 0x9dc   : > { %10118 = vpow2.f32 %v8117_v5  ;;  %v7126_v5 = vld [vmem:[#allocation3 + $0x8] sm:$0xff] }
 0x9dd   : > { %10120 = vpow2.f32 %v8115_v7  ;;  %v9265_v8 = vpop.f32.mrb[20].mxu0 }
 0x9de   : > { %v9327_v11 = vadd.f32 %v9265_v8, %v8049_v57  ;;  %v7046_v35 = vpop.f32.mrb[21].mxu0 }
 0x9df   : > { %v9328_v12 = vadd.f32 %v8049_v57, %v7046_v35  ;;  %v9266_v16 = vpop.f32.mrb[22].mxu0 }
 0x9e0   : > { %v8120_v22 = vmul.f32 -1.442695, %v9327_v11  ;;  %v9329_v26 = vadd.f32 %v9266_v16, %v8049_v57  ;;  %v7049_v14 = vpop.f32.mrb[23].mxu0 }
 0x9e1   : > { %v8118_v27 = vmul.f32 -1.442695, %v9328_v12  ;;  %v9330_v28 = vadd.f32 %v8049_v57, %v7049_v14  ;;  %v10011_v57 = vld [vmem:[#allocation26 + $0x14] ss:$8 sps:$4 sm:$0xff]  }
 0x9e2   : > { %10122 = vpow2.f32 %v8120_v22  ;;  %v8121_v30 = vmul.f32 -1.442695, %v9329_v26 }
 0x9e3   : > { %10124 = vpow2.f32 %v8118_v27  ;;  %v8119_v10 = vmul.f32 -1.442695, %v9330_v28 }
 0x9e4   : > { %v10115_v19 = vpop.eup %10114  ;;  %10126 = vpow2.f32 %v8121_v30  ;;  %v7131_v30 = vld [vmem:[#allocation3 + $0x30] sm:$0xff] }
 0x9e5   : > { %v10117_v13 = vpop.eup %10116  ;;  %v7095_v3 = vadd.f32 1.0, %v10115_v19  ;;  %10128 = vpow2.f32 %v8119_v10  ;;  %v7129_v10 = vld [vmem:[#allocation3 + $0x20] sm:$0xff]  ;;  %v7132_v19 = vld [vmem:[#allocation3 + $0x38] sm:$0xff] }
 0x9e6   : > { %v10119_v17 = vpop.eup %10118  ;;  %v7093_v20 = vadd.f32 1.0, %v10117_v13 }
 0x9e7   : > { %v10121_v21 = vpop.eup %10120  ;;  %10130 = vrcp.f32 %v7095_v3  ;;  %v7096_v6 = vadd.f32 1.0, %v10119_v17  ;;  %v7130_v3 = vld [vmem:[#allocation3 + $0x28] sm:$0xff] }
 0x9e8   : > { %10132 = vrcp.f32 %v7093_v20  ;;  %v7094_v31 = vadd.f32 1.0, %v10121_v21 }
 0x9e9   : > { %10134 = vrcp.f32 %v7096_v6 }
 0x9ea   : > { %10136 = vrcp.f32 %v7094_v31 }
 0x9ec   : > { %v10123_v60 = vpop.eup %10122 }
 0x9ed   : > { %v10125_v32 = vpop.eup %10124  ;;  %v7099_v34 = vadd.f32 1.0, %v10123_v60 }
 0x9ee   : > { %v10127_v9 = vpop.eup %10126  ;;  %v7097_v37 = vadd.f32 1.0, %v10125_v32 }
 0x9ef   : > { %v10129_v38 = vpop.eup %10128  ;;  %10138 = vrcp.f32 %v7099_v34  ;;  %v7100_v40 = vadd.f32 1.0, %v10127_v9 }
 0x9f0   : > { %10140 = vrcp.f32 %v7097_v37  ;;  %v7098_v42 = vadd.f32 1.0, %v10129_v38 }
 0x9f1   : > { %v10131_v43 = vpop.eup %10130  ;;  %10142 = vrcp.f32 %v7100_v40 }
 0x9f2   : > { %v10133_v23 = vpop.eup %10132  ;;  %10144 = vrcp.f32 %v7098_v42  ;;  %v7119_v24 = vmul.f32 %v10131_v43, %v9323_v61  ;;  %v10014_v61 = vld [vmem:[#allocation26 + $0x24] ss:$8 sps:$4 sm:$0xff]  }
 0x9f3   : > { %v10135_v25 = vpop.eup %10134  ;;  %v7117_v29 = vmul.f32 %v10133_v23, %v9324_v63  ;;  %v10017_v63 = vld [vmem:[#allocation26 + $0x34] ss:$8 sps:$4 sm:$0xff]  }
 0x9f4   : > { %v10137_v36 = vpop.eup %10136  ;;  %v7120_v15 = vmul.f32 %v10135_v25, %v9325_v54  ;;  %v8122_v54 = vld [vmem:[#allocation24] ss:$0 sm:$0xff] }
 0x9f5   : > { %v7118_v44 = vmul.f32 %v10137_v36, %v9326_v48  ;;  %v7142_v48 = vadd.f32 %v8122_v54, %v7127_v2  ;;  %v7140_v8 = vadd.f32 %v8122_v54, %v7125_v4  ;;  %v7146_v13 = vadd.f32 %v8122_v54, %v7131_v30 }
 0x9f6   : > { %v7149_v45 = vpack.c.bf16 %v7120_v15, %v7119_v24  ;;  %v7144_v20 = vadd.f32 %v8122_v54, %v7129_v10  ;;  %v7147_v31 = vadd.f32 %v8122_v54, %v7132_v19  ;;  %v7145_v34 = vadd.f32 %v8122_v54, %v7130_v3 }
 0x9f7   : > { %v7148_v1 = vpack.c.bf16 %v7118_v44, %v7117_v29 }
 0x9f9   : > { %v10139_v18 = vpop.eup %10138  ;;  %9275 = vmatprep.mubr.msk.bf16.mxu1 %vm771_vm0, %v7148_v1 }
 0x9fa   : > { %v10141_v41 = vpop.eup %10140  ;;  %9276 = vmatmul.mubr.msk.bf16.vlgmr.msra.gmra.mrb[32].mxu1 %vm771_vm0, %v7149_v45  ;;  %v7123_v47 = vmul.f32 %v10139_v18, %v9327_v11  ;;  %v7299_v18 = vlaneseq }
 0x9fb   : > { %v10143_v33 = vpop.eup %10142  ;;  %v7121_v39 = vmul.f32 %v10141_v41, %v9328_v12  ;;  %7362 = vmatpush1.bf16.msra.mxu1 %v10006_v53  ;;  %v7143_v12 = vadd.f32 %v8122_v54, %v7128_v59 }
 0x9fc   : > { %v10145_v46 = vpop.eup %10144  ;;  %v7124_v49 = vmul.f32 %v10143_v33, %v9329_v26  ;;  %7363 = vmatprep.subr.bf16.mxu1 %v10011_v57  ;;  %v7141_v26 = vadd.f32 %v8122_v54, %v7126_v5  ;;  %v7300_v41 = vshrl.u32 %v7299_v18, 7 }
 0x9fd   : > { %v7122_v50 = vmul.f32 %v10145_v46, %v9330_v28  ;;  %v7297_v46 = vld [vmem:[#allocation27] sm:$0x3] }
 0x9fe   : > { %v7151_v51 = vpack.c.bf16 %v7124_v49, %v7123_v47  ;;  %v7301_v33 = vsub.s32 0, %v7300_v41  ;;  %v7305_v47 = vsub.s32 1, %v7300_v41 }
 0x9ff   : > { %v7150_v52 = vpack.c.bf16 %v7122_v50, %v7121_v39  ;;  %7364 = vmatpush1.bf16.msra.mxu1 %v10009_v56 }
 0xa00   : > { %7365 = vmatprep.subr.bf16.mxu1 %v10014_v61  ;;  %v7302_v49 = vrot.slane %v7297_v46, %v7301_v33  ;;  %v7306_v39 = vrot.slane %v7297_v46, %v7305_v47 }
 0xa01   : > { %9279 = vmatprep.mubr.msk.bf16.mxu1 %vm771_vm0, %v7150_v52 }
 0xa02   : > { %9280 = vmatmul.mubr.msk.bf16.gmra.mrb[36].mxu1 %vm771_vm0, %v7151_v51 }
 0xa03   : > { %7366 = vmatpush1.bf16.msra.mxu1 %v10012_v58  ;;  %7393 = vmatprep.mubr.bf16.mxu1 %v10661_v0 }
 0xa04   : > { %7367 = vmatprep.subr.bf16.mxu1 %v10017_v63 }
 0xa07   : > { %7368 = vmatpush1.bf16.msra.mxu1 %v10015_v62 }
 0xacd   : > { %v9277_v7 = vpop.f32.mrb[32].mxu1 }
 0xace   : > { %v7263_v11 = vadd.f32 %v9277_v7, %v7142_v48  ;;  %v7230_v35 = vpop.f32.mrb[33].mxu1 }
 0xacf   : > { %v7261_v16 = vadd.f32 %v7230_v35, %v7140_v8  ;;  %v9278_v22 = vpop.f32.mrb[34].mxu1 }
 0xad0   : > { %7271 = vst.msk [vmem:[#allocation3 + $0x10] sm:$0xff] %vm771_vm0, %v7263_v11  ;;  %v7264_v14 = vadd.f32 %v9278_v22, %v7143_v12  ;;  %v7233_v27 = vpop.f32.mrb[35].mxu1 }
 0xad1   : > { %7269 = vst.msk [vmem:[#allocation3] sm:$0xff] %vm771_vm0, %v7261_v16  ;;  %v7262_v28 = vadd.f32 %v7233_v27, %v7141_v26 }
 0xad2   : > { %7272 = vst.msk [vmem:[#allocation3 + $0x18] sm:$0xff] %vm771_vm0, %v7264_v14 }
 0xad3   : > { %7270 = vst.msk [vmem:[#allocation3 + $0x8] sm:$0xff] %vm771_vm0, %v7262_v28 }
 0xad5   : > { %v9281_v17 = vpop.f32.mrb[36].mxu1 }
 0xad6   : > { %v7267_v21 = vadd.f32 %v9281_v17, %v7146_v13  ;;  %v7246_v6 = vpop.f32.mrb[37].mxu1 }
 0xad7   : > { %v7265_v60 = vadd.f32 %v7246_v6, %v7144_v20  ;;  %v9282_v32 = vpop.f32.mrb[38].mxu1  ;;  %v7279_v25 = vld [vmem:[#allocation3 + $0x10] sm:$0xff] }
 0xad8   : > { %7275 = vst.msk [vmem:[#allocation3 + $0x30] sm:$0xff] %vm771_vm0, %v7267_v21  ;;  %v7268_v9 = vadd.f32 %v9282_v32, %v7147_v31  ;;  %v7249_v37 = vpop.f32.mrb[39].mxu1  ;;  %v7277_v40 = vld [vmem:[#allocation3] sm:$0xff] }
 0xad9   : > { %7273 = vst.msk [vmem:[#allocation3 + $0x20] sm:$0xff] %vm771_vm0, %v7265_v60  ;;  %v7266_v38 = vadd.f32 %v7249_v37, %v7145_v34  ;;  %v7280_v23 = vld [vmem:[#allocation3 + $0x18] sm:$0xff] }
 0xada   : > { %7276 = vst.msk [vmem:[#allocation3 + $0x38] sm:$0xff] %vm771_vm0, %v7268_v9  ;;  %v7278_v42 = vld [vmem:[#allocation3 + $0x8] sm:$0xff]  ;;  %v7286_v36 = vpack.c.bf16 %v7280_v23, %v7279_v25 }
 0xadb   : > { %7274 = vst.msk [vmem:[#allocation3 + $0x28] sm:$0xff] %vm771_vm0, %v7266_v38  ;;  %v7285_v43 = vpack.c.bf16 %v7278_v42, %v7277_v40 }
 0xadd   : > { %8139 = vmatmul.mubr.msk.bf16.vlgmr.msra.gmra.mrb[40].mxu1 %vm771_vm0, %v7285_v43 }
 0xade   : > { %7403 = vmatprep.mubr.bf16.mxu1 %v10661_v0 }
 0xadf   : > { %v7283_v45 = vld [vmem:[#allocation3 + $0x30] sm:$0xff] }
 0xae0   : > { %v7281_v15 = vld [vmem:[#allocation3 + $0x20] sm:$0xff] }
 0xae1   : > { %v7284_v44 = vld [vmem:[#allocation3 + $0x38] sm:$0xff] }
 0xae2   : > { %v7282_v24 = vld [vmem:[#allocation3 + $0x28] sm:$0xff]  ;;  %v7288_v1 = vpack.c.bf16 %v7284_v44, %v7283_v45 }
 0xae3   : > { %v7287_v29 = vpack.c.bf16 %v7282_v24, %v7281_v15 }
 0xae5   : > { %8140 = vmatmul.mubr.msk.bf16.gmra.mrb[44].mxu1 %vm771_vm0, %v7286_v36 }
 0xae6   : > { %7413 = vmatprep.mubr.bf16.mxu1 %v10661_v0 }
 0xaed   : > { %8141 = vmatmul.mubr.msk.bf16.gmra.mrb[48].mxu1 %vm771_vm0, %v7287_v29 }
 0xaee   : > { %7423 = vmatprep.mubr.bf16.mxu1 %v10661_v0 }
 0xaf5   : > { %8142 = vmatmul.mubr.msk.bf16.gmra.mrb[52].mxu1 %vm771_vm0, %v7288_v1 }
 0xbb0   : > { %v7395_v50 = vpop.f32.mrb[40].mxu1 }
 0xbb1   : > { %v7396_v51 = vadd.f32 %v7395_v50, %v7302_v49  ;;  %v7397_v52 = vpop.f32.mrb[41].mxu1 }
 0xbb2   : > { %v7398_v53 = vadd.f32 %v7397_v52, %v7306_v39  ;;  %v7399_v55 = vpop.f32.mrb[42].mxu1 }
 0xbb3   : > { %v7434_v56 = vmax.f32 %v7396_v51, 0.0  ;;  %v7400_v57 = vadd.f32 %v7399_v55, %v7302_v49  ;;  %v7401_v58 = vpop.f32.mrb[43].mxu1 }
 0xbb4   : > { %v7435_v61 = vmax.f32 %v7398_v53, 0.0  ;;  %v7402_v62 = vadd.f32 %v7401_v58, %v7306_v39 }
 0xbb5   : > { %7450 = vst [vmem:[%s12063_s17] sm:$0xff] %v7434_v56  ;;  %v7436_v63 = vmax.f32 %v7400_v57, 0.0 }
 0xbb6   : > { %8143 = vst [vmem:[%s12063_s17 + $0x8] sm:$0xff] %v7435_v61  ;;  %v7437_v0 = vmax.f32 %v7402_v62, 0.0 }
 0xbb7   : > { %7451 = vst [vmem:[%s12063_s17 + $0x10] sm:$0xff] %v7436_v63 }
 0xbb8   : > { %8144 = vst [vmem:[%s12063_s17 + $0x18] sm:$0xff] %v7437_v0  ;;  %v7405_v2 = vpop.f32.mrb[44].mxu1 }
 0xbb9   : > { %v7406_v54 = vadd.f32 %v7405_v2, %v7302_v49  ;;  %v7407_v4 = vpop.f32.mrb[45].mxu1 }
 0xbba   : > { %v7408_v59 = vadd.f32 %v7407_v4, %v7306_v39  ;;  %v7409_v48 = vpop.f32.mrb[46].mxu1 }
 0xbbb   : > { %v7438_v5 = vmax.f32 %v7406_v54, 0.0  ;;  %v7410_v7 = vadd.f32 %v7409_v48, %v7302_v49  ;;  %v7411_v8 = vpop.f32.mrb[47].mxu1 }
 0xbbc   : > { %v7439_v11 = vmax.f32 %v7408_v59, 0.0  ;;  %v7412_v35 = vadd.f32 %v7411_v8, %v7306_v39 }
 0xbbd   : > { %7452 = vst [vmem:[%s12063_s17 + $0x20] sm:$0xff] %v7438_v5  ;;  %v7440_v12 = vmax.f32 %v7410_v7, 0.0 }
 0xbbe   : > { %8145 = vst [vmem:[%s12063_s17 + $0x28] sm:$0xff] %v7439_v11  ;;  %v7441_v16 = vmax.f32 %v7412_v35, 0.0 }
 0xbbf   : > { %7453 = vst [vmem:[%s12063_s17 + $0x30] sm:$0xff] %v7440_v12 }
 0xbc0   : > { %8146 = vst [vmem:[%s12063_s17 + $0x38] sm:$0xff] %v7441_v16  ;;  %v7415_v22 = vpop.f32.mrb[48].mxu1 }
 0xbc1   : > { %v7416_v26 = vadd.f32 %v7415_v22, %v7302_v49  ;;  %v7417_v14 = vpop.f32.mrb[49].mxu1 }
 0xbc2   : > { %v7418_v27 = vadd.f32 %v7417_v14, %v7306_v39  ;;  %v7419_v28 = vpop.f32.mrb[50].mxu1 }
 0xbc3   : > { %v7442_v30 = vmax.f32 %v7416_v26, 0.0  ;;  %v7420_v10 = vadd.f32 %v7419_v28, %v7302_v49  ;;  %v7421_v19 = vpop.f32.mrb[51].mxu1 }
 0xbc4   : > { %v7443_v13 = vmax.f32 %v7418_v27, 0.0  ;;  %v7422_v3 = vadd.f32 %v7421_v19, %v7306_v39 }
 0xbc5   : > { %7454 = vst [vmem:[%s12063_s17 + $0x40] sm:$0xff] %v7442_v30  ;;  %v7444_v17 = vmax.f32 %v7420_v10, 0.0 }
 0xbc6   : > { %8147 = vst [vmem:[%s12063_s17 + $0x48] sm:$0xff] %v7443_v13  ;;  %v7445_v20 = vmax.f32 %v7422_v3, 0.0 }
 0xbc7   : > { %7455 = vst [vmem:[%s12063_s17 + $0x50] sm:$0xff] %v7444_v17 }
 0xbc8   : > { %8148 = vst [vmem:[%s12063_s17 + $0x58] sm:$0xff] %v7445_v20  ;;  %v7425_v21 = vpop.f32.mrb[52].mxu1 }
 0xbc9   : > { %v7426_v6 = vadd.f32 %v7425_v21, %v7302_v49  ;;  %v7427_v31 = vpop.f32.mrb[53].mxu1 }
 0xbca   : > { %v7428_v60 = vadd.f32 %v7427_v31, %v7306_v39  ;;  %v7429_v32 = vpop.f32.mrb[54].mxu1 }
 0xbcb   : > { %v7446_v34 = vmax.f32 %v7426_v6, 0.0  ;;  %v7430_v9 = vadd.f32 %v7429_v32, %v7302_v49  ;;  %v7431_v37 = vpop.f32.mrb[55].mxu1 }
 0xbcc   : > { %v7447_v38 = vmax.f32 %v7428_v60, 0.0  ;;  %v7432_v40 = vadd.f32 %v7431_v37, %v7306_v39 }
 0xbcd   : > { %7456 = vst [vmem:[%s12063_s17 + $0x60] sm:$0xff] %v7446_v34  ;;  %v7448_v42 = vmax.f32 %v7430_v9, 0.0 }
 0xbce   : > { %8149 = vst [vmem:[%s12063_s17 + $0x68] sm:$0xff] %v7447_v38  ;;  %v7449_v43 = vmax.f32 %v7432_v40, 0.0 }
 0xbcf   : > { %7457 = vst [vmem:[%s12063_s17 + $0x70] sm:$0xff] %v7448_v42 }
 0xbd0   : > { %8150 = vst [vmem:[%s12063_s17 + $0x78] sm:$0xff] %v7449_v43 }
 0xbd1 PF: > { %s12153_s8 = sld [smem:[#allocation38_spill]] }
 0xbd7   : > { %s36_s24 = sadd.s32 1, %s12153_s8  }
 0xbd8   : > { %p33_p5 = scmp.ge.s32.totalorder %s36_s24, 4  }
 0xbda   :  { %35 = sbr.rel (!%p33_p5) target bundleno = 18 (0x12), region = 226 }
 0xbe1   :  { %7488 = vsyncpa [#allocation5], 1 }
 0xbe2   :  { %7490 = vsyncpa [#allocation5 + $0x1], 1 }
 0xbe3   :  { %7491 = vsyncpa [#allocation7], 1 }
 0xbe4   :  { %7492 = vsyncpa [#allocation10], 1 }
 0xbe5   :  { %7493 = vsyncpa [#allocation13], 1 }
 0xbe6   :  { %7494 = vsyncpa [#allocation16], 1 }
 0xbe7   :  { %7495 = vsyncpa [#allocation19], 1 }
 0xbe8   :  { %7496 = vsyncpa [#allocation22], 1 }
 0xbe9   :  { %7497 = vsyncpa [#allocation25], 1 }
 0xbea   :  { %7498 = vsyncpa [#allocation28], 1 }

</bundles_post_ra>
